<compile_context>
chip_gen: v5e
topology: v5e:2x2
jax: 0.10.0
libtpu: 0.0.40
codegen_flags: <defaults>
</compile_context>

<pallas_src>
import jax
import jax.numpy as jnp
from jax.experimental import pallas as pl
from jax.experimental.pallas import tpu as pltpu

NEG_INF = -1e30


def _ceil_to(x, m):
    return ((x + m - 1) // m) * m


def _gru_cell(x, h, wih, whh, bih, bhh):
    """PyTorch-semantics GRU cell; bf16 matmul operands, f32 accumulation."""
    H = whh.shape[0]
    gi = jnp.dot(x, wih, preferred_element_type=jnp.float32) + bih
    gh = jnp.dot(h.astype(jnp.bfloat16), whh,
                 preferred_element_type=jnp.float32) + bhh
    r = jax.nn.sigmoid(gi[:, :H] + gh[:, :H])
    z = jax.nn.sigmoid(gi[:, H:2 * H] + gh[:, H:2 * H])
    n = jnp.tanh(gi[:, 2 * H:] + r * gh[:, 2 * H:])
    return (1.0 - z) * n + z * h


# ------------------------------ encoder kernel -------------------------------

def encoder_kernel(x_ref, m_ref, wih_ref, whh_ref, bih_ref, bhh_ref,
                   out_ref, hfin_ref, h_scr):
    """GRU over one chunk of timesteps; grid axis 0 walks time chunks.

    Inputs are time-major (chunk, B, E); the encoder-output block is written
    batch-major (B, chunk, H) so the decoder attention gets (B, S, H) with no
    host-side transpose between the two pallas_calls.
    """
    @pl.when(pl.program_id(0) == 0)
    def _():
        h_scr[...] = jnp.zeros_like(h_scr)

    wih = wih_ref[...]          # (E, 3H) bf16, resident
    whh = whh_ref[...]          # (H, 3H) bf16, resident
    bih = bih_ref[...]          # (1, 3H) f32
    bhh = bhh_ref[...]          # (1, 3H) f32
    chunk = x_ref.shape[0]

    h = h_scr[...]              # (B, H) f32 carry
    for t in range(chunk):      # static unroll of the short fixed chunk
        h_new = _gru_cell(x_ref[t], h, wih, whh, bih, bhh)
        # pack_padded_sequence emulation: freeze hidden past each row's length.
        m = m_ref[t]            # (B, 1) f32
        h = m * h_new + (1.0 - m) * h
        out_ref[:, t, :] = h.astype(out_ref.dtype)     # batch-major store
    h_scr[...] = h

    @pl.when(pl.program_id(0) == pl.num_programs(0) - 1)
    def _():
        hfin_ref[...] = h       # final hidden stored once, on the last chunk


def run_encoder(x_emb, mask3, params, time_chunk=8):
    # TODO(synk): raise time_chunk to 16-32 (128 MiB VMEM parts, v5e/v6e);
    # keep the resident footprint small on v7x (64 MiB VMEM).
    Sp, Bp, Ep = x_emb.shape
    Hp = params['enc_whh'].shape[0]
    enc_bt, h_fin = pl.pallas_call(
        encoder_kernel,
        out_shape=(jax.ShapeDtypeStruct((Bp, Sp, Hp), jnp.bfloat16),
                   jax.ShapeDtypeStruct((Bp, Hp), jnp.float32)),
        grid_spec=pltpu.PrefetchScalarGridSpec(
            num_scalar_prefetch=0,
            grid=(Sp // time_chunk,),
            in_specs=[
                pl.BlockSpec((time_chunk, Bp, Ep), lambda c: (c, 0, 0)),
                pl.BlockSpec((time_chunk, Bp, 1), lambda c: (c, 0, 0)),
                # Resident (constant index_map) weights.
                # TODO(synk): pipeline_mode=pl.Buffered(1) here to drop the
                # default double-buffer on never-changing blocks (v7x VMEM).
                pl.BlockSpec((Ep, 3 * Hp), lambda c: (0, 0)),
                pl.BlockSpec((Hp, 3 * Hp), lambda c: (0, 0)),
                pl.BlockSpec((1, 3 * Hp), lambda c: (0, 0)),
                pl.BlockSpec((1, 3 * Hp), lambda c: (0, 0)),
            ],
            out_specs=[
                pl.BlockSpec((Bp, time_chunk, Hp), lambda c: (0, c, 0)),
                pl.BlockSpec((Bp, Hp), lambda c: (0, 0)),
            ],
            scratch_shapes=[pltpu.VMEM((Bp, Hp), jnp.float32)],
        ),
        compiler_params=pltpu.CompilerParams(
            dimension_semantics=("arbitrary",)),
    )(x_emb, mask3, params['enc_wih'], params['enc_whh'],
      params['enc_bih'], params['enc_bhh'])
    return enc_bt, h_fin


# ------------------------------ decoder kernel -------------------------------

def decoder_kernel(x_ref, h0_ref, enc_ref, amask_ref,
                   wih_ref, whh_ref, bih_ref, bhh_ref,
                   h_out_ref, ctx_out_ref, h_scr):
    """One chunk of decoder timesteps per grid step.

    The GRU recurrence is serial inside the chunk; attention for the whole
    chunk is then two batched MXU contractions over the resident encoder
    outputs.  The vocab projection / log-softmax are hoisted into the separate
    projection kernel, so this kernel only emits (B, chunk, H) hidden/context
    streams (bf16) per step.
    """
    @pl.when(pl.program_id(0) == 0)
    def _():
        h_scr[...] = h0_ref[...]            # seed with the encoder final hidden

    wih = wih_ref[...]
    whh = whh_ref[...]
    bih = bih_ref[...]
    bhh = bhh_ref[...]
    enc = enc_ref[...]                      # (B, S, H) bf16, resident
    chunk = x_ref.shape[0]

    h = h_scr[...]                          # (B, H) f32
    for t in range(chunk):                  # serial GRU recurrence
        h = _gru_cell(x_ref[t], h, wih, whh, bih, bhh)
        h_out_ref[:, t, :] = h.astype(h_out_ref.dtype)
    h_scr[...] = h

    # Chunk-batched masked dot-product attention on the MXU.
    q = h_out_ref[...]                                          # (B, chunk, H) bf16
    scores = jnp.einsum('bth,bsh->bts', q, enc,
                        preferred_element_type=jnp.float32)     # (B, chunk, S)
    scores = scores + amask_ref[...]                            # additive 0 / -1e30
    smax = jnp.max(scores, axis=-1, keepdims=True)
    p = jnp.exp(scores - smax)
    attn = p / jnp.sum(p, axis=-1, keepdims=True)               # exact softmax
    ctx = jnp.einsum('bts,bsh->bth', attn.astype(jnp.bfloat16), enc,
                     preferred_element_type=jnp.float32)        # (B, chunk, H) f32
    ctx_out_ref[...] = ctx.astype(ctx_out_ref.dtype)


def run_decoder(dec_in, h0, enc_bt, amask3, params, time_chunk=8):
    Tpad, Bp, Ep = dec_in.shape
    _, Sp, Hp = enc_bt.shape
    # TODO(synk): on v7x add a leading 'parallel' batch grid axis (Bp/2 per
    # block) so each of the two TensorCores runs half the batch recurrence.
    h_seq, ctx_seq = pl.pallas_call(
        decoder_kernel,
        out_shape=(jax.ShapeDtypeStruct((Bp, Tpad, Hp), jnp.bfloat16),
                   jax.ShapeDtypeStruct((Bp, Tpad, Hp), jnp.bfloat16)),
        grid_spec=pltpu.PrefetchScalarGridSpec(
            num_scalar_prefetch=0,
            grid=(Tpad // time_chunk,),
            in_specs=[
                pl.BlockSpec((time_chunk, Bp, Ep), lambda c: (c, 0, 0)),
                # Resident (constant index_map) operands.
                # TODO(synk): pipeline_mode=pl.Buffered(1) on enc_out / weights
                # to halve the resident VMEM footprint (critical on v7x 64 MiB).
                pl.BlockSpec((Bp, Hp), lambda c: (0, 0)),
                pl.BlockSpec((Bp, Sp, Hp), lambda c: (0, 0, 0)),
                pl.BlockSpec((Bp, time_chunk, Sp), lambda c: (0, 0, 0)),
                pl.BlockSpec((Ep, 3 * Hp), lambda c: (0, 0)),
                pl.BlockSpec((Hp, 3 * Hp), lambda c: (0, 0)),
                pl.BlockSpec((1, 3 * Hp), lambda c: (0, 0)),
                pl.BlockSpec((1, 3 * Hp), lambda c: (0, 0)),
            ],
            out_specs=[
                pl.BlockSpec((Bp, time_chunk, Hp), lambda c: (0, c, 0)),
                pl.BlockSpec((Bp, time_chunk, Hp), lambda c: (0, c, 0)),
            ],
            scratch_shapes=[pltpu.VMEM((Bp, Hp), jnp.float32)],
        ),
        compiler_params=pltpu.CompilerParams(
            dimension_semantics=("arbitrary",)),
    )(dec_in, h0, enc_bt, amask3,
      params['dec_wih'], params['dec_whh'], params['dec_bih'], params['dec_bhh'])
    return h_seq, ctx_seq


# --------------------- hoisted projection + log-softmax ----------------------

def projection_kernel(h_ref, c_ref, wh_ref, wc_ref, b_ref, logp_ref):
    """Time-batched [hidden ; context] -> vocab projection + log-softmax.

    wout is kept as two (H, V) halves so no per-row concat is materialized;
    same total MXU work as the fused (2H, V) matmul.
    """
    logits = (jnp.dot(h_ref[...], wh_ref[...], preferred_element_type=jnp.float32)
              + jnp.dot(c_ref[...], wc_ref[...], preferred_element_type=jnp.float32)
              + b_ref[...])
    lmax = jnp.max(logits, axis=-1, keepdims=True)
    lse = lmax + jnp.log(jnp.sum(jnp.exp(logits - lmax), axis=-1, keepdims=True))
    logp_ref[...] = logits - lse
    # TODO(synk): at realistic vocab sizes tile the V axis (two-pass LSE) and/or
    # emit bf16 or an in-kernel NLL gather to cut the (T*B,V) f32 writeback.


def run_projection(h_flat, ctx_flat, params, row_tile):
    N, Hp = h_flat.shape
    Vp = params['wout_h'].shape[-1]
    return pl.pallas_call(
        projection_kernel,
        out_shape=jax.ShapeDtypeStruct((N, Vp), jnp.float32),
        grid_spec=pltpu.PrefetchScalarGridSpec(
            num_scalar_prefetch=0,
            grid=(N // row_tile,),
            in_specs=[
                pl.BlockSpec((row_tile, Hp), lambda i: (i, 0)),
                pl.BlockSpec((row_tile, Hp), lambda i: (i, 0)),
                pl.BlockSpec((Hp, Vp), lambda i: (0, 0)),
                pl.BlockSpec((Hp, Vp), lambda i: (0, 0)),
                pl.BlockSpec((1, Vp), lambda i: (0, 0)),
            ],
            out_specs=pl.BlockSpec((row_tile, Vp), lambda i: (i, 0)),
        ),
        compiler_params=pltpu.CompilerParams(
            dimension_semantics=("parallel",)),
    )(h_flat, ctx_flat, params['wout_h'], params['wout_c'], params['bout'])


# ------------------------------- Seq2Seq glue --------------------------------

def init_params(key, V, E, H):
    """Pre-padded (lane/sublane aligned), pre-fused, bf16 matmul weights."""
    Vp, Ep, Hp = _ceil_to(V, 128), _ceil_to(E, 128), _ceil_to(H, 128)
    keys = jax.random.split(key, 7)
    rnd = lambda k, shape: 0.1 * jax.random.normal(k, shape, jnp.float32)

    def pad2(w, r, c):
        return jnp.pad(w, ((0, r - w.shape[0]), (0, c - w.shape[1])))

    def gru_weight(k, in_dim, in_pad):      # fused [r | z | n] -> (in_pad, 3Hp)
        ks = jax.random.split(k, 3)
        gates = [pad2(rnd(kk, (in_dim, H)), in_pad, Hp) for kk in ks]
        return jnp.concatenate(gates, axis=1).astype(jnp.bfloat16)

    emb = pad2(rnd(keys[0], (V, E)), Vp, Ep).astype(jnp.bfloat16)
    wout_h = pad2(rnd(keys[5], (H, V)), Hp, Vp).astype(jnp.bfloat16)
    wout_c = pad2(rnd(keys[6], (H, V)), Hp, Vp).astype(jnp.bfloat16)
    # Zero bias on real vocab, -1e30 on padded columns (killed by the softmax).
    bout = jnp.where(jnp.arange(Vp) < V, 0.0, NEG_INF)[None, :].astype(jnp.float32)
    zeros_b = jnp.zeros((1, 3 * Hp), jnp.float32)

    return dict(
        num_words=V,                        # logical vocab size (python int)
        embedding=emb,
        enc_wih=gru_weight(keys[1], E, Ep), enc_whh=gru_weight(keys[2], H, Hp),
        enc_bih=zeros_b, enc_bhh=zeros_b,
        dec_wih=gru_weight(keys[3], E, Ep), dec_whh=gru_weight(keys[4], H, Hp),
        dec_bih=zeros_b, dec_bhh=zeros_b,
        wout_h=wout_h, wout_c=wout_c, bout=bout,
    )


def seq2seq_forward(params, input_seq, input_lens, target_seq, target_lens=None,
                    enc_chunk=8, dec_chunk=8):
    """Mirrors Seq2Seq.forward: returns probas of shape (T, B, V); probas[0]==0."""
    S, B = input_seq.shape
    T = target_seq.shape[0]
    V = params['num_words']
    Vp = params['wout_h'].shape[-1]
    Hp = params['enc_whh'].shape[0]

    Bp = _ceil_to(B, 8)
    Sp = _ceil_to(S, enc_chunk)
    Tpad = _ceil_to(T - 1, dec_chunk)

    # Pad batch / source time; padded tokens use id 0, padded lengths are 0.
    inp = jnp.pad(input_seq, ((0, Sp - S), (0, Bp - B)))
    lens = jnp.pad(input_lens, (0, Bp - B))
    tgt = jnp.pad(target_seq, ((0, 0), (0, Bp - B)))

    # Embedding gathers stay in plain JAX (XLA gather).
    x_emb = params['embedding'][inp]                                   # (Sp,Bp,Ep) bf16
    step_mask = (jnp.arange(Sp)[:, None] < lens[None, :]).astype(jnp.float32)

    enc_bt, enc_h = run_encoder(x_emb, step_mask[..., None], params,
                                time_chunk=enc_chunk)                  # (Bp,Sp,Hp)

    # Additive attention mask, pre-broadcast over the chunk axis so the kernel
    # does a plain add (no compare/select, no in-kernel reshape).
    amask = jnp.where(jnp.arange(Sp)[None, :] < lens[:, None], 0.0, NEG_INF)
    amask3 = jnp.broadcast_to(amask[:, None, :].astype(jnp.float32),
                              (Bp, dec_chunk, Sp))

    # Teacher forcing: output step t (t=1..T-1) consumes target_seq[t-1].
    dec_in = params['embedding'][tgt[:T - 1]]                          # (T-1,Bp,Ep)
    dec_in = jnp.pad(dec_in, ((0, Tpad - (T - 1)), (0, 0), (0, 0)))

    h_seq, ctx_seq = run_decoder(dec_in, enc_h, enc_bt, amask3, params,
                                 time_chunk=dec_chunk)                 # (Bp,Tpad,Hp)

    # Hoisted, time-batched vocab projection + log-softmax over all rows.
    row_tile = Bp * dec_chunk
    logp_flat = run_projection(h_seq.reshape(Bp * Tpad, Hp),
                               ctx_seq.reshape(Bp * Tpad, Hp),
                               params, row_tile)                       # (Bp*Tpad,Vp)

    logp = jnp.transpose(logp_flat.reshape(Bp, Tpad, Vp), (1, 0, 2))[:T - 1]
    probas = jnp.concatenate(
        [jnp.zeros((1, Bp, Vp), jnp.float32), logp], axis=0)           # (T,Bp,Vp)
    return probas[:, :B, :V]


# ----------------------------------- main ------------------------------------

if __name__ == "__main__":
    V, E, H = 32, 16, 32       # vocab, embedding, hidden (logical sizes)
    S, B, T = 24, 2, 20        # src len, batch, tgt len

    key = jax.random.PRNGKey(0)
    kp, ki, kt = jax.random.split(key, 3)
    params = init_params(kp, V, E, H)

    input_seq = jax.random.randint(ki, (S, B), 0, V, dtype=jnp.int32)   # (S, B)
    input_lens = jnp.array([S, S - 5], dtype=jnp.int32)
    target_seq = jax.random.randint(kt, (T, B), 0, V, dtype=jnp.int32)  # (T, B)
    target_lens = jnp.array([T, T - 3], dtype=jnp.int32)

    probas = seq2seq_forward(params, input_seq, input_lens, target_seq, target_lens)
    probas = jax.block_until_ready(probas)

    assert probas.shape == (T, B, V)
    assert bool(jnp.all(jnp.isfinite(probas)))
    assert bool(jnp.all(probas[0] == 0.0))           # probas[0] stays zero
    # rows t>=1 are log-probabilities: each should sum to ~1 after exp
    row_sums = jnp.exp(probas[1:]).sum(-1)
    assert bool(jnp.allclose(row_sums, 1.0, atol=1e-4))
    print("KERNEL_OK")
</pallas_src>

<mosaic_0001>
module attributes {stable_mosaic.version = 11 : i64} {
  func.func @encoder_kernel(%arg0: i32, %arg1: memref<8x8x128xbf16, #tpu.memory_space<vmem>>, %arg2: memref<8x8x1xf32, #tpu.memory_space<vmem>>, %arg3: memref<128x384xbf16, #tpu.memory_space<vmem>>, %arg4: memref<128x384xbf16, #tpu.memory_space<vmem>>, %arg5: memref<1x384xf32, #tpu.memory_space<vmem>>, %arg6: memref<1x384xf32, #tpu.memory_space<vmem>>, %arg7: memref<8x8x128xbf16, #tpu.memory_space<vmem>>, %arg8: memref<8x128xf32, #tpu.memory_space<vmem>>, %arg9: memref<8x128xf32, #tpu.memory_space<vmem>>) attributes {dimension_semantics = [#tpu.dimension_semantics<arbitrary>], iteration_bounds = array<i64: 3>, scalar_prefetch = 0 : i64, scratch_operands = 1 : i64, tpu.core_type = #tpu.core_type<tc>, window_params = [{transform_indices = @transform_0, window_bounds = array<i64: 8, 8, 128>}, {transform_indices = @transform_1, window_bounds = array<i64: 8, 8, 1>}, {pipeline_mode = #tpu.pipeline_mode<synchronous>, transform_indices = @transform_2, window_bounds = array<i64: 128, 384>}, {pipeline_mode = #tpu.pipeline_mode<synchronous>, transform_indices = @transform_3, window_bounds = array<i64: 128, 384>}, {pipeline_mode = #tpu.pipeline_mode<synchronous>, transform_indices = @transform_4, window_bounds = array<i64: 1, 384>}, {pipeline_mode = #tpu.pipeline_mode<synchronous>, transform_indices = @transform_5, window_bounds = array<i64: 1, 384>}, {transform_indices = @transform_6, window_bounds = array<i64: 8, 8, 128>}, {pipeline_mode = #tpu.pipeline_mode<synchronous>, transform_indices = @transform_7, window_bounds = array<i64: 8, 128>}]} {
    %c0_i32 = arith.constant 0 : i32
    %0 = arith.cmpi eq, %arg0, %c0_i32 : i32
    %1 = arith.extui %0 : i1 to i32
    %c0_i32_0 = arith.constant 0 : i32
    %2 = arith.cmpi ne, %1, %c0_i32_0 : i32
    scf.if %2 {
      %cst_125 = arith.constant 0.000000e+00 : f32
      %396 = vector.broadcast %cst_125 : f32 to vector<8x128xf32>
      %c0_126 = arith.constant 0 : index
      %c0_127 = arith.constant 0 : index
      %397 = vector.load %arg9[%c0_126, %c0_127] : memref<8x128xf32, #tpu.memory_space<vmem>>, vector<8x128xf32>
      tpu.vector_store %arg9[%c0_126, %c0_127], %396 {strides = array<i32>} : memref<8x128xf32, #tpu.memory_space<vmem>>, vector<8x128xf32>,
    } else {
    }
    %c0 = arith.constant 0 : index
    %c0_1 = arith.constant 0 : index
    %3 = vector.load %arg3[%c0, %c0_1] : memref<128x384xbf16, #tpu.memory_space<vmem>>, vector<128x384xbf16>
    %c0_2 = arith.constant 0 : index
    %c0_3 = arith.constant 0 : index
    %4 = vector.load %arg4[%c0_2, %c0_3] : memref<128x384xbf16, #tpu.memory_space<vmem>>, vector<128x384xbf16>
    %c0_4 = arith.constant 0 : index
    %c0_5 = arith.constant 0 : index
    %5 = vector.load %arg5[%c0_4, %c0_5] : memref<1x384xf32, #tpu.memory_space<vmem>>, vector<1x384xf32>
    %c0_6 = arith.constant 0 : index
    %c0_7 = arith.constant 0 : index
    %6 = vector.load %arg6[%c0_6, %c0_7] : memref<1x384xf32, #tpu.memory_space<vmem>>, vector<1x384xf32>
    %c0_8 = arith.constant 0 : index
    %c0_9 = arith.constant 0 : index
    %7 = vector.load %arg9[%c0_8, %c0_9] : memref<8x128xf32, #tpu.memory_space<vmem>>, vector<8x128xf32>
    %c0_10 = arith.constant 0 : index
    %c0_11 = arith.constant 0 : index
    %c0_12 = arith.constant 0 : index
    %8 = vector.load %arg1[%c0_10, %c0_11, %c0_12] : memref<8x8x128xbf16, #tpu.memory_space<vmem>>, vector<1x8x128xbf16>
    %9 = vector.shape_cast %8 : vector<1x8x128xbf16> to vector<8x128xbf16>
    %cst = arith.constant dense<0.000000e+00> : vector<8x384xf32>
    %10 = tpu.matmul %9, %3, %cst {dimension_numbers = #tpu.dot_dimension_numbers<[1], [0], [0], [1], [0, 0, 1, 1], [], []>} : vector<8x128xbf16>, vector<128x384xbf16>, vector<8x384xf32> -> vector<8x384xf32>
    %11 = vector.broadcast %5 : vector<1x384xf32> to vector<8x384xf32>
    %12 = arith.addf %10, %11 : vector<8x384xf32>
    %13 = arith.truncf %7 : vector<8x128xf32> to vector<8x128xbf16>
    %cst_13 = arith.constant dense<0.000000e+00> : vector<8x384xf32>
    %14 = tpu.matmul %13, %4, %cst_13 {dimension_numbers = #tpu.dot_dimension_numbers<[1], [0], [0], [1], [0, 0, 1, 1], [], []>} : vector<8x128xbf16>, vector<128x384xbf16>, vector<8x384xf32> -> vector<8x384xf32>
    %15 = vector.broadcast %6 : vector<1x384xf32> to vector<8x384xf32>
    %16 = arith.addf %14, %15 : vector<8x384xf32>
    %17 = vector.extract_strided_slice %12 {offsets = [0, 0], sizes = [8, 128], strides = [1, 1]} : vector<8x384xf32> to vector<8x128xf32>
    %18 = vector.extract_strided_slice %16 {offsets = [0, 0], sizes = [8, 128], strides = [1, 1]} : vector<8x384xf32> to vector<8x128xf32>
    %19 = arith.addf %17, %18 : vector<8x128xf32>
    %20 = arith.negf %19 : vector<8x128xf32>
    %21 = math.exp %20 : vector<8x128xf32>
    %cst_14 = arith.constant 1.000000e+00 : f32
    %22 = vector.broadcast %cst_14 : f32 to vector<8x128xf32>
    %23 = arith.addf %22, %21 : vector<8x128xf32>
    %24 = arith.divf %22, %23 : vector<8x128xf32>
    %25 = vector.extract_strided_slice %12 {offsets = [0, 128], sizes = [8, 128], strides = [1, 1]} : vector<8x384xf32> to vector<8x128xf32>
    %26 = vector.extract_strided_slice %16 {offsets = [0, 128], sizes = [8, 128], strides = [1, 1]} : vector<8x384xf32> to vector<8x128xf32>
    %27 = arith.addf %25, %26 : vector<8x128xf32>
    %28 = arith.negf %27 : vector<8x128xf32>
    %29 = math.exp %28 : vector<8x128xf32>
    %cst_15 = arith.constant 1.000000e+00 : f32
    %30 = vector.broadcast %cst_15 : f32 to vector<8x128xf32>
    %31 = arith.addf %30, %29 : vector<8x128xf32>
    %32 = arith.divf %30, %31 : vector<8x128xf32>
    %33 = vector.extract_strided_slice %12 {offsets = [0, 256], sizes = [8, 128], strides = [1, 1]} : vector<8x384xf32> to vector<8x128xf32>
    %34 = vector.extract_strided_slice %16 {offsets = [0, 256], sizes = [8, 128], strides = [1, 1]} : vector<8x384xf32> to vector<8x128xf32>
    %35 = arith.mulf %24, %34 : vector<8x128xf32>
    %36 = arith.addf %33, %35 : vector<8x128xf32>
    %37 = math.tanh %36 : vector<8x128xf32>
    %cst_16 = arith.constant 1.000000e+00 : f32
    %38 = vector.broadcast %cst_16 : f32 to vector<8x128xf32>
    %39 = arith.subf %38, %32 : vector<8x128xf32>
    %40 = arith.mulf %39, %37 : vector<8x128xf32>
    %41 = arith.mulf %32, %7 : vector<8x128xf32>
    %42 = arith.addf %40, %41 : vector<8x128xf32>
    %c0_17 = arith.constant 0 : index
    %c0_18 = arith.constant 0 : index
    %c0_19 = arith.constant 0 : index
    %43 = vector.load %arg2[%c0_17, %c0_18, %c0_19] : memref<8x8x1xf32, #tpu.memory_space<vmem>>, vector<1x8x1xf32>
    %44 = vector.shape_cast %43 : vector<1x8x1xf32> to vector<8x1xf32>
    %45 = vector.broadcast %44 : vector<8x1xf32> to vector<8x128xf32>
    %46 = arith.mulf %45, %42 : vector<8x128xf32>
    %cst_20 = arith.constant 1.000000e+00 : f32
    %47 = vector.broadcast %cst_20 : f32 to vector<8x1xf32>
    %48 = arith.subf %47, %44 : vector<8x1xf32>
    %49 = vector.broadcast %48 : vector<8x1xf32> to vector<8x128xf32>
    %50 = arith.mulf %49, %7 : vector<8x128xf32>
    %51 = arith.addf %46, %50 : vector<8x128xf32>
    %52 = arith.truncf %51 : vector<8x128xf32> to vector<8x128xbf16>
    %c0_21 = arith.constant 0 : index
    %c0_22 = arith.constant 0 : index
    %c0_23 = arith.constant 0 : index
    %53 = vector.load %arg7[%c0_21, %c0_22, %c0_23] : memref<8x8x128xbf16, #tpu.memory_space<vmem>>, vector<8x1x128xbf16>
    %54 = vector.shape_cast %53 : vector<8x1x128xbf16> to vector<8x128xbf16>
    %55 = vector.shape_cast %52 : vector<8x128xbf16> to vector<8x1x128xbf16>
    tpu.vector_store %arg7[%c0_21, %c0_22, %c0_23], %55 {strides = array<i32>} : memref<8x8x128xbf16, #tpu.memory_space<vmem>>, vector<8x1x128xbf16>,
    %c1 = arith.constant 1 : index
    %c0_24 = arith.constant 0 : index
    %c0_25 = arith.constant 0 : index
    %56 = vector.load %arg1[%c1, %c0_24, %c0_25] : memref<8x8x128xbf16, #tpu.memory_space<vmem>>, vector<1x8x128xbf16>
    %57 = vector.shape_cast %56 : vector<1x8x128xbf16> to vector<8x128xbf16>
    %cst_26 = arith.constant dense<0.000000e+00> : vector<8x384xf32>
    %58 = tpu.matmul %57, %3, %cst_26 {dimension_numbers = #tpu.dot_dimension_numbers<[1], [0], [0], [1], [0, 0, 1, 1], [], []>} : vector<8x128xbf16>, vector<128x384xbf16>, vector<8x384xf32> -> vector<8x384xf32>
    %59 = vector.broadcast %5 : vector<1x384xf32> to vector<8x384xf32>
    %60 = arith.addf %58, %59 : vector<8x384xf32>
    %61 = arith.truncf %51 : vector<8x128xf32> to vector<8x128xbf16>
    %cst_27 = arith.constant dense<0.000000e+00> : vector<8x384xf32>
    %62 = tpu.matmul %61, %4, %cst_27 {dimension_numbers = #tpu.dot_dimension_numbers<[1], [0], [0], [1], [0, 0, 1, 1], [], []>} : vector<8x128xbf16>, vector<128x384xbf16>, vector<8x384xf32> -> vector<8x384xf32>
    %63 = vector.broadcast %6 : vector<1x384xf32> to vector<8x384xf32>
    %64 = arith.addf %62, %63 : vector<8x384xf32>
    %65 = vector.extract_strided_slice %60 {offsets = [0, 0], sizes = [8, 128], strides = [1, 1]} : vector<8x384xf32> to vector<8x128xf32>
    %66 = vector.extract_strided_slice %64 {offsets = [0, 0], sizes = [8, 128], strides = [1, 1]} : vector<8x384xf32> to vector<8x128xf32>
    %67 = arith.addf %65, %66 : vector<8x128xf32>
    %68 = arith.negf %67 : vector<8x128xf32>
    %69 = math.exp %68 : vector<8x128xf32>
    %cst_28 = arith.constant 1.000000e+00 : f32
    %70 = vector.broadcast %cst_28 : f32 to vector<8x128xf32>
    %71 = arith.addf %70, %69 : vector<8x128xf32>
    %72 = arith.divf %70, %71 : vector<8x128xf32>
    %73 = vector.extract_strided_slice %60 {offsets = [0, 128], sizes = [8, 128], strides = [1, 1]} : vector<8x384xf32> to vector<8x128xf32>
    %74 = vector.extract_strided_slice %64 {offsets = [0, 128], sizes = [8, 128], strides = [1, 1]} : vector<8x384xf32> to vector<8x128xf32>
    %75 = arith.addf %73, %74 : vector<8x128xf32>
    %76 = arith.negf %75 : vector<8x128xf32>
    %77 = math.exp %76 : vector<8x128xf32>
    %cst_29 = arith.constant 1.000000e+00 : f32
    %78 = vector.broadcast %cst_29 : f32 to vector<8x128xf32>
    %79 = arith.addf %78, %77 : vector<8x128xf32>
    %80 = arith.divf %78, %79 : vector<8x128xf32>
    %81 = vector.extract_strided_slice %60 {offsets = [0, 256], sizes = [8, 128], strides = [1, 1]} : vector<8x384xf32> to vector<8x128xf32>
    %82 = vector.extract_strided_slice %64 {offsets = [0, 256], sizes = [8, 128], strides = [1, 1]} : vector<8x384xf32> to vector<8x128xf32>
    %83 = arith.mulf %72, %82 : vector<8x128xf32>
    %84 = arith.addf %81, %83 : vector<8x128xf32>
    %85 = math.tanh %84 : vector<8x128xf32>
    %cst_30 = arith.constant 1.000000e+00 : f32
    %86 = vector.broadcast %cst_30 : f32 to vector<8x128xf32>
    %87 = arith.subf %86, %80 : vector<8x128xf32>
    %88 = arith.mulf %87, %85 : vector<8x128xf32>
    %89 = arith.mulf %80, %51 : vector<8x128xf32>
    %90 = arith.addf %88, %89 : vector<8x128xf32>
    %c1_31 = arith.constant 1 : index
    %c0_32 = arith.constant 0 : index
    %c0_33 = arith.constant 0 : index
    %91 = vector.load %arg2[%c1_31, %c0_32, %c0_33] : memref<8x8x1xf32, #tpu.memory_space<vmem>>, vector<1x8x1xf32>
    %92 = vector.shape_cast %91 : vector<1x8x1xf32> to vector<8x1xf32>
    %93 = vector.broadcast %92 : vector<8x1xf32> to vector<8x128xf32>
    %94 = arith.mulf %93, %90 : vector<8x128xf32>
    %cst_34 = arith.constant 1.000000e+00 : f32
    %95 = vector.broadcast %cst_34 : f32 to vector<8x1xf32>
    %96 = arith.subf %95, %92 : vector<8x1xf32>
    %97 = vector.broadcast %96 : vector<8x1xf32> to vector<8x128xf32>
    %98 = arith.mulf %97, %51 : vector<8x128xf32>
    %99 = arith.addf %94, %98 : vector<8x128xf32>
    %100 = arith.truncf %99 : vector<8x128xf32> to vector<8x128xbf16>
    %c0_35 = arith.constant 0 : index
    %c1_36 = arith.constant 1 : index
    %c0_37 = arith.constant 0 : index
    %101 = vector.load %arg7[%c0_35, %c1_36, %c0_37] : memref<8x8x128xbf16, #tpu.memory_space<vmem>>, vector<8x1x128xbf16>
    %102 = vector.shape_cast %101 : vector<8x1x128xbf16> to vector<8x128xbf16>
    %103 = vector.shape_cast %100 : vector<8x128xbf16> to vector<8x1x128xbf16>
    tpu.vector_store %arg7[%c0_35, %c1_36, %c0_37], %103 {strides = array<i32>} : memref<8x8x128xbf16, #tpu.memory_space<vmem>>, vector<8x1x128xbf16>,
    %c2 = arith.constant 2 : index
    %c0_38 = arith.constant 0 : index
    %c0_39 = arith.constant 0 : index
    %104 = vector.load %arg1[%c2, %c0_38, %c0_39] : memref<8x8x128xbf16, #tpu.memory_space<vmem>>, vector<1x8x128xbf16>
    %105 = vector.shape_cast %104 : vector<1x8x128xbf16> to vector<8x128xbf16>
    %cst_40 = arith.constant dense<0.000000e+00> : vector<8x384xf32>
    %106 = tpu.matmul %105, %3, %cst_40 {dimension_numbers = #tpu.dot_dimension_numbers<[1], [0], [0], [1], [0, 0, 1, 1], [], []>} : vector<8x128xbf16>, vector<128x384xbf16>, vector<8x384xf32> -> vector<8x384xf32>
    %107 = vector.broadcast %5 : vector<1x384xf32> to vector<8x384xf32>
    %108 = arith.addf %106, %107 : vector<8x384xf32>
    %109 = arith.truncf %99 : vector<8x128xf32> to vector<8x128xbf16>
    %cst_41 = arith.constant dense<0.000000e+00> : vector<8x384xf32>
    %110 = tpu.matmul %109, %4, %cst_41 {dimension_numbers = #tpu.dot_dimension_numbers<[1], [0], [0], [1], [0, 0, 1, 1], [], []>} : vector<8x128xbf16>, vector<128x384xbf16>, vector<8x384xf32> -> vector<8x384xf32>
    %111 = vector.broadcast %6 : vector<1x384xf32> to vector<8x384xf32>
    %112 = arith.addf %110, %111 : vector<8x384xf32>
    %113 = vector.extract_strided_slice %108 {offsets = [0, 0], sizes = [8, 128], strides = [1, 1]} : vector<8x384xf32> to vector<8x128xf32>
    %114 = vector.extract_strided_slice %112 {offsets = [0, 0], sizes = [8, 128], strides = [1, 1]} : vector<8x384xf32> to vector<8x128xf32>
    %115 = arith.addf %113, %114 : vector<8x128xf32>
    %116 = arith.negf %115 : vector<8x128xf32>
    %117 = math.exp %116 : vector<8x128xf32>
    %cst_42 = arith.constant 1.000000e+00 : f32
    %118 = vector.broadcast %cst_42 : f32 to vector<8x128xf32>
    %119 = arith.addf %118, %117 : vector<8x128xf32>
    %120 = arith.divf %118, %119 : vector<8x128xf32>
    %121 = vector.extract_strided_slice %108 {offsets = [0, 128], sizes = [8, 128], strides = [1, 1]} : vector<8x384xf32> to vector<8x128xf32>
    %122 = vector.extract_strided_slice %112 {offsets = [0, 128], sizes = [8, 128], strides = [1, 1]} : vector<8x384xf32> to vector<8x128xf32>
    %123 = arith.addf %121, %122 : vector<8x128xf32>
    %124 = arith.negf %123 : vector<8x128xf32>
    %125 = math.exp %124 : vector<8x128xf32>
    %cst_43 = arith.constant 1.000000e+00 : f32
    %126 = vector.broadcast %cst_43 : f32 to vector<8x128xf32>
    %127 = arith.addf %126, %125 : vector<8x128xf32>
    %128 = arith.divf %126, %127 : vector<8x128xf32>
    %129 = vector.extract_strided_slice %108 {offsets = [0, 256], sizes = [8, 128], strides = [1, 1]} : vector<8x384xf32> to vector<8x128xf32>
    %130 = vector.extract_strided_slice %112 {offsets = [0, 256], sizes = [8, 128], strides = [1, 1]} : vector<8x384xf32> to vector<8x128xf32>
    %131 = arith.mulf %120, %130 : vector<8x128xf32>
    %132 = arith.addf %129, %131 : vector<8x128xf32>
    %133 = math.tanh %132 : vector<8x128xf32>
    %cst_44 = arith.constant 1.000000e+00 : f32
    %134 = vector.broadcast %cst_44 : f32 to vector<8x128xf32>
    %135 = arith.subf %134, %128 : vector<8x128xf32>
    %136 = arith.mulf %135, %133 : vector<8x128xf32>
    %137 = arith.mulf %128, %99 : vector<8x128xf32>
    %138 = arith.addf %136, %137 : vector<8x128xf32>
    %c2_45 = arith.constant 2 : index
    %c0_46 = arith.constant 0 : index
    %c0_47 = arith.constant 0 : index
    %139 = vector.load %arg2[%c2_45, %c0_46, %c0_47] : memref<8x8x1xf32, #tpu.memory_space<vmem>>, vector<1x8x1xf32>
    %140 = vector.shape_cast %139 : vector<1x8x1xf32> to vector<8x1xf32>
    %141 = vector.broadcast %140 : vector<8x1xf32> to vector<8x128xf32>
    %142 = arith.mulf %141, %138 : vector<8x128xf32>
    %cst_48 = arith.constant 1.000000e+00 : f32
    %143 = vector.broadcast %cst_48 : f32 to vector<8x1xf32>
    %144 = arith.subf %143, %140 : vector<8x1xf32>
    %145 = vector.broadcast %144 : vector<8x1xf32> to vector<8x128xf32>
    %146 = arith.mulf %145, %99 : vector<8x128xf32>
    %147 = arith.addf %142, %146 : vector<8x128xf32>
    %148 = arith.truncf %147 : vector<8x128xf32> to vector<8x128xbf16>
    %c0_49 = arith.constant 0 : index
    %c2_50 = arith.constant 2 : index
    %c0_51 = arith.constant 0 : index
    %149 = vector.load %arg7[%c0_49, %c2_50, %c0_51] : memref<8x8x128xbf16, #tpu.memory_space<vmem>>, vector<8x1x128xbf16>
    %150 = vector.shape_cast %149 : vector<8x1x128xbf16> to vector<8x128xbf16>
    %151 = vector.shape_cast %148 : vector<8x128xbf16> to vector<8x1x128xbf16>
    tpu.vector_store %arg7[%c0_49, %c2_50, %c0_51], %151 {strides = array<i32>} : memref<8x8x128xbf16, #tpu.memory_space<vmem>>, vector<8x1x128xbf16>,
    %c3 = arith.constant 3 : index
    %c0_52 = arith.constant 0 : index
    %c0_53 = arith.constant 0 : index
    %152 = vector.load %arg1[%c3, %c0_52, %c0_53] : memref<8x8x128xbf16, #tpu.memory_space<vmem>>, vector<1x8x128xbf16>
    %153 = vector.shape_cast %152 : vector<1x8x128xbf16> to vector<8x128xbf16>
    %cst_54 = arith.constant dense<0.000000e+00> : vector<8x384xf32>
    %154 = tpu.matmul %153, %3, %cst_54 {dimension_numbers = #tpu.dot_dimension_numbers<[1], [0], [0], [1], [0, 0, 1, 1], [], []>} : vector<8x128xbf16>, vector<128x384xbf16>, vector<8x384xf32> -> vector<8x384xf32>
    %155 = vector.broadcast %5 : vector<1x384xf32> to vector<8x384xf32>
    %156 = arith.addf %154, %155 : vector<8x384xf32>
    %157 = arith.truncf %147 : vector<8x128xf32> to vector<8x128xbf16>
    %cst_55 = arith.constant dense<0.000000e+00> : vector<8x384xf32>
    %158 = tpu.matmul %157, %4, %cst_55 {dimension_numbers = #tpu.dot_dimension_numbers<[1], [0], [0], [1], [0, 0, 1, 1], [], []>} : vector<8x128xbf16>, vector<128x384xbf16>, vector<8x384xf32> -> vector<8x384xf32>
    %159 = vector.broadcast %6 : vector<1x384xf32> to vector<8x384xf32>
    %160 = arith.addf %158, %159 : vector<8x384xf32>
    %161 = vector.extract_strided_slice %156 {offsets = [0, 0], sizes = [8, 128], strides = [1, 1]} : vector<8x384xf32> to vector<8x128xf32>
    %162 = vector.extract_strided_slice %160 {offsets = [0, 0], sizes = [8, 128], strides = [1, 1]} : vector<8x384xf32> to vector<8x128xf32>
    %163 = arith.addf %161, %162 : vector<8x128xf32>
    %164 = arith.negf %163 : vector<8x128xf32>
    %165 = math.exp %164 : vector<8x128xf32>
    %cst_56 = arith.constant 1.000000e+00 : f32
    %166 = vector.broadcast %cst_56 : f32 to vector<8x128xf32>
    %167 = arith.addf %166, %165 : vector<8x128xf32>
    %168 = arith.divf %166, %167 : vector<8x128xf32>
    %169 = vector.extract_strided_slice %156 {offsets = [0, 128], sizes = [8, 128], strides = [1, 1]} : vector<8x384xf32> to vector<8x128xf32>
    %170 = vector.extract_strided_slice %160 {offsets = [0, 128], sizes = [8, 128], strides = [1, 1]} : vector<8x384xf32> to vector<8x128xf32>
    %171 = arith.addf %169, %170 : vector<8x128xf32>
    %172 = arith.negf %171 : vector<8x128xf32>
    %173 = math.exp %172 : vector<8x128xf32>
    %cst_57 = arith.constant 1.000000e+00 : f32
    %174 = vector.broadcast %cst_57 : f32 to vector<8x128xf32>
    %175 = arith.addf %174, %173 : vector<8x128xf32>
    %176 = arith.divf %174, %175 : vector<8x128xf32>
    %177 = vector.extract_strided_slice %156 {offsets = [0, 256], sizes = [8, 128], strides = [1, 1]} : vector<8x384xf32> to vector<8x128xf32>
    %178 = vector.extract_strided_slice %160 {offsets = [0, 256], sizes = [8, 128], strides = [1, 1]} : vector<8x384xf32> to vector<8x128xf32>
    %179 = arith.mulf %168, %178 : vector<8x128xf32>
    %180 = arith.addf %177, %179 : vector<8x128xf32>
    %181 = math.tanh %180 : vector<8x128xf32>
    %cst_58 = arith.constant 1.000000e+00 : f32
    %182 = vector.broadcast %cst_58 : f32 to vector<8x128xf32>
    %183 = arith.subf %182, %176 : vector<8x128xf32>
    %184 = arith.mulf %183, %181 : vector<8x128xf32>
    %185 = arith.mulf %176, %147 : vector<8x128xf32>
    %186 = arith.addf %184, %185 : vector<8x128xf32>
    %c3_59 = arith.constant 3 : index
    %c0_60 = arith.constant 0 : index
    %c0_61 = arith.constant 0 : index
    %187 = vector.load %arg2[%c3_59, %c0_60, %c0_61] : memref<8x8x1xf32, #tpu.memory_space<vmem>>, vector<1x8x1xf32>
    %188 = vector.shape_cast %187 : vector<1x8x1xf32> to vector<8x1xf32>
    %189 = vector.broadcast %188 : vector<8x1xf32> to vector<8x128xf32>
    %190 = arith.mulf %189, %186 : vector<8x128xf32>
    %cst_62 = arith.constant 1.000000e+00 : f32
    %191 = vector.broadcast %cst_62 : f32 to vector<8x1xf32>
    %192 = arith.subf %191, %188 : vector<8x1xf32>
    %193 = vector.broadcast %192 : vector<8x1xf32> to vector<8x128xf32>
    %194 = arith.mulf %193, %147 : vector<8x128xf32>
    %195 = arith.addf %190, %194 : vector<8x128xf32>
    %196 = arith.truncf %195 : vector<8x128xf32> to vector<8x128xbf16>
    %c0_63 = arith.constant 0 : index
    %c3_64 = arith.constant 3 : index
    %c0_65 = arith.constant 0 : index
    %197 = vector.load %arg7[%c0_63, %c3_64, %c0_65] : memref<8x8x128xbf16, #tpu.memory_space<vmem>>, vector<8x1x128xbf16>
    %198 = vector.shape_cast %197 : vector<8x1x128xbf16> to vector<8x128xbf16>
    %199 = vector.shape_cast %196 : vector<8x128xbf16> to vector<8x1x128xbf16>
    tpu.vector_store %arg7[%c0_63, %c3_64, %c0_65], %199 {strides = array<i32>} : memref<8x8x128xbf16, #tpu.memory_space<vmem>>, vector<8x1x128xbf16>,
    %c4 = arith.constant 4 : index
    %c0_66 = arith.constant 0 : index
    %c0_67 = arith.constant 0 : index
    %200 = vector.load %arg1[%c4, %c0_66, %c0_67] : memref<8x8x128xbf16, #tpu.memory_space<vmem>>, vector<1x8x128xbf16>
    %201 = vector.shape_cast %200 : vector<1x8x128xbf16> to vector<8x128xbf16>
    %cst_68 = arith.constant dense<0.000000e+00> : vector<8x384xf32>
    %202 = tpu.matmul %201, %3, %cst_68 {dimension_numbers = #tpu.dot_dimension_numbers<[1], [0], [0], [1], [0, 0, 1, 1], [], []>} : vector<8x128xbf16>, vector<128x384xbf16>, vector<8x384xf32> -> vector<8x384xf32>
    %203 = vector.broadcast %5 : vector<1x384xf32> to vector<8x384xf32>
    %204 = arith.addf %202, %203 : vector<8x384xf32>
    %205 = arith.truncf %195 : vector<8x128xf32> to vector<8x128xbf16>
    %cst_69 = arith.constant dense<0.000000e+00> : vector<8x384xf32>
    %206 = tpu.matmul %205, %4, %cst_69 {dimension_numbers = #tpu.dot_dimension_numbers<[1], [0], [0], [1], [0, 0, 1, 1], [], []>} : vector<8x128xbf16>, vector<128x384xbf16>, vector<8x384xf32> -> vector<8x384xf32>
    %207 = vector.broadcast %6 : vector<1x384xf32> to vector<8x384xf32>
    %208 = arith.addf %206, %207 : vector<8x384xf32>
    %209 = vector.extract_strided_slice %204 {offsets = [0, 0], sizes = [8, 128], strides = [1, 1]} : vector<8x384xf32> to vector<8x128xf32>
    %210 = vector.extract_strided_slice %208 {offsets = [0, 0], sizes = [8, 128], strides = [1, 1]} : vector<8x384xf32> to vector<8x128xf32>
    %211 = arith.addf %209, %210 : vector<8x128xf32>
    %212 = arith.negf %211 : vector<8x128xf32>
    %213 = math.exp %212 : vector<8x128xf32>
    %cst_70 = arith.constant 1.000000e+00 : f32
    %214 = vector.broadcast %cst_70 : f32 to vector<8x128xf32>
    %215 = arith.addf %214, %213 : vector<8x128xf32>
    %216 = arith.divf %214, %215 : vector<8x128xf32>
    %217 = vector.extract_strided_slice %204 {offsets = [0, 128], sizes = [8, 128], strides = [1, 1]} : vector<8x384xf32> to vector<8x128xf32>
    %218 = vector.extract_strided_slice %208 {offsets = [0, 128], sizes = [8, 128], strides = [1, 1]} : vector<8x384xf32> to vector<8x128xf32>
    %219 = arith.addf %217, %218 : vector<8x128xf32>
    %220 = arith.negf %219 : vector<8x128xf32>
    %221 = math.exp %220 : vector<8x128xf32>
    %cst_71 = arith.constant 1.000000e+00 : f32
    %222 = vector.broadcast %cst_71 : f32 to vector<8x128xf32>
    %223 = arith.addf %222, %221 : vector<8x128xf32>
    %224 = arith.divf %222, %223 : vector<8x128xf32>
    %225 = vector.extract_strided_slice %204 {offsets = [0, 256], sizes = [8, 128], strides = [1, 1]} : vector<8x384xf32> to vector<8x128xf32>
    %226 = vector.extract_strided_slice %208 {offsets = [0, 256], sizes = [8, 128], strides = [1, 1]} : vector<8x384xf32> to vector<8x128xf32>
    %227 = arith.mulf %216, %226 : vector<8x128xf32>
    %228 = arith.addf %225, %227 : vector<8x128xf32>
    %229 = math.tanh %228 : vector<8x128xf32>
    %cst_72 = arith.constant 1.000000e+00 : f32
    %230 = vector.broadcast %cst_72 : f32 to vector<8x128xf32>
    %231 = arith.subf %230, %224 : vector<8x128xf32>
    %232 = arith.mulf %231, %229 : vector<8x128xf32>
    %233 = arith.mulf %224, %195 : vector<8x128xf32>
    %234 = arith.addf %232, %233 : vector<8x128xf32>
    %c4_73 = arith.constant 4 : index
    %c0_74 = arith.constant 0 : index
    %c0_75 = arith.constant 0 : index
    %235 = vector.load %arg2[%c4_73, %c0_74, %c0_75] : memref<8x8x1xf32, #tpu.memory_space<vmem>>, vector<1x8x1xf32>
    %236 = vector.shape_cast %235 : vector<1x8x1xf32> to vector<8x1xf32>
    %237 = vector.broadcast %236 : vector<8x1xf32> to vector<8x128xf32>
    %238 = arith.mulf %237, %234 : vector<8x128xf32>
    %cst_76 = arith.constant 1.000000e+00 : f32
    %239 = vector.broadcast %cst_76 : f32 to vector<8x1xf32>
    %240 = arith.subf %239, %236 : vector<8x1xf32>
    %241 = vector.broadcast %240 : vector<8x1xf32> to vector<8x128xf32>
    %242 = arith.mulf %241, %195 : vector<8x128xf32>
    %243 = arith.addf %238, %242 : vector<8x128xf32>
    %244 = arith.truncf %243 : vector<8x128xf32> to vector<8x128xbf16>
    %c0_77 = arith.constant 0 : index
    %c4_78 = arith.constant 4 : index
    %c0_79 = arith.constant 0 : index
    %245 = vector.load %arg7[%c0_77, %c4_78, %c0_79] : memref<8x8x128xbf16, #tpu.memory_space<vmem>>, vector<8x1x128xbf16>
    %246 = vector.shape_cast %245 : vector<8x1x128xbf16> to vector<8x128xbf16>
    %247 = vector.shape_cast %244 : vector<8x128xbf16> to vector<8x1x128xbf16>
    tpu.vector_store %arg7[%c0_77, %c4_78, %c0_79], %247 {strides = array<i32>} : memref<8x8x128xbf16, #tpu.memory_space<vmem>>, vector<8x1x128xbf16>,
    %c5 = arith.constant 5 : index
    %c0_80 = arith.constant 0 : index
    %c0_81 = arith.constant 0 : index
    %248 = vector.load %arg1[%c5, %c0_80, %c0_81] : memref<8x8x128xbf16, #tpu.memory_space<vmem>>, vector<1x8x128xbf16>
    %249 = vector.shape_cast %248 : vector<1x8x128xbf16> to vector<8x128xbf16>
    %cst_82 = arith.constant dense<0.000000e+00> : vector<8x384xf32>
    %250 = tpu.matmul %249, %3, %cst_82 {dimension_numbers = #tpu.dot_dimension_numbers<[1], [0], [0], [1], [0, 0, 1, 1], [], []>} : vector<8x128xbf16>, vector<128x384xbf16>, vector<8x384xf32> -> vector<8x384xf32>
    %251 = vector.broadcast %5 : vector<1x384xf32> to vector<8x384xf32>
    %252 = arith.addf %250, %251 : vector<8x384xf32>
    %253 = arith.truncf %243 : vector<8x128xf32> to vector<8x128xbf16>
    %cst_83 = arith.constant dense<0.000000e+00> : vector<8x384xf32>
    %254 = tpu.matmul %253, %4, %cst_83 {dimension_numbers = #tpu.dot_dimension_numbers<[1], [0], [0], [1], [0, 0, 1, 1], [], []>} : vector<8x128xbf16>, vector<128x384xbf16>, vector<8x384xf32> -> vector<8x384xf32>
    %255 = vector.broadcast %6 : vector<1x384xf32> to vector<8x384xf32>
    %256 = arith.addf %254, %255 : vector<8x384xf32>
    %257 = vector.extract_strided_slice %252 {offsets = [0, 0], sizes = [8, 128], strides = [1, 1]} : vector<8x384xf32> to vector<8x128xf32>
    %258 = vector.extract_strided_slice %256 {offsets = [0, 0], sizes = [8, 128], strides = [1, 1]} : vector<8x384xf32> to vector<8x128xf32>
    %259 = arith.addf %257, %258 : vector<8x128xf32>
    %260 = arith.negf %259 : vector<8x128xf32>
    %261 = math.exp %260 : vector<8x128xf32>
    %cst_84 = arith.constant 1.000000e+00 : f32
    %262 = vector.broadcast %cst_84 : f32 to vector<8x128xf32>
    %263 = arith.addf %262, %261 : vector<8x128xf32>
    %264 = arith.divf %262, %263 : vector<8x128xf32>
    %265 = vector.extract_strided_slice %252 {offsets = [0, 128], sizes = [8, 128], strides = [1, 1]} : vector<8x384xf32> to vector<8x128xf32>
    %266 = vector.extract_strided_slice %256 {offsets = [0, 128], sizes = [8, 128], strides = [1, 1]} : vector<8x384xf32> to vector<8x128xf32>
    %267 = arith.addf %265, %266 : vector<8x128xf32>
    %268 = arith.negf %267 : vector<8x128xf32>
    %269 = math.exp %268 : vector<8x128xf32>
    %cst_85 = arith.constant 1.000000e+00 : f32
    %270 = vector.broadcast %cst_85 : f32 to vector<8x128xf32>
    %271 = arith.addf %270, %269 : vector<8x128xf32>
    %272 = arith.divf %270, %271 : vector<8x128xf32>
    %273 = vector.extract_strided_slice %252 {offsets = [0, 256], sizes = [8, 128], strides = [1, 1]} : vector<8x384xf32> to vector<8x128xf32>
    %274 = vector.extract_strided_slice %256 {offsets = [0, 256], sizes = [8, 128], strides = [1, 1]} : vector<8x384xf32> to vector<8x128xf32>
    %275 = arith.mulf %264, %274 : vector<8x128xf32>
    %276 = arith.addf %273, %275 : vector<8x128xf32>
    %277 = math.tanh %276 : vector<8x128xf32>
    %cst_86 = arith.constant 1.000000e+00 : f32
    %278 = vector.broadcast %cst_86 : f32 to vector<8x128xf32>
    %279 = arith.subf %278, %272 : vector<8x128xf32>
    %280 = arith.mulf %279, %277 : vector<8x128xf32>
    %281 = arith.mulf %272, %243 : vector<8x128xf32>
    %282 = arith.addf %280, %281 : vector<8x128xf32>
    %c5_87 = arith.constant 5 : index
    %c0_88 = arith.constant 0 : index
    %c0_89 = arith.constant 0 : index
    %283 = vector.load %arg2[%c5_87, %c0_88, %c0_89] : memref<8x8x1xf32, #tpu.memory_space<vmem>>, vector<1x8x1xf32>
    %284 = vector.shape_cast %283 : vector<1x8x1xf32> to vector<8x1xf32>
    %285 = vector.broadcast %284 : vector<8x1xf32> to vector<8x128xf32>
    %286 = arith.mulf %285, %282 : vector<8x128xf32>
    %cst_90 = arith.constant 1.000000e+00 : f32
    %287 = vector.broadcast %cst_90 : f32 to vector<8x1xf32>
    %288 = arith.subf %287, %284 : vector<8x1xf32>
    %289 = vector.broadcast %288 : vector<8x1xf32> to vector<8x128xf32>
    %290 = arith.mulf %289, %243 : vector<8x128xf32>
    %291 = arith.addf %286, %290 : vector<8x128xf32>
    %292 = arith.truncf %291 : vector<8x128xf32> to vector<8x128xbf16>
    %c0_91 = arith.constant 0 : index
    %c5_92 = arith.constant 5 : index
    %c0_93 = arith.constant 0 : index
    %293 = vector.load %arg7[%c0_91, %c5_92, %c0_93] : memref<8x8x128xbf16, #tpu.memory_space<vmem>>, vector<8x1x128xbf16>
    %294 = vector.shape_cast %293 : vector<8x1x128xbf16> to vector<8x128xbf16>
    %295 = vector.shape_cast %292 : vector<8x128xbf16> to vector<8x1x128xbf16>
    tpu.vector_store %arg7[%c0_91, %c5_92, %c0_93], %295 {strides = array<i32>} : memref<8x8x128xbf16, #tpu.memory_space<vmem>>, vector<8x1x128xbf16>,
    %c6 = arith.constant 6 : index
    %c0_94 = arith.constant 0 : index
    %c0_95 = arith.constant 0 : index
    %296 = vector.load %arg1[%c6, %c0_94, %c0_95] : memref<8x8x128xbf16, #tpu.memory_space<vmem>>, vector<1x8x128xbf16>
    %297 = vector.shape_cast %296 : vector<1x8x128xbf16> to vector<8x128xbf16>
    %cst_96 = arith.constant dense<0.000000e+00> : vector<8x384xf32>
    %298 = tpu.matmul %297, %3, %cst_96 {dimension_numbers = #tpu.dot_dimension_numbers<[1], [0], [0], [1], [0, 0, 1, 1], [], []>} : vector<8x128xbf16>, vector<128x384xbf16>, vector<8x384xf32> -> vector<8x384xf32>
    %299 = vector.broadcast %5 : vector<1x384xf32> to vector<8x384xf32>
    %300 = arith.addf %298, %299 : vector<8x384xf32>
    %301 = arith.truncf %291 : vector<8x128xf32> to vector<8x128xbf16>
    %cst_97 = arith.constant dense<0.000000e+00> : vector<8x384xf32>
    %302 = tpu.matmul %301, %4, %cst_97 {dimension_numbers = #tpu.dot_dimension_numbers<[1], [0], [0], [1], [0, 0, 1, 1], [], []>} : vector<8x128xbf16>, vector<128x384xbf16>, vector<8x384xf32> -> vector<8x384xf32>
    %303 = vector.broadcast %6 : vector<1x384xf32> to vector<8x384xf32>
    %304 = arith.addf %302, %303 : vector<8x384xf32>
    %305 = vector.extract_strided_slice %300 {offsets = [0, 0], sizes = [8, 128], strides = [1, 1]} : vector<8x384xf32> to vector<8x128xf32>
    %306 = vector.extract_strided_slice %304 {offsets = [0, 0], sizes = [8, 128], strides = [1, 1]} : vector<8x384xf32> to vector<8x128xf32>
    %307 = arith.addf %305, %306 : vector<8x128xf32>
    %308 = arith.negf %307 : vector<8x128xf32>
    %309 = math.exp %308 : vector<8x128xf32>
    %cst_98 = arith.constant 1.000000e+00 : f32
    %310 = vector.broadcast %cst_98 : f32 to vector<8x128xf32>
    %311 = arith.addf %310, %309 : vector<8x128xf32>
    %312 = arith.divf %310, %311 : vector<8x128xf32>
    %313 = vector.extract_strided_slice %300 {offsets = [0, 128], sizes = [8, 128], strides = [1, 1]} : vector<8x384xf32> to vector<8x128xf32>
    %314 = vector.extract_strided_slice %304 {offsets = [0, 128], sizes = [8, 128], strides = [1, 1]} : vector<8x384xf32> to vector<8x128xf32>
    %315 = arith.addf %313, %314 : vector<8x128xf32>
    %316 = arith.negf %315 : vector<8x128xf32>
    %317 = math.exp %316 : vector<8x128xf32>
    %cst_99 = arith.constant 1.000000e+00 : f32
    %318 = vector.broadcast %cst_99 : f32 to vector<8x128xf32>
    %319 = arith.addf %318, %317 : vector<8x128xf32>
    %320 = arith.divf %318, %319 : vector<8x128xf32>
    %321 = vector.extract_strided_slice %300 {offsets = [0, 256], sizes = [8, 128], strides = [1, 1]} : vector<8x384xf32> to vector<8x128xf32>
    %322 = vector.extract_strided_slice %304 {offsets = [0, 256], sizes = [8, 128], strides = [1, 1]} : vector<8x384xf32> to vector<8x128xf32>
    %323 = arith.mulf %312, %322 : vector<8x128xf32>
    %324 = arith.addf %321, %323 : vector<8x128xf32>
    %325 = math.tanh %324 : vector<8x128xf32>
    %cst_100 = arith.constant 1.000000e+00 : f32
    %326 = vector.broadcast %cst_100 : f32 to vector<8x128xf32>
    %327 = arith.subf %326, %320 : vector<8x128xf32>
    %328 = arith.mulf %327, %325 : vector<8x128xf32>
    %329 = arith.mulf %320, %291 : vector<8x128xf32>
    %330 = arith.addf %328, %329 : vector<8x128xf32>
    %c6_101 = arith.constant 6 : index
    %c0_102 = arith.constant 0 : index
    %c0_103 = arith.constant 0 : index
    %331 = vector.load %arg2[%c6_101, %c0_102, %c0_103] : memref<8x8x1xf32, #tpu.memory_space<vmem>>, vector<1x8x1xf32>
    %332 = vector.shape_cast %331 : vector<1x8x1xf32> to vector<8x1xf32>
    %333 = vector.broadcast %332 : vector<8x1xf32> to vector<8x128xf32>
    %334 = arith.mulf %333, %330 : vector<8x128xf32>
    %cst_104 = arith.constant 1.000000e+00 : f32
    %335 = vector.broadcast %cst_104 : f32 to vector<8x1xf32>
    %336 = arith.subf %335, %332 : vector<8x1xf32>
    %337 = vector.broadcast %336 : vector<8x1xf32> to vector<8x128xf32>
    %338 = arith.mulf %337, %291 : vector<8x128xf32>
    %339 = arith.addf %334, %338 : vector<8x128xf32>
    %340 = arith.truncf %339 : vector<8x128xf32> to vector<8x128xbf16>
    %c0_105 = arith.constant 0 : index
    %c6_106 = arith.constant 6 : index
    %c0_107 = arith.constant 0 : index
    %341 = vector.load %arg7[%c0_105, %c6_106, %c0_107] : memref<8x8x128xbf16, #tpu.memory_space<vmem>>, vector<8x1x128xbf16>
    %342 = vector.shape_cast %341 : vector<8x1x128xbf16> to vector<8x128xbf16>
    %343 = vector.shape_cast %340 : vector<8x128xbf16> to vector<8x1x128xbf16>
    tpu.vector_store %arg7[%c0_105, %c6_106, %c0_107], %343 {strides = array<i32>} : memref<8x8x128xbf16, #tpu.memory_space<vmem>>, vector<8x1x128xbf16>,
    %c7 = arith.constant 7 : index
    %c0_108 = arith.constant 0 : index
    %c0_109 = arith.constant 0 : index
    %344 = vector.load %arg1[%c7, %c0_108, %c0_109] : memref<8x8x128xbf16, #tpu.memory_space<vmem>>, vector<1x8x128xbf16>
    %345 = vector.shape_cast %344 : vector<1x8x128xbf16> to vector<8x128xbf16>
    %cst_110 = arith.constant dense<0.000000e+00> : vector<8x384xf32>
    %346 = tpu.matmul %345, %3, %cst_110 {dimension_numbers = #tpu.dot_dimension_numbers<[1], [0], [0], [1], [0, 0, 1, 1], [], []>} : vector<8x128xbf16>, vector<128x384xbf16>, vector<8x384xf32> -> vector<8x384xf32>
    %347 = vector.broadcast %5 : vector<1x384xf32> to vector<8x384xf32>
    %348 = arith.addf %346, %347 : vector<8x384xf32>
    %349 = arith.truncf %339 : vector<8x128xf32> to vector<8x128xbf16>
    %cst_111 = arith.constant dense<0.000000e+00> : vector<8x384xf32>
    %350 = tpu.matmul %349, %4, %cst_111 {dimension_numbers = #tpu.dot_dimension_numbers<[1], [0], [0], [1], [0, 0, 1, 1], [], []>} : vector<8x128xbf16>, vector<128x384xbf16>, vector<8x384xf32> -> vector<8x384xf32>
    %351 = vector.broadcast %6 : vector<1x384xf32> to vector<8x384xf32>
    %352 = arith.addf %350, %351 : vector<8x384xf32>
    %353 = vector.extract_strided_slice %348 {offsets = [0, 0], sizes = [8, 128], strides = [1, 1]} : vector<8x384xf32> to vector<8x128xf32>
    %354 = vector.extract_strided_slice %352 {offsets = [0, 0], sizes = [8, 128], strides = [1, 1]} : vector<8x384xf32> to vector<8x128xf32>
    %355 = arith.addf %353, %354 : vector<8x128xf32>
    %356 = arith.negf %355 : vector<8x128xf32>
    %357 = math.exp %356 : vector<8x128xf32>
    %cst_112 = arith.constant 1.000000e+00 : f32
    %358 = vector.broadcast %cst_112 : f32 to vector<8x128xf32>
    %359 = arith.addf %358, %357 : vector<8x128xf32>
    %360 = arith.divf %358, %359 : vector<8x128xf32>
    %361 = vector.extract_strided_slice %348 {offsets = [0, 128], sizes = [8, 128], strides = [1, 1]} : vector<8x384xf32> to vector<8x128xf32>
    %362 = vector.extract_strided_slice %352 {offsets = [0, 128], sizes = [8, 128], strides = [1, 1]} : vector<8x384xf32> to vector<8x128xf32>
    %363 = arith.addf %361, %362 : vector<8x128xf32>
    %364 = arith.negf %363 : vector<8x128xf32>
    %365 = math.exp %364 : vector<8x128xf32>
    %cst_113 = arith.constant 1.000000e+00 : f32
    %366 = vector.broadcast %cst_113 : f32 to vector<8x128xf32>
    %367 = arith.addf %366, %365 : vector<8x128xf32>
    %368 = arith.divf %366, %367 : vector<8x128xf32>
    %369 = vector.extract_strided_slice %348 {offsets = [0, 256], sizes = [8, 128], strides = [1, 1]} : vector<8x384xf32> to vector<8x128xf32>
    %370 = vector.extract_strided_slice %352 {offsets = [0, 256], sizes = [8, 128], strides = [1, 1]} : vector<8x384xf32> to vector<8x128xf32>
    %371 = arith.mulf %360, %370 : vector<8x128xf32>
    %372 = arith.addf %369, %371 : vector<8x128xf32>
    %373 = math.tanh %372 : vector<8x128xf32>
    %cst_114 = arith.constant 1.000000e+00 : f32
    %374 = vector.broadcast %cst_114 : f32 to vector<8x128xf32>
    %375 = arith.subf %374, %368 : vector<8x128xf32>
    %376 = arith.mulf %375, %373 : vector<8x128xf32>
    %377 = arith.mulf %368, %339 : vector<8x128xf32>
    %378 = arith.addf %376, %377 : vector<8x128xf32>
    %c7_115 = arith.constant 7 : index
    %c0_116 = arith.constant 0 : index
    %c0_117 = arith.constant 0 : index
    %379 = vector.load %arg2[%c7_115, %c0_116, %c0_117] : memref<8x8x1xf32, #tpu.memory_space<vmem>>, vector<1x8x1xf32>
    %380 = vector.shape_cast %379 : vector<1x8x1xf32> to vector<8x1xf32>
    %381 = vector.broadcast %380 : vector<8x1xf32> to vector<8x128xf32>
    %382 = arith.mulf %381, %378 : vector<8x128xf32>
    %cst_118 = arith.constant 1.000000e+00 : f32
    %383 = vector.broadcast %cst_118 : f32 to vector<8x1xf32>
    %384 = arith.subf %383, %380 : vector<8x1xf32>
    %385 = vector.broadcast %384 : vector<8x1xf32> to vector<8x128xf32>
    %386 = arith.mulf %385, %339 : vector<8x128xf32>
    %387 = arith.addf %382, %386 : vector<8x128xf32>
    %388 = arith.truncf %387 : vector<8x128xf32> to vector<8x128xbf16>
    %c0_119 = arith.constant 0 : index
    %c7_120 = arith.constant 7 : index
    %c0_121 = arith.constant 0 : index
    %389 = vector.load %arg7[%c0_119, %c7_120, %c0_121] : memref<8x8x128xbf16, #tpu.memory_space<vmem>>, vector<8x1x128xbf16>
    %390 = vector.shape_cast %389 : vector<8x1x128xbf16> to vector<8x128xbf16>
    %391 = vector.shape_cast %388 : vector<8x128xbf16> to vector<8x1x128xbf16>
    tpu.vector_store %arg7[%c0_119, %c7_120, %c0_121], %391 {strides = array<i32>} : memref<8x8x128xbf16, #tpu.memory_space<vmem>>, vector<8x1x128xbf16>,
    %c0_122 = arith.constant 0 : index
    %c0_123 = arith.constant 0 : index
    %392 = vector.load %arg9[%c0_122, %c0_123] : memref<8x128xf32, #tpu.memory_space<vmem>>, vector<8x128xf32>
    tpu.vector_store %arg9[%c0_122, %c0_123], %387 {strides = array<i32>} : memref<8x128xf32, #tpu.memory_space<vmem>>, vector<8x128xf32>,
    %c2_i32 = arith.constant 2 : i32
    %393 = arith.cmpi eq, %arg0, %c2_i32 : i32
    %394 = arith.extui %393 : i1 to i32
    %c0_i32_124 = arith.constant 0 : i32
    %395 = arith.cmpi ne, %394, %c0_i32_124 : i32
    scf.if %395 {
      %c0_125 = arith.constant 0 : index
      %c0_126 = arith.constant 0 : index
      %396 = vector.load %arg8[%c0_125, %c0_126] : memref<8x128xf32, #tpu.memory_space<vmem>>, vector<8x128xf32>
      tpu.vector_store %arg8[%c0_125, %c0_126], %387 {strides = array<i32>} : memref<8x128xf32, #tpu.memory_space<vmem>>, vector<8x128xf32>,
    } else {
    }
    return
  }
  func.func @transform_0(%arg0: i32) -> (i32, i32, i32) {
    %c0_i32 = arith.constant 0 : i32
    %c0_i32_0 = arith.constant 0 : i32
    %c0_i32_1 = arith.constant 0 : i32
    return %arg0, %c0_i32, %c0_i32_0 : i32, i32, i32
  }
  func.func @transform_1(%arg0: i32) -> (i32, i32, i32) {
    %c0_i32 = arith.constant 0 : i32
    %c0_i32_0 = arith.constant 0 : i32
    %c0_i32_1 = arith.constant 0 : i32
    return %arg0, %c0_i32, %c0_i32_0 : i32, i32, i32
  }
  func.func @transform_2(%arg0: i32) -> (i32, i32) {
    %c0_i32 = arith.constant 0 : i32
    %c0_i32_0 = arith.constant 0 : i32
    %c0_i32_1 = arith.constant 0 : i32
    return %c0_i32, %c0_i32_0 : i32, i32
  }
  func.func @transform_3(%arg0: i32) -> (i32, i32) {
    %c0_i32 = arith.constant 0 : i32
    %c0_i32_0 = arith.constant 0 : i32
    %c0_i32_1 = arith.constant 0 : i32
    return %c0_i32, %c0_i32_0 : i32, i32
  }
  func.func @transform_4(%arg0: i32) -> (i32, i32) {
    %c0_i32 = arith.constant 0 : i32
    %c0_i32_0 = arith.constant 0 : i32
    %c0_i32_1 = arith.constant 0 : i32
    return %c0_i32, %c0_i32_0 : i32, i32
  }
  func.func @transform_5(%arg0: i32) -> (i32, i32) {
    %c0_i32 = arith.constant 0 : i32
    %c0_i32_0 = arith.constant 0 : i32
    %c0_i32_1 = arith.constant 0 : i32
    return %c0_i32, %c0_i32_0 : i32, i32
  }
  func.func @transform_6(%arg0: i32) -> (i32, i32, i32) {
    %c0_i32 = arith.constant 0 : i32
    %c0_i32_0 = arith.constant 0 : i32
    %c0_i32_1 = arith.constant 0 : i32
    return %c0_i32, %arg0, %c0_i32_0 : i32, i32, i32
  }
  func.func @transform_7(%arg0: i32) -> (i32, i32) {
    %c0_i32 = arith.constant 0 : i32
    %c0_i32_0 = arith.constant 0 : i32
    %c0_i32_1 = arith.constant 0 : i32
    return %c0_i32, %c0_i32_0 : i32, i32
  }
}

</mosaic_0001>

<bundles_post_ra>
// kernel: tpu_custom_call.1
= control target key start
LH: loop header
LB: loop body
LE: loop exit
PB: predicated region body
PF: predicated region fallthrough
CT: control target
= control target key end

     0   :  { %s4798_s0 = inlined_call_operand.hbm [shape: bf16[24,8,128], index: 0, kind: input, shape index: {}]   ;;  %s4799_s1 = inlined_call_operand.vmem [shape: f32[24,8,1], index: 1, kind: input, shape index: {}]   ;;  %s4800_s2 = inlined_call_operand.vmem [shape: bf16[128,384], index: 2, kind: input, shape index: {}]   ;;  %s4801_s3 = inlined_call_operand.hbm [shape: bf16[128,384], index: 3, kind: input, shape index: {}]   ;;  %s4802_s4 = inlined_call_operand.vmem [shape: f32[1,384], index: 4, kind: input, shape index: {}]   ;;  %s4803_s5 = inlined_call_operand.vmem [shape: f32[1,384], index: 5, kind: input, shape index: {}]   ;;  %s4804_s6 = inlined_call_operand.hbm [shape: bf16[8,24,128], index: 6, kind: output, shape index: {0}]   ;;  %s4805_s7 = inlined_call_operand.hbm [shape: f32[8,128], index: 7, kind: output, shape index: {1}]  }
   0x1   :  { %4872 = sst [smem:[#allocation40_spill]] %s4798_s0 }
   0x2   :  { %4873 = sst [smem:[#allocation41_spill]] %s4801_s3 }
   0x3   :  { %13 = vsyncpa [#allocation4], 0 }
   0x4   :  { %15 = vsyncpa [#allocation4 + $0x1], 0 }
   0x5   :  { %16 = vsyncpa [#allocation7], 0 }
   0x6   :  { %17 = vsyncpa [#allocation5], 0 }
   0x7   :  { %19 = vsyncpa [#allocation5 + $0x1], 0 }
   0x8   :  { %20 = vsyncpa [#allocation10], 0  ;;  %s3452_s24 = smov 0   ;;  %s3454_s25 = smov 0  }
   0x9   :  { %s3456_s26 = smov 0   ;;  %s3458_s27 = smov 0  }
   0xa LB: > { %s3473_s28 = sadd.s32 4294967295, %s3398_s27   ;;  %s2755_s29 = sadd.s32 4294967294, %s3398_s27   ;;  %s3398_s27 = sphi %s3458_s27, %s4995_s27   ;;  %s3394_s26 = sphi %s3456_s26, %s4994_s26   ;;  %s3390_s25 = sphi %s3454_s25, %s4993_s25   ;;  %s3386_s24 = sphi %s3452_s24, %s4992_s24  }
   0xb   : > { %p46_p0 = scmp.ne.s32.totalorder %s3390_s25, %s3386_s24  ;;  %p47_p1 = scmp.eq.s32.totalorder %s3473_s28, 0 }
   0xc   : > { %p4806_p2 = scmp.eq.s32.totalorder %s3473_s28, 2  ;;  %p186_p3 = scmp.eq.s32.totalorder %s2755_s29, 2 }
   0xd   : > { %p3482_p4 = por %p47_p1, %p46_p0  ;;  %p2756_p5 = scmp.ge.s32.totalorder %s3398_s27, 1 }
   0xe   : > { %p3487_p6 = por %p186_p3, %p46_p0  ;;  %p214_p7 = scmp.lt.s32.totalorder %s3398_s27, 4 }
   0xf   : > { %s4876_s3 = sld [smem:[#allocation41_spill]]  ;;  %s3400_s13 = smov [#allocation6]  }
  0x10   : > { %p3496_p9 = pnand %p2756_p5, %p214_p7  ;;  %s230_s14 = sshll.u32 %s3400_s13, 4  ;;  %s231_s14 = int_to_ptr.vmem [resolvable:$true] %s230_s14 }
  0x11   : > { %s3505_s15 = sadd.s32 1, %s3398_s27   ;;  %s3401_s16 = smov 192  }
  0x12   : > { %p3091_p10 = pneg %p3496_p9  ;;  %s3402_s17 = smov 12  }
  0x13   : > { %s30_s18 = ssub.s32 %s3398_s27, %s3505_s15  ;;  %s33_s19 = sadd.s32 1, %s3394_s26 }
  0x14   : > { %p3092_p11 = pnand %p3091_p10, %p47_p1  ;;  %p31_p12 = scmp.eq.s32.totalorder %s30_s18, 0 }
  0x15   : > { %s228_s11 = sshll.u32 %s4876_s3, 4  ;;  %p40_p13 = scmp.ne.s32.totalorder %s3394_s26, %s3390_s25  ;;  %s229_s11 = int_to_ptr.hbm [resolvable:$true] %s228_s11 }
  0x16   : > { %3094 = dma.hbm_to_vmem [thread:$0]  (!%p3092_p11), %s229_s11, 3072, %s231_s14, [#allocation7], %s3401_s16, %s3401_s16, %s3402_s17  }
  0x17   : > { %p41_p0 = scmp.eq.s32.totalorder %s3398_s27, 0  ;;  %p3104_p3 = scmp.lt.s32.totalorder %s3398_s27, 3 }
  0x18   : > { %s3515_s20 = scalar_select %p31_p12, %s3394_s26, %s33_s19  }
  0x19   : > { %p42_p5 = por %p41_p0, %p40_p13  ;;  %p3519_p7 = por %p4806_p2, %p40_p13 }
  0x1a   : > { %s250_s22 = sand.u32 1, %s3394_s26   ;;  %s3030_s23 = sshll.u32 %s3398_s27, 5 }
  0x1b   : > { %s2759_s29 = sshll.u32 %s250_s22, 5  ;;  %s4879_s0 = sld [smem:[#allocation40_spill]] }
  0x1c   : > { %s254_s14 = scalar_lea.vmem [#allocation3], %s2759_s29  ;;  %p3530_p10 = pnand %p3104_p3, %p42_p5 }
  0x1d   : > { %s262_s16 = sshll.u32 %s254_s14, 4  ;;  %s251_s18 = scalar_lea.sflag [#allocation4], %s250_s22  ;;  %s263_s16 = int_to_ptr.vmem [resolvable:$true] %s262_s16 }
  0x1e   : > { %p3270_p12 = pneg %p3530_p10 }
  0x21   : > { %s259_s11 = scalar_lea.hbm %s4879_s0, %s3030_s23  ;;  %s3273_s9 = scalar_lea.hbm %s4879_s0, 96 }
  0x22   : > { %s260_s13 = sshll.u32 %s259_s11, 4  ;;  %s261_s13 = int_to_ptr.hbm [resolvable:$true] %s260_s13 }
  0x23   : > { %s3266_s19 = sshra.s32 %s261_s13, 4  ;;  %s3267_s19 = int_to_ptr.hbm [resolvable:$true] %s3266_s19 }
  0x24   : > { %s3268_s3 = scalar_lea.hbm %s3267_s19, 32  ;;  %p3274_p3 = scmp.lt.s32.totalorder %s3267_s19, %s4879_s0 }
  0x25   : > { %p3269_p11 = scmp.ne.s32.totalorder %s3267_s19, %s3268_s3  ;;  %p3275_p5 = scmp.lt.s32.totalorder %s3273_s9, %s3268_s3 }
  0x27   : > { %p3271_p13 = pnand %p3270_p12, %p3269_p11  ;;  %p3276_p2 = por %p3275_p5, %p3274_p3 }
  0x29   : > { %p3272_p0 = pneg %p3271_p13 }
  0x2b   : > { %p3277_p8 = pnand %p3276_p2, %p3272_p0 }
  0x2d   : > { %3280 = shalt.err (!%p3277_p8)
}
  0x2e   : > { %s3403_s22 = smov 64   ;;  %s3404_s14 = smov 4  }
  0x2f   : > { %3098 = dma.hbm_to_vmem [thread:$0]  (!%p3530_p10), %s261_s13, 512, %s263_s16, %s251_s18, %s3403_s22, %s3403_s22, %s3404_s14  }
  0x30   : > { %283 = sbr.rel (%p3496_p9) target bundleno = 1618 (0x652), region = 44 }
  0x35   : > { %s3547_s23 = sand.u32 1, %s3390_s25  }
  0x36   : > { %s2763_s29 = sshll.u32 %s3547_s23, 5  ;;  %s286_s19 = scalar_lea.sflag [#allocation4], %s3547_s23 }
  0x37   : > { %s3551_s3 = scalar_lea.vmem [#allocation3], %s2763_s29 }
  0x38   : > { %3369 = dma.done.wait (%p3482_p4), %s286_s19, 512  }
  0x39   : > { %3371 = vsyncadd (%p3482_p4), %s286_s19, 4294966784 }
  0x3a   : > { %3373 = dma.done.wait (%p47_p1), [#allocation7], 3072  }
  0x3b   : > { %3375 = vsyncadd (%p47_p1), [#allocation7], 4294964224  ;;  %s2766_s12 = sshll.u32 %s3473_s28, 3  ;;  %s3567_s9 = scalar_lea.vmem [#allocation8], %s2763_s29 }
  0x3c   : > { %p333_p2 = scmp.lt.s32.totalorder %s2766_s12, 23  ;;  %p4881_p4 = scmp.ne.s32.totalorder %s3473_s28, 0 }
  0x3e   : > { %s4997_s12 = smov (!%p333_p2, %s2766_s12), 23  ;;  %341 = sbr.rel (%p4881_p4) target bundleno = 69 (0x45), region = 56 }
  0x3f   : > { %s2767_s13 = sshll.u32 %s4997_s12, 3 }
  0x40   : > { %s3565_s18 = scalar_lea.vmem %s4799_s1, %s2767_s13 }
  0x43   : > { %v3405_v0 = vmov 0.0  }
  0x44   : > { %342 = vst [vmem:[#allocation2] sm:$0xff] %v3405_v0 }
  0x45 PF: > { %v2855_v1 = vld [vmem:[%s4800_s2 + $0xa8] sm:$0xf]  ;;  %v3053_v2 = vld [vmem:[%s4800_s2 + $0xb0] sm:$0xf0]  ;;  %v2951_v3 = vld [vmem:[#allocation6 + $0xa8] sm:$0xf] }
  0x46   : > { %v3577_v4 = vor.u32 %v3053_v2, %v2855_v1  ;;  %v3077_v5 = vld [vmem:[#allocation6 + $0xb0] sm:$0xf0]  ;;  %v2843_v6 = vld [vmem:[%s4800_s2 + $0x90] sm:$0xf]  ;;  %v2939_v9 = vld [vmem:[#allocation6 + $0x90] sm:$0xf] }
  0x47   : > { %v3050_v7 = vld [vmem:[%s4800_s2 + $0x98] sm:$0xf0]  ;;  %v3585_v8 = vor.u32 %v3077_v5, %v2951_v3  ;;  %v3074_v10 = vld [vmem:[#allocation6 + $0x98] sm:$0xf0]  ;;  %v3052_v11 = vld [vmem:[%s4800_s2 + $0xac] sm:$0xf] }
  0x48   : > { %4882 = vst [vmem:[#allocation15_spill] sm:$0xff] %v3577_v4  ;;  %546 = vmatpush.bf16.msra.mxu0 %v3577_v4  ;;  %v3591_v12 = vor.u32 %v3050_v7, %v2843_v6  ;;  %v2857_v13 = vld [vmem:[%s4800_s2 + $0xb4] sm:$0xf0]  ;;  %v3597_v14 = vor.u32 %v3074_v10, %v2939_v9  ;;  %v3047_v17 = vld [vmem:[%s4800_s2 + $0x80] sm:$0xf0]  ;;  %vm825_vm8 = vcmask 1040384  }
  0x49   : > { %721 = vmatpush.bf16.msra.mxu3 %v3585_v8  ;;  %v3599_v15 = vor.u32 %v3052_v11, %v2857_v13  ;;  %v2831_v16 = vld [vmem:[%s4800_s2 + $0x78] sm:$0xf]  ;;  %v3049_v18 = vld [vmem:[%s4800_s2 + $0x94] sm:$0xf]  ;;  %v2927_v19 = vld [vmem:[#allocation6 + $0x78] sm:$0xf] }
  0x4a   : > { %4883 = vst [vmem:[#allocation16_spill] sm:$0xff] %v3597_v14  ;;  %v3071_v20 = vld [vmem:[#allocation6 + $0x80] sm:$0xf0]  ;;  %v2845_v21 = vld [vmem:[%s4800_s2 + $0x9c] sm:$0xf0]  ;;  %v3617_v23 = vor.u32 %v3047_v17, %v2831_v16  ;;  %vm830_vm9 = vcmask 1041409  }
  0x4b   : > { %4884 = vst [vmem:[#allocation17_spill] sm:$0xff] %v3599_v15  ;;  %559 = vmatpush.bf16.msra.mxu1 %v3599_v15  ;;  %v3614_v22 = vor.u32 %v3049_v18, %v2845_v21  ;;  %v3046_v24 = vld [vmem:[%s4800_s2 + $0x7c] sm:$0xf]  ;;  %v2833_v25 = vld [vmem:[%s4800_s2 + $0x84] sm:$0xf0]  ;;  %v3626_v26 = vor.u32 %v3071_v20, %v2927_v19  ;;  %vm834_vm10 = vcmask 1042434  }
  0x4c   : > { %547 = vmatpush.bf16.msra.mxu0 %v3591_v12  ;;  %v2819_v27 = vld [vmem:[%s4800_s2 + $0x60] sm:$0xf]  ;;  %v3044_v28 = vld [vmem:[%s4800_s2 + $0x68] sm:$0xf0]  ;;  %v2915_v29 = vld [vmem:[#allocation6 + $0x60] sm:$0xf]  ;;  %v3635_v31 = vor.u32 %v3046_v24, %v2833_v25 }
  0x4d   : > { %4885 = vst [vmem:[#allocation18_spill] sm:$0xff] %v3614_v22  ;;  %722 = vmatpush.bf16.msra.mxu3 %v3597_v14  ;;  %v3068_v30 = vld [vmem:[#allocation6 + $0x68] sm:$0xf0]  ;;  %v3638_v32 = vor.u32 %v3044_v28, %v2819_v27  ;;  %v3043_v33 = vld [vmem:[%s4800_s2 + $0x64] sm:$0xf]  ;;  %vm838_vm11 = vcmask 1043459  }
  0x4e   : > { %v2821_v34 = vld [vmem:[%s4800_s2 + $0x6c] sm:$0xf0]  ;;  %v3647_v35 = vor.u32 %v3068_v30, %v2915_v29  ;;  %v2807_v36 = vld [vmem:[%s4800_s2 + $0x48] sm:$0xf]  ;;  %v3041_v37 = vld [vmem:[%s4800_s2 + $0x50] sm:$0xf0] }
  0x4f   : > { %560 = vmatpush.bf16.msra.mxu1 %v3614_v22  ;;  %v2903_v38 = vld [vmem:[#allocation6 + $0x48] sm:$0xf]  ;;  %v3065_v39 = vld [vmem:[#allocation6 + $0x50] sm:$0xf0]  ;;  %v3656_v40 = vor.u32 %v3043_v33, %v2821_v34  ;;  %v3659_v41 = vor.u32 %v3041_v37, %v2807_v36  ;;  %v3040_v43 = vld [vmem:[%s4800_s2 + $0x4c] sm:$0xf] }
  0x50   : > { %548 = vmatpush.bf16.msra.mxu0 %v3617_v23  ;;  %v2795_v42 = vld [vmem:[%s4800_s2 + $0x30] sm:$0xf]  ;;  %v2809_v44 = vld [vmem:[%s4800_s2 + $0x54] sm:$0xf0]  ;;  %v3671_v45 = vor.u32 %v3065_v39, %v2903_v38  ;;  %v3038_v46 = vld [vmem:[%s4800_s2 + $0x38] sm:$0xf0] }
  0x51   : > { %723 = vmatpush.bf16.msra.mxu3 %v3626_v26  ;;  %v2863_v47 = vld [vmem:[%s4800_s2 + $0xb0] sm:$0xf]  ;;  %v3054_v48 = vld [vmem:[%s4800_s2 + $0xb8] sm:$0xf0]  ;;  %v2891_v49 = vld [vmem:[#allocation6 + $0x30] sm:$0xf]  ;;  %v3685_v52 = vor.u32 %v3040_v43, %v2809_v44  ;;  %v3691_v54 = vor.u32 %v3038_v46, %v2795_v42 }
  0x52   : > { %4886 = vst [vmem:[#allocation19_spill] sm:$0xff] %v3671_v45  ;;  %v3062_v50 = vld [vmem:[#allocation6 + $0x38] sm:$0xf0]  ;;  %v3682_v51 = vor.u32 %v3054_v48, %v2863_v47  ;;  %v2851_v53 = vld [vmem:[%s4800_s2 + $0x98] sm:$0xf]  ;;  %p3023_p1 = scmp.ne.s32.totalorder %s3473_s28, 2 }
  0x53   : > { %561 = vmatpush.bf16.msra.mxu1 %v3635_v31  ;;  %v3037_v55 = vld [vmem:[%s4800_s2 + $0x34] sm:$0xf]  ;;  %v2797_v56 = vld [vmem:[%s4800_s2 + $0x3c] sm:$0xf0]  ;;  %v3051_v57 = vld [vmem:[%s4800_s2 + $0xa0] sm:$0xf0]  ;;  %v3704_v58 = vor.u32 %v3062_v50, %v2891_v49 }
  0x54   : > { %549 = vmatpush.bf16.msra.mxu0 %v3638_v32  ;;  %572 = vmatpush.bf16.msra.mxu2 %v3682_v51  ;;  %v2783_v59 = vld [vmem:[%s4800_s2 + $0x18] sm:$0xf]  ;;  %v3035_v60 = vld [vmem:[%s4800_s2 + $0x20] sm:$0xf0]  ;;  %v3712_v61 = vor.u32 %v3051_v57, %v2851_v53  ;;  %v2839_v62 = vld [vmem:[%s4800_s2 + $0x80] sm:$0xf]  ;;  %v3721_v2 = vor.u32 %v3037_v55, %v2797_v56 }
  0x55   : > { %724 = vmatpush.bf16.msra.mxu3 %v3647_v35  ;;  %v2879_v63 = vld [vmem:[#allocation6 + $0x18] sm:$0xf]  ;;  %v3059_v0 = vld [vmem:[#allocation6 + $0x20] sm:$0xf0]  ;;  %v3727_v5 = vor.u32 %v3035_v60, %v2783_v59  ;;  %v3034_v7 = vld [vmem:[%s4800_s2 + $0x1c] sm:$0xf] }
  0x56   : > { %v3048_v1 = vld [vmem:[%s4800_s2 + $0x88] sm:$0xf0]  ;;  %v2771_v3 = vld [vmem:[%s4800_s2] sm:$0xf]  ;;  %v2785_v9 = vld [vmem:[%s4800_s2 + $0x24] sm:$0xf0]  ;;  %v3742_v11 = vor.u32 %v3059_v0, %v2879_v63 }
  0x57   : > { %562 = vmatpush.bf16.msra.mxu1 %v3656_v40  ;;  %4887 = vst [vmem:[#allocation20_spill] sm:$0xff] %v3727_v5  ;;  %v3032_v6 = vld [vmem:[%s4800_s2 + $0x8] sm:$0xf0]  ;;  %v3739_v10 = vor.u32 %v3048_v1, %v2839_v62  ;;  %v2867_v13 = vld [vmem:[#allocation6] sm:$0xf]  ;;  %v3751_v21 = vor.u32 %v3034_v7, %v2785_v9  ;;  %v3756_v25 = vld [vmem:[#allocation2] sm:$0xff] }
  0x58   : > { %550 = vmatpush.bf16.msra.mxu0 %v3659_v41  ;;  %573 = vmatpush.bf16.msra.mxu2 %v3712_v61  ;;  %4888 = vst [vmem:[#allocation21_spill] sm:$0xff] %v3742_v11  ;;  %v2827_v16 = vld [vmem:[%s4800_s2 + $0x68] sm:$0xf]  ;;  %v3045_v17 = vld [vmem:[%s4800_s2 + $0x70] sm:$0xf0]  ;;  %v3754_v24 = vor.u32 %v3032_v6, %v2771_v3  ;;  %v3784_v44 = vpack.c.bf16 %v3756_v25, %v3756_v25  ;;  %v3406_v60 = vmov 0  }
  0x59   : > { %725 = vmatpush.bf16.msra.mxu3 %v3671_v45  ;;  %v3056_v18 = vld [vmem:[#allocation6 + $0x8] sm:$0xf0]  ;;  %v2953_v20 = vld [vmem:[#allocation6 + $0xb4] sm:$0xf0]  ;;  %4889 = vst [vmem:[#allocation22_spill] sm:$0xff] %v3751_v21  ;;  %v3765_v29 = vor.u32 %v3045_v17, %v2827_v16  ;;  %3153 = vset.pattern.permute.xlu0 %v3406_v60 }
  0x5a   : > { %v3076_v19 = vld [vmem:[#allocation6 + $0xac] sm:$0xf]  ;;  %4890 = vst [vmem:[#allocation23_spill] sm:$0xff] %v3754_v24  ;;  %v3031_v27 = vld [vmem:[%s4800_s2 + $0x4] sm:$0xf]  ;;  %v3768_v30 = vor.u32 %v3056_v18, %v2867_v13  ;;  %3154 = vset.pattern.permute.xlu1 %v3406_v60  ;;  %3155 = vset.pattern.permute.xlu2 %v3406_v60 }
  0x5b   : > { %563 = vmatpush.bf16.msra.mxu1 %v3685_v52  ;;  %v2773_v28 = vld [vmem:[%s4800_s2 + $0xc] sm:$0xf0]  ;;  %4891 = vst [vmem:[#allocation24_spill] sm:$0xff] %v3765_v29  ;;  %v3770_v33 = vor.u32 %v3076_v19, %v2953_v20  ;;  %v3073_v34 = vld [vmem:[#allocation6 + $0x94] sm:$0xf]  ;;  %v807_v62 = vld [vmem:[%s3565_s18] sm:$0xff] }
  0x5c   : > { %551 = vmatpush.bf16.msra.mxu0 %v3691_v54  ;;  %574 = vmatpush.bf16.msra.mxu2 %v3739_v10  ;;  %4892 = vst [vmem:[#allocation25_spill] sm:$0xff] %v3768_v30  ;;  %v2959_v36 = vld [vmem:[#allocation6 + $0xb0] sm:$0xf]  ;;  %v3078_v37 = vld [vmem:[#allocation6 + $0xb8] sm:$0xf0]  ;;  %v3779_v43 = vor.u32 %v3031_v27, %v2773_v28 }
  0x5d   : > { %726 = vmatpush.bf16.msra.mxu3 %v3704_v58  ;;  %v2941_v38 = vld [vmem:[#allocation6 + $0x9c] sm:$0xf0]  ;;  %v2815_v39 = vld [vmem:[%s4800_s2 + $0x50] sm:$0xf]  ;;  %v3042_v42 = vld [vmem:[%s4800_s2 + $0x58] sm:$0xf0]  ;;  %v3789_v47 = vor.u32 %v3078_v37, %v2959_v36  ;;  %810 = vperm.xlu0 %3153, %v807_v62  }
  0x5e   : > { %4893 = vst [vmem:[#allocation26_spill] sm:$0xff] %v3779_v43  ;;  %v3787_v46 = vld [vmem:[%s3551_s3] sm:$0xf]  ;;  %v3794_v48 = vor.u32 %v3073_v34, %v2941_v38  ;;  %v3070_v49 = vld [vmem:[#allocation6 + $0x7c] sm:$0xf]  ;;  %v3796_v55 = vor.u32 %v3042_v42, %v2815_v39  ;;  %v814_v38 = vsub.f32 1.0, %v807_v62 }
  0x5f   : > { %564 = vmatpush.bf16.msra.mxu1 %v3721_v2  ;;  %4894 = vst [vmem:[#allocation27_spill] sm:$0xff] %v3789_v47  ;;  %v2947_v50 = vld [vmem:[#allocation6 + $0x98] sm:$0xf]  ;;  %v3075_v53 = vld [vmem:[#allocation6 + $0xa0] sm:$0xf0] }
  0x60   : > { %552 = vmatpush.bf16.msra.mxu0 %v3727_v5  ;;  %575 = vmatpush.bf16.msra.mxu2 %v3765_v29  ;;  %4895 = vst [vmem:[#allocation28_spill] sm:$0xff] %v3796_v55  ;;  %v2929_v56 = vld [vmem:[#allocation6 + $0x84] sm:$0xf0]  ;;  %v2803_v57 = vld [vmem:[%s4800_s2 + $0x38] sm:$0xf]  ;;  %v3809_v63 = vor.u32 %v3075_v53, %v2947_v50 }
  0x61   : > { %727 = vmatpush.bf16.msra.mxu3 %v3742_v11  ;;  %v3039_v59 = vld [vmem:[%s4800_s2 + $0x40] sm:$0xf0]  ;;  %v3812_v0 = vor.u32 %v3070_v49, %v2929_v56  ;;  %v3067_v1 = vld [vmem:[#allocation6 + $0x64] sm:$0xf]  ;;  %v2935_v3 = vld [vmem:[#allocation6 + $0x80] sm:$0xf] }
  0x62   : > { %4896 = vst [vmem:[#allocation29_spill] sm:$0xff] %v3809_v63  ;;  %v3072_v6 = vld [vmem:[#allocation6 + $0x88] sm:$0xf0]  ;;  %v3815_v7 = vor.u32 %v3039_v59, %v2803_v57  ;;  %v2917_v9 = vld [vmem:[#allocation6 + $0x6c] sm:$0xf0]  ;;  %v2970_v59 = vld [vmem:[%s3565_s18 + $0x8] sm:$0xff] }
  0x63   : > { %565 = vmatpush.bf16.msra.mxu1 %v3751_v21  ;;  %v2791_v13 = vld [vmem:[%s4800_s2 + $0x20] sm:$0xf]  ;;  %v3036_v16 = vld [vmem:[%s4800_s2 + $0x28] sm:$0xf0]  ;;  %v3826_v17 = vor.u32 %v3072_v6, %v2935_v3  ;;  %v3064_v18 = vld [vmem:[#allocation6 + $0x4c] sm:$0xf]  ;;  %v3829_v19 = vor.u32 %v3067_v1, %v2917_v9  ;;  %1056 = vperm.xlu1 %3154, %v2970_v59  }
  0x64   : > { %553 = vmatpush.bf16.msra.mxu0 %v3754_v24  ;;  %576 = vmatpush.bf16.msra.mxu2 %v3796_v55  ;;  %4897 = vst [vmem:[#allocation30_spill] sm:$0xff] %v3815_v7  ;;  %v2905_v20 = vld [vmem:[#allocation6 + $0x54] sm:$0xf0]  ;;  %v2923_v27 = vld [vmem:[#allocation6 + $0x68] sm:$0xf]  ;;  %v3832_v34 = vor.u32 %v3036_v16, %v2791_v13  ;;  %v2986_v13 = vld [vmem:[%s3565_s18 + $0x18] sm:$0xff] }
  0x65   : > { %728 = vmatpush.bf16.msra.mxu3 %v3768_v30  ;;  %4898 = vst [vmem:[#allocation31_spill] sm:$0xff] %v3829_v19  ;;  %v3069_v28 = vld [vmem:[#allocation6 + $0x70] sm:$0xf0]  ;;  %v2779_v36 = vld [vmem:[%s4800_s2 + $0x8] sm:$0xf]  ;;  %v3845_v42 = vor.u32 %v3064_v18, %v2905_v20  ;;  %817 = vperm.xlu0 %3153, %v814_v38   ;;  %v1060_v16 = vsub.f32 1.0, %v2970_v59 }
  0x66   : > { %4899 = vst [vmem:[#allocation32_spill] sm:$0xff] %v3832_v34  ;;  %v3033_v37 = vld [vmem:[%s4800_s2 + $0x10] sm:$0xf0]  ;;  %v3842_v39 = vor.u32 %v3069_v28, %v2923_v27  ;;  %v2911_v49 = vld [vmem:[#allocation6 + $0x50] sm:$0xf]  ;;  %v3871_v38 = vld [vmem:[%s3565_s18 + $0x20] sm:$0xff] }
  0x67   : > { %566 = vmatpush.bf16.msra.mxu1 %v3779_v43  ;;  %554 = vmatmul.bf16.vlgmr.msra.gmra.mxu0 %v3787_v46  ;;  %4900 = vst [vmem:[#allocation33_spill] sm:$0xff] %v3845_v42  ;;  %v3066_v50 = vld [vmem:[#allocation6 + $0x58] sm:$0xf0]  ;;  %v3848_v53 = vor.u32 %v3033_v37, %v2779_v36  ;;  %v3061_v56 = vld [vmem:[#allocation6 + $0x34] sm:$0xf] }
  0x68   : > { %734 = vmatpush.bf16.msrb.mxu0 %v3770_v33  ;;  %729 = vmatmul.bf16.vlgmr.msra.gmra.mxu3 %v3784_v44  ;;  %v2893_v57 = vld [vmem:[#allocation6 + $0x3c] sm:$0xf0]  ;;  %v3853_v60 = vor.u32 %v3066_v50, %v2911_v49  ;;  %v2899_v1 = vld [vmem:[#allocation6 + $0x38] sm:$0xf]  ;;  %v3063_v3 = vld [vmem:[#allocation6 + $0x40] sm:$0xf0] }
  0x69   : > { %940 = vmatpush.bf16.msrb.mxu3 %v3599_v15  ;;  %577 = vmatpush.bf16.msra.mxu2 %v3815_v7  ;;  %4901 = vst [vmem:[#allocation34_spill] sm:$0xff] %v3848_v53  ;;  %v3856_v62 = vor.u32 %v3061_v56, %v2893_v57  ;;  %v3058_v6 = vld [vmem:[#allocation6 + $0x1c] sm:$0xf]  ;;  %v2881_v9 = vld [vmem:[#allocation6 + $0x24] sm:$0xf0]  ;;  %v3863_v18 = vor.u32 %v3063_v3, %v2899_v1  ;;  %v1784_v57 = vsub.f32 1.0, %v3871_v38 }
  0x6a   : > { %567 = vmatmul.bf16.vlgmr.msra.gmra.mxu1 %v3787_v46  ;;  %v3867_v20 = vor.u32 %v3058_v6, %v2881_v9  ;;  %v2887_v27 = vld [vmem:[#allocation6 + $0x20] sm:$0xf]  ;;  %v3060_v28 = vld [vmem:[#allocation6 + $0x28] sm:$0xf0]  ;;  %v3055_v36 = vld [vmem:[#allocation6 + $0x4] sm:$0xf] }
  0x6b   : > { %747 = vmatpush.bf16.msrb.mxu1 %v3789_v47  ;;  %4902 = vst [vmem:[#allocation35_spill] sm:$0xff] %v3856_v62  ;;  %v2869_v37 = vld [vmem:[#allocation6 + $0xc] sm:$0xf0]  ;;  %1063 = vperm.xlu1 %3154, %v1060_v16   ;;  %v3875_v49 = vor.u32 %v3060_v28, %v2887_v27  ;;  %v2875_v50 = vld [vmem:[#allocation6 + $0x8] sm:$0xf]  ;;  %v1543_v1 = vsub.f32 1.0, %v2986_v13 }
  0x6c   : > { %735 = vmatpush.bf16.msrb.mxu0 %v3794_v48  ;;  %4903 = vst [vmem:[#allocation36_spill] sm:$0xff] %v3867_v20  ;;  %v3057_v56 = vld [vmem:[#allocation6 + $0x10] sm:$0xf0]  ;;  %v3896_v3 = vld [vmem:[%s3565_s18 + $0x30] sm:$0xff]  ;;  %v3956_v9 = vld [vmem:[%s4802_s4] sm:$0x7] }
  0x6d   : > { %941 = vmatpush.bf16.msrb.mxu3 %v3614_v22  ;;  %578 = vmatpush.bf16.msra.mxu2 %v3832_v34  ;;  %4904 = vst [vmem:[#allocation37_spill] sm:$0xff] %v3875_v49  ;;  %v3884_v59 = vor.u32 %v3057_v56, %v2875_v50  ;;  %v3905_v6 = vld [vmem:[%s3565_s18 + $0x38] sm:$0xff]  ;;  %v408_v16 = vld [vmem:[%s4803_s5] sm:$0x7]  ;;  %v3962_v27 = vperm.slane %v3956_v9, 0 }
  0x6e   : > { %1539 = vperm.xlu0 %3153, %v2986_v13   ;;  %vm899_vm12 = vsmask.f32 256 }
  0x6f   : > { %748 = vmatpush.bf16.msrb.mxu1 %v3809_v63  ;;  %4906 = vst [vmem:[#allocation39_spill] sm:$0xff] %v3884_v59  ;;  %vm4032_vm13 = vmand %vm825_vm8, %vm899_vm12 }
  0x70   : > { %736 = vmatpush.bf16.msrb.mxu0 %v3812_v0 }
  0x71   : > { %942 = vmatpush.bf16.msrb.mxu3 %v3635_v31  ;;  %579 = vmatpush.bf16.msra.mxu2 %v3848_v53 }
  0x73   : > { %749 = vmatpush.bf16.msrb.mxu1 %v3826_v17  ;;  %1546 = vperm.xlu1 %3154, %v1543_v1  }
  0x74   : > { %737 = vmatpush.bf16.msrb.mxu0 %v3829_v19  ;;  %580 = vmatmul.bf16.vlgmr.msra.gmra.mxu2 %v3787_v46  ;;  %v3878_v46 = vor.u32 %v3055_v36, %v2869_v37  ;;  %v3964_v36 = vperm.slane %v408_v16, 0 }
  0x75   : > { %927 = vmatpush.bf16.msrb.mxu2 %v3577_v4  ;;  %943 = vmatpush.bf16.msrb.mxu3 %v3656_v40 }
  0x76   : > { %4905 = vst [vmem:[#allocation38_spill] sm:$0xff] %v3878_v46  ;;  %1787 = vperm.xlu0 %3153, %v1784_v57  }
  0x77   : > { %750 = vmatpush.bf16.msrb.mxu1 %v3842_v39 }
  0x78   : > { %738 = vmatpush.bf16.msrb.mxu0 %v3845_v42 }
  0x79   : > { %928 = vmatpush.bf16.msrb.mxu2 %v3591_v12  ;;  %944 = vmatpush.bf16.msrb.mxu3 %v3685_v52 }
  0x7b   : > { %751 = vmatpush.bf16.msrb.mxu1 %v3853_v60 }
  0x7c   : > { %739 = vmatpush.bf16.msrb.mxu0 %v3856_v62 }
  0x7d   : > { %929 = vmatpush.bf16.msrb.mxu2 %v3617_v23  ;;  %945 = vmatpush.bf16.msrb.mxu3 %v3721_v2 }
  0x7e   : > { %2263 = vperm.xlu0 %3153, %v3896_v3  }
  0x7f   : > { %752 = vmatpush.bf16.msrb.mxu1 %v3863_v18 }
  0x80   : > { %740 = vmatpush.bf16.msrb.mxu0 %v3867_v20 }
  0x81   : > { %930 = vmatpush.bf16.msrb.mxu2 %v3638_v32  ;;  %946 = vmatpush.bf16.msrb.mxu3 %v3751_v21 }
  0x83   : > { %753 = vmatpush.bf16.msrb.mxu1 %v3875_v49 }
  0x84   : > { %741 = vmatpush.bf16.msrb.mxu0 %v3878_v46 }
  0x85   : > { %931 = vmatpush.bf16.msrb.mxu2 %v3659_v41  ;;  %947 = vmatpush.bf16.msrb.mxu3 %v3779_v43 }
  0x87   : > { %742 = vmatmul.bf16.vlgmr.msrb.gmra.mxu0 %v3784_v44  ;;  %754 = vmatpush.bf16.msrb.mxu1 %v3884_v59 }
  0x88   : > { %953 = vmatpush.bf16.msra.mxu0 %v3682_v51 }
  0x89   : > { %992 = vmatpush.bf16.msra.mxu3 %v3789_v47  ;;  %932 = vmatpush.bf16.msrb.mxu2 %v3691_v54 }
  0x8a   : > { %755 = vmatmul.bf16.vlgmr.msrb.gmra.mxu1 %v3784_v44  ;;  %v2509_v44 = vsub.f32 1.0, %v3905_v6 }
  0x8b   : > { %966 = vmatpush.bf16.msra.mxu1 %v3585_v8 }
  0x8c   : > { %954 = vmatpush.bf16.msra.mxu0 %v3712_v61  ;;  %2512 = vperm.xlu0 %3153, %v2509_v44  }
  0x8d   : > { %993 = vmatpush.bf16.msra.mxu3 %v3809_v63  ;;  %933 = vmatpush.bf16.msrb.mxu2 %v3727_v5 }
  0x8f   : > { %967 = vmatpush.bf16.msra.mxu1 %v3597_v14 }
  0x90   : > { %955 = vmatpush.bf16.msra.mxu0 %v3739_v10 }
  0x91   : > { %994 = vmatpush.bf16.msra.mxu3 %v3826_v17  ;;  %934 = vmatpush.bf16.msrb.mxu2 %v3754_v24 }
  0x93   : > { %968 = vmatpush.bf16.msra.mxu1 %v3626_v26 }
  0x94   : > { %956 = vmatpush.bf16.msra.mxu0 %v3765_v29 }
  0x95   : > { %979 = vmatpush.bf16.msra.mxu2 %v3770_v33  ;;  %995 = vmatpush.bf16.msra.mxu3 %v3842_v39 }
  0x97   : > { %969 = vmatpush.bf16.msra.mxu1 %v3647_v35 }
  0x98   : > { %957 = vmatpush.bf16.msra.mxu0 %v3796_v55 }
  0x99   : > { %980 = vmatpush.bf16.msra.mxu2 %v3794_v48  ;;  %996 = vmatpush.bf16.msra.mxu3 %v3853_v60 }
  0x9b   : > { %970 = vmatpush.bf16.msra.mxu1 %v3671_v45 }
  0x9c   : > { %958 = vmatpush.bf16.msra.mxu0 %v3815_v7 }
  0x9d   : > { %981 = vmatpush.bf16.msra.mxu2 %v3812_v0  ;;  %997 = vmatpush.bf16.msra.mxu3 %v3863_v18 }
  0x9f   : > { %971 = vmatpush.bf16.msra.mxu1 %v3704_v58 }
  0xa0   : > { %959 = vmatpush.bf16.msra.mxu0 %v3832_v34 }
  0xa1   : > { %982 = vmatpush.bf16.msra.mxu2 %v3829_v19  ;;  %998 = vmatpush.bf16.msra.mxu3 %v3875_v49 }
  0xa3   : > { %972 = vmatpush.bf16.msra.mxu1 %v3742_v11 }
  0xa4   : > { %960 = vmatpush.bf16.msra.mxu0 %v3848_v53 }
  0xa5   : > { %983 = vmatpush.bf16.msra.mxu2 %v3845_v42  ;;  %999 = vmatpush.bf16.msra.mxu3 %v3884_v59 }
  0xa7   : > { %973 = vmatpush.bf16.msra.mxu1 %v3768_v30 }
  0xa8   : > { %1168 = vmatpush.bf16.msrb.mxu0 %v3577_v4 }
  0xa9   : > { %984 = vmatpush.bf16.msra.mxu2 %v3856_v62 }
  0xab   : > { %1181 = vmatpush.bf16.msrb.mxu1 %v3599_v15 }
  0xac   : > { %1169 = vmatpush.bf16.msrb.mxu0 %v3591_v12 }
  0xad   : > { %985 = vmatpush.bf16.msra.mxu2 %v3867_v20 }
  0xaf   : > { %1182 = vmatpush.bf16.msrb.mxu1 %v3614_v22 }
  0xb0   : > { %1170 = vmatpush.bf16.msrb.mxu0 %v3617_v23 }
  0xb1   : > { %986 = vmatpush.bf16.msra.mxu2 %v3878_v46 }
  0xb3   : > { %1183 = vmatpush.bf16.msrb.mxu1 %v3635_v31 }
  0xb4   : > { %1171 = vmatpush.bf16.msrb.mxu0 %v3638_v32 }
  0xb7   : > { %1184 = vmatpush.bf16.msrb.mxu1 %v3656_v40 }
  0xb8   : > { %1172 = vmatpush.bf16.msrb.mxu0 %v3659_v41 }
  0xbb   : > { %1185 = vmatpush.bf16.msrb.mxu1 %v3685_v52 }
  0xbc   : > { %1173 = vmatpush.bf16.msrb.mxu0 %v3691_v54 }
  0xbf   : > { %1186 = vmatpush.bf16.msrb.mxu1 %v3721_v2 }
  0xc0   : > { %1174 = vmatpush.bf16.msrb.mxu0 %v3727_v5  ;;  %v2967_v5 = vld [vmem:[%s3551_s3 + $0x4] sm:$0xf] }
  0xc1   : > { %935 = vmatmul.bf16.vlgmr.msrb.gmra.mxu2 %v2967_v5  ;;  %948 = vmatmul.bf16.vlgmr.msrb.gmra.mxu3 %v2967_v5 }
  0xc2   : > { %961 = vmatmul.bf16.vlgmr.msra.gmra.mxu0 %v2967_v5  ;;  %1207 = vmatpush.bf16.msrb.mxu3 %v3585_v8 }
  0xc3   : > { %1187 = vmatpush.bf16.msrb.mxu1 %v3751_v21  ;;  %1194 = vmatpush.bf16.msrb.mxu2 %v3682_v51 }
  0xc4   : > { %1175 = vmatpush.bf16.msrb.mxu0 %v3754_v24 }
  0xc6   : > { %1208 = vmatpush.bf16.msrb.mxu3 %v3597_v14 }
  0xc7   : > { %1188 = vmatpush.bf16.msrb.mxu1 %v3779_v43  ;;  %1195 = vmatpush.bf16.msrb.mxu2 %v3712_v61 }
  0xc8   : > { %1220 = vmatpush.bf16.msra.mxu0 %v3770_v33 }
  0xca   : > { %1209 = vmatpush.bf16.msrb.mxu3 %v3626_v26 }
  0xcb   : > { %1196 = vmatpush.bf16.msrb.mxu2 %v3739_v10 }
  0xcc   : > { %1221 = vmatpush.bf16.msra.mxu0 %v3794_v48 }
  0xce   : > { %1210 = vmatpush.bf16.msrb.mxu3 %v3647_v35 }
  0xcf   : > { %1197 = vmatpush.bf16.msrb.mxu2 %v3765_v29 }
  0xd0   : > { %1222 = vmatpush.bf16.msra.mxu0 %v3812_v0 }
  0xd2   : > { %1211 = vmatpush.bf16.msrb.mxu3 %v3671_v45 }
  0xd3   : > { %1198 = vmatpush.bf16.msrb.mxu2 %v3796_v55 }
  0xd4   : > { %1223 = vmatpush.bf16.msra.mxu0 %v3829_v19 }
  0xd6   : > { %1212 = vmatpush.bf16.msrb.mxu3 %v3704_v58 }
  0xd7   : > { %1199 = vmatpush.bf16.msrb.mxu2 %v3815_v7 }
  0xd8   : > { %1224 = vmatpush.bf16.msra.mxu0 %v3845_v42 }
  0xda   : > { %1213 = vmatpush.bf16.msrb.mxu3 %v3742_v11 }
  0xdb   : > { %1200 = vmatpush.bf16.msrb.mxu2 %v3832_v34 }
  0xdc   : > { %1225 = vmatpush.bf16.msra.mxu0 %v3856_v62 }
  0xde   : > { %1214 = vmatpush.bf16.msrb.mxu3 %v3768_v30 }
  0xdf   : > { %1201 = vmatpush.bf16.msrb.mxu2 %v3848_v53 }
  0xe0   : > { %1226 = vmatpush.bf16.msra.mxu0 %v3867_v20 }
  0xe4   : > { %v555_v13 = vpop.f32.mrf.mxu0  ;;  %1227 = vmatpush.bf16.msra.mxu0 %v3878_v46 }
  0xe5   : > { %v556_v37 = vadd.f32 %v555_v13, %v3962_v27  ;;  %v3971_v13 = vperm.slane %v3956_v9, 1 }
  0xe7   : > { %v568_v28 = vpop.f32.mrf.mxu1 }
  0xeb   : > { %v730_v50 = vpop.f32.mrf.mxu3 }
  0xec   : > { %v731_v56 = vadd.f32 %v730_v50, %v3964_v36  ;;  %v557_v57 = vpop.f32.mrf.mxu0 }
  0xee   : > { %v760_v1 = vadd.f32 %v731_v56, %v556_v37  ;;  %v3975_v37 = vperm.slane %v408_v16, 1 }
  0xef   : > { %v570_v44 = vpop.f32.mrf.mxu1 }
  0xf0   : > { %v2961_v43 = vmul.f32 -1.442695, %v760_v1 }
  0xf2   : > { %3156 = vpow2.f32 %v2961_v43 }
  0xf3   : > { %v732_v24 = vpop.f32.mrf.mxu3 }
  0xf4   : > { %v569_v24 = vadd.f32 %v568_v28, %v3971_v13 }
  0xf7   : > { %v581_v49 = vpop.f32.mrf.mxu2 }
  0xf8   : > { %v3157_v59 = vpop.eup %3156 }
  0xf9   : > { %v764_v21 = vadd.f32 1.0, %v3157_v59 }
  0xfb   : > { %3158 = vrcp.f32 %v764_v21  ;;  %vm770_vm0 = vweird.f32 %v764_v21 }
  0xff   : > { %v583_v56 = vpop.f32.mrf.mxu2 }
 0x101   : > { %v3159_v5 = vpop.eup %3158 }
 0x102   : > { %v766_v50 = vmul.f32 %v3159_v5, %v764_v21  ;;  %vm771_vm1 = vweird.f32 %v3159_v5 }
 0x103   : > { %vm772_vm2 = vmor %vm770_vm0, %vm771_vm1 }
 0x104   : > { %v743_v43 = vpop.f32.mrf.mxu0  ;;  %v767_v44 = vsub.f32 1.0, %v766_v50  ;;  %v3991_v50 = vperm.slane %v408_v16, 2 }
 0x105   : > { %v744_v59 = vadd.f32 %v743_v43, %v3975_v37 }
 0x106   : > { %v768_v14 = vmul.f32 %v3159_v5, %v767_v44 }
 0x107   : > { %v780_v57 = vadd.f32 %v744_v59, %v569_v24  ;;  %v756_v1 = vpop.f32.mrf.mxu1  ;;  %v776_v24 = vand.u32 2147483648, %v764_v21 }
 0x108   : > { %v769_v56 = vadd.f32 %v3159_v5, %v768_v14 }
 0x109   : > { %v2962_v28 = vmul.f32 -1.442695, %v780_v57  ;;  %v774_v57 = vand.u32 2147483647, %v764_v21  ;;  %v777_v14 = vor.u32 1.1754944e-38, %v776_v24 }
 0x10a   : > { %v773_v19 = vsel %vm772_vm2, %v3159_v5, %v769_v56 }
 0x10b   : > { %3160 = vpow2.f32 %v2962_v28  ;;  %vm775_vm3 = vcmp.eq.f32.partialorder %v774_v57, 8.507059e+37 }
 0x10c   : > { %v745_v43 = vpop.f32.mrf.mxu0  ;;  %v778_v16 = vsel %vm775_vm3, %v777_v14, %v773_v19  ;;  %v811_v14 = vpop.permute.xlu0 %810 }
 0x10d   : > { %v757_v43 = vadd.f32 %v756_v1, %v3991_v50 }
 0x10f   : > { %v758_v59 = vpop.f32.mrf.mxu1  ;;  %v800_v21 = vmul.f32 %v778_v16, %v757_v43  ;;  %v4008_v43 = vld [vmem:[%s3565_s18 + $0x28] sm:$0xff]  ;;  %v2978_v16 = vld [vmem:[%s3565_s18 + $0x10] sm:$0xff] }
 0x110   : > { %v3998_v59 = vperm.slane %v3956_v9, 2  ;;  %2022 = vperm.xlu1 %3154, %v4008_v43   ;;  %1297 = vperm.xlu2 %3155, %v2978_v16   ;;  %v1301_v53 = vsub.f32 1.0, %v2978_v16 }
 0x111   : > { %v3161_v44 = vpop.eup %3160 }
 0x112   : > { %v784_v28 = vadd.f32 1.0, %v3161_v44  ;;  %v582_v5 = vadd.f32 %v581_v49, %v3998_v59 }
 0x114   : > { %3162 = vrcp.f32 %v784_v28  ;;  %v801_v19 = vadd.f32 %v800_v21, %v582_v5  ;;  %v796_v24 = vand.u32 2147483648, %v784_v28  ;;  %v794_v44 = vand.u32 2147483647, %v784_v28 }
 0x115   : > { %vm790_vm5 = vweird.f32 %v784_v28 }
 0x116   : > { %3164 = vtanh.f32 %v801_v19  ;;  %v797_v30 = vor.u32 1.1754944e-38, %v796_v24  ;;  %vm795_vm7 = vcmp.eq.f32.partialorder %v794_v44, 8.507059e+37 }
 0x118   : > { %1304 = vperm.xlu2 %3155, %v1301_v53  }
 0x11a   : > { %v3163_v56 = vpop.eup %3162 }
 0x11b   : > { %v786_v1 = vmul.f32 %v3163_v56, %v784_v28  ;;  %vm791_vm4 = vweird.f32 %v3163_v56 }
 0x11c   : > { %vm792_vm6 = vmor %vm790_vm5, %vm791_vm4 }
 0x11d   : > { %v787_v9 = vsub.f32 1.0, %v786_v1  ;;  %v3165_v1 = vpop.eup %3164 }
 0x11f   : > { %v788_v57 = vmul.f32 %v3163_v56, %v787_v9  ;;  %v2267_v9 = vsub.f32 1.0, %v3896_v3 }
 0x120   : > { %1780 = vperm.xlu2 %3155, %v3871_v38   ;;  %v901_v38 = vld [vmem:[%s3567_s9] sm:$0x1] }
 0x121   : > { %v789_v49 = vadd.f32 %v3163_v56, %v788_v57  ;;  %v818_v57 = vpop.permute.xlu0 %817  ;;  %2270 = vperm.xlu1 %3154, %v2267_v9   ;;  %v4911_v9 = vld [vmem:[#allocation22_spill] sm:$0xff] }
 0x122   : > { %v820_v24 = vmul.f32 %v818_v57, %v3756_v25 }
 0x123   : > { %v793_v46 = vsel %vm792_vm6, %v3163_v56, %v789_v49  ;;  %v3407_v56 = vmov 286326784   ;;  %vm1140_vm6 = vsmask.f32 7938 }
 0x124   : > { %v798_v21 = vsel %vm795_vm7, %v797_v30, %v793_v46  ;;  %v859_v44 = vunpack.c.l.s4 %v3407_v56  ;;  %v904_v56 = vld [vmem:[%s3567_s9 + $0x4] sm:$0x1]  ;;  %vm4143_vm7 = vmand %vm825_vm8, %vm1140_vm6 }
 0x125   : > { %v803_v5 = vsub.f32 1.0, %v798_v21  ;;  %v805_v28 = vmul.f32 %v798_v21, %v3756_v25 }
 0x127   : > { %v804_v34 = vmul.f32 %v3165_v1, %v803_v5  ;;  %v2026_v1 = vsub.f32 1.0, %v4008_v43 }
 0x129   : > { %v806_v19 = vadd.f32 %v805_v28, %v804_v34  ;;  %v4019_v34 = vunpack.c.0.s8 %v859_v44  ;;  %2029 = vperm.xlu2 %3155, %v2026_v1   ;;  %v4910_v1 = vld [vmem:[#allocation20_spill] sm:$0xff] }
 0x12b   : > { %v813_v20 = vmul.f32 %v811_v14, %v806_v19 }
 0x12d   : > { %v4015_v11 = vadd.f32 %v820_v24, %v813_v20 }
 0x12f   : > { %v822_v30 = vpack.c.bf16 %v4015_v11, %v4015_v11 }
 0x131   : > { %v824_v46 = vrot.slane %v822_v30, 3  ;;  %974 = vmatmul.bf16.vlgmr.msra.gmra.mxu1 %v822_v30  ;;  %987 = vmatmul.bf16.vlgmr.msra.gmra.mxu2 %v822_v30 }
 0x132   : > { %1000 = vmatmul.bf16.vlgmr.msra.gmra.mxu3 %v822_v30  ;;  %1233 = vmatpush.bf16.msra.mxu1 %v3789_v47 }
 0x133   : > { %v828_v25 = vsel %vm825_vm8, %v822_v30, %v824_v46  ;;  %v831_v53 = vsel %vm830_vm9, %v822_v30, %v824_v46  ;;  %v835_v20 = vsel %vm834_vm10, %v822_v30, %v824_v46  ;;  %v839_v3 = vsel %vm838_vm11, %v822_v30, %v824_v46  ;;  %1410 = vmatpush.bf16.msra.mxu2 %v3577_v4 }
 0x134   : > { %v833_v14 = vrot.slane %v831_v53, 1  ;;  %v837_v49 = vrot.slane %v835_v20, 2  ;;  %v841_v16 = vrot.slane %v839_v3, 3  ;;  %v843_v21 = vunpack.i.h.s16 %v828_v25  ;;  %1423 = vmatpush.bf16.msra.mxu3 %v3599_v15  ;;  %v913_v53 = vld [vmem:[%s3567_s9 + $0x10] sm:$0x1]  ;;  %2505 = vperm.xlu2 %3155, %v3905_v6   ;;  %v4914_v6 = vld [vmem:[#allocation26_spill] sm:$0xff] }
 0x135   : > { %v2963_v5 = vpack.i.b16 %v828_v25, %v828_v25  ;;  %v907_v25 = vld [vmem:[%s3567_s9 + $0x8] sm:$0x1] }
 0x136   : > { %v845_v28 = vunpack.i.h.s16 %v833_v14  ;;  %v847_v19 = vunpack.i.h.s16 %v837_v49  ;;  %v849_v57 = vunpack.i.h.s16 %v841_v16  ;;  %v851_v24 = vpack.i.b16 %v843_v21, %v843_v21  ;;  %1234 = vmatpush.bf16.msra.mxu1 %v3809_v63  ;;  %v910_v21 = vld [vmem:[%s3567_s9 + $0xc] sm:$0x1]  ;;  %v916_v63 = vld [vmem:[%s3567_s9 + $0x14] sm:$0x1] }
 0x137   : > { %v2964_v44 = vpack.i.b16 %v833_v14, %v833_v14  ;;  %v2965_v30 = vpack.i.b16 %v837_v49, %v837_v49  ;;  %v2966_v46 = vpack.i.b16 %v841_v16, %v841_v16  ;;  %v861_v43 = vperm.slane %v2963_v5, %v4019_v34  ;;  %1411 = vmatpush.bf16.msra.mxu2 %v3591_v12 }
 0x138   : > { %v853_v20 = vpack.i.b16 %v845_v28, %v845_v28  ;;  %v855_v3 = vpack.i.b16 %v847_v19, %v847_v19  ;;  %v857_v15 = vpack.i.b16 %v849_v57, %v849_v57  ;;  %v865_v4 = vperm.slane %v851_v24, %v4019_v34  ;;  %1424 = vmatpush.bf16.msra.mxu3 %v3614_v22  ;;  %v919_v28 = vld [vmem:[%s3567_s9 + $0x18] sm:$0x1] }
 0x139   : > { %v869_v14 = vperm.slane %v2964_v44, %v4019_v34  ;;  %v877_v49 = vperm.slane %v2965_v30, %v4019_v34  ;;  %v885_v16 = vperm.slane %v2966_v46, %v4019_v34  ;;  %v902_v5 = vsel %vm4032_vm13, %v861_v43, %v901_v38  ;;  %v922_v30 = vld [vmem:[%s3567_s9 + $0x1c] sm:$0x1] }
 0x13a   : > { %v873_v19 = vperm.slane %v853_v20, %v4019_v34  ;;  %v881_v57 = vperm.slane %v855_v3, %v4019_v34  ;;  %v889_v24 = vperm.slane %v857_v15, %v4019_v34  ;;  %903 = vst [vmem:[%s3567_s9] sm:$0x1] %v902_v5  ;;  %v905_v44 = vsel %vm4032_vm13, %v865_v4, %v904_v56 }
 0x13b   : > { %906 = vst [vmem:[%s3567_s9 + $0x4] sm:$0x1] %v905_v44  ;;  %v908_v38 = vsel %vm4032_vm13, %v869_v14, %v907_v25  ;;  %v914_v46 = vsel %vm4032_vm13, %v877_v49, %v913_v53  ;;  %1235 = vmatpush.bf16.msra.mxu1 %v3826_v17  ;;  %1412 = vmatpush.bf16.msra.mxu2 %v3617_v23  ;;  %v4912_v25 = vld [vmem:[#allocation39_spill] sm:$0xff] }
 0x13c   : > { %909 = vst [vmem:[%s3567_s9 + $0x8] sm:$0x1] %v908_v38  ;;  %v911_v15 = vsel %vm4032_vm13, %v873_v19, %v910_v21  ;;  %v917_v4 = vsel %vm4032_vm13, %v881_v57, %v916_v63  ;;  %v920_v56 = vsel %vm4032_vm13, %v885_v16, %v919_v28  ;;  %1425 = vmatpush.bf16.msra.mxu3 %v3635_v31  ;;  %v4909_v63 = vld [vmem:[#allocation37_spill] sm:$0xff]  ;;  %v4913_v53 = vld [vmem:[#allocation23_spill] sm:$0xff] }
 0x13d   : > { %912 = vst [vmem:[%s3567_s9 + $0xc] sm:$0x1] %v911_v15  ;;  %v923_v43 = vsel %vm4032_vm13, %v889_v24, %v922_v30 }
 0x13e   : > { %915 = vst [vmem:[%s3567_s9 + $0x10] sm:$0x1] %v914_v46 }
 0x13f   : > { %918 = vst [vmem:[%s3567_s9 + $0x14] sm:$0x1] %v917_v4  ;;  %1236 = vmatpush.bf16.msra.mxu1 %v3842_v39  ;;  %1413 = vmatpush.bf16.msra.mxu2 %v3638_v32  ;;  %v962_v49 = vpop.f32.mrf.mxu0 }
 0x140   : > { %921 = vst [vmem:[%s3567_s9 + $0x18] sm:$0x1] %v920_v56  ;;  %1426 = vmatpush.bf16.msra.mxu3 %v3656_v40  ;;  %v2975_v56 = vld [vmem:[%s3551_s3 + $0x8] sm:$0xf] }
 0x141   : > { %924 = vst [vmem:[%s3567_s9 + $0x1c] sm:$0x1] %v923_v43  ;;  %1176 = vmatmul.bf16.vlgmr.msrb.gmra.mxu0 %v2975_v56  ;;  %1189 = vmatmul.bf16.vlgmr.msrb.gmra.mxu1 %v2975_v56 }
 0x142   : > { %1202 = vmatmul.bf16.vlgmr.msrb.gmra.mxu2 %v2975_v56  ;;  %1436 = vmatpush.bf16.msrb.mxu0 %v3682_v51 }
 0x143   : > { %1237 = vmatpush.bf16.msra.mxu1 %v3853_v60  ;;  %1414 = vmatpush.bf16.msra.mxu2 %v3659_v41 }
 0x144   : > { %1427 = vmatpush.bf16.msra.mxu3 %v3685_v52  ;;  %v936_v20 = vpop.f32.mrf.mxu2  ;;  %v949_v3 = vpop.f32.mrf.mxu3 }
 0x145   : > { %v937_v5 = vadd.f32 %v936_v20, %v3962_v27  ;;  %v950_v57 = vadd.f32 %v949_v3, %v3971_v13 }
 0x146   : > { %1437 = vmatpush.bf16.msrb.mxu0 %v3712_v61 }
 0x147   : > { %1238 = vmatpush.bf16.msra.mxu1 %v3863_v18  ;;  %1415 = vmatpush.bf16.msra.mxu2 %v3691_v54  ;;  %v964_v44 = vpop.f32.mrf.mxu0 }
 0x148   : > { %1428 = vmatpush.bf16.msra.mxu3 %v3721_v2  ;;  %v4916_v44 = vld [vmem:[#allocation31_spill] sm:$0xff] }
 0x14a   : > { %1438 = vmatpush.bf16.msrb.mxu0 %v3739_v10 }
 0x14b   : > { %1239 = vmatpush.bf16.msra.mxu1 %v4909_v63  ;;  %1416 = vmatpush.bf16.msra.mxu2 %v4910_v1 }
 0x14c   : > { %1429 = vmatpush.bf16.msra.mxu3 %v4911_v9  ;;  %v938_v21 = vpop.f32.mrf.mxu2  ;;  %v951_v14 = vpop.f32.mrf.mxu3 }
 0x14e   : > { %1439 = vmatpush.bf16.msrb.mxu0 %v3765_v29 }
 0x14f   : > { %1240 = vmatpush.bf16.msra.mxu1 %v4912_v25  ;;  %1417 = vmatpush.bf16.msra.mxu2 %v4913_v53 }
 0x150   : > { %1430 = vmatpush.bf16.msra.mxu3 %v4914_v6 }
 0x152   : > { %1440 = vmatpush.bf16.msrb.mxu0 %v3796_v55 }
 0x153   : > { %1449 = vmatpush.bf16.msrb.mxu1 %v3585_v8  ;;  %1462 = vmatpush.bf16.msrb.mxu2 %v3770_v33 }
 0x156   : > { %1441 = vmatpush.bf16.msrb.mxu0 %v3815_v7 }
 0x157   : > { %1463 = vmatpush.bf16.msrb.mxu2 %v3794_v48 }
 0x15b   : > { %1464 = vmatpush.bf16.msrb.mxu2 %v3812_v0 }
 0x15f   : > { %1465 = vmatpush.bf16.msrb.mxu2 %v4916_v44 }
 0x163   : > { %1466 = vmatpush.bf16.msrb.mxu2 %v3845_v42 }
 0x167   : > { %1467 = vmatpush.bf16.msrb.mxu2 %v3856_v62 }
 0x1ae   : > { %v975_v16 = vpop.f32.mrf.mxu1 }
 0x1af   : > { %v976_v28 = vadd.f32 %v975_v16, %v3964_v36  ;;  %v4915_v16 = vld [vmem:[#allocation16_spill] sm:$0xff] }
 0x1b0   : > { %1450 = vmatpush.bf16.msrb.mxu1 %v4915_v16 }
 0x1b1   : > { %v1005_v19 = vadd.f32 %v976_v28, %v937_v5 }
 0x1b3   : > { %v2968_v24 = vmul.f32 -1.442695, %v1005_v19 }
 0x1b4   : > { %v988_v30 = vpop.f32.mrf.mxu2  ;;  %1451 = vmatpush.bf16.msrb.mxu1 %v3626_v26 }
 0x1b5   : > { %3166 = vpow2.f32 %v2968_v24  ;;  %v989_v38 = vadd.f32 %v988_v30, %v3975_v37  ;;  %v1001_v46 = vpop.f32.mrf.mxu3 }
 0x1b6   : > { %v977_v15 = vpop.f32.mrf.mxu1 }
 0x1b7   : > { %v1025_v4 = vadd.f32 %v989_v38, %v950_v57 }
 0x1b8   : > { %1452 = vmatpush.bf16.msrb.mxu1 %v3647_v35 }
 0x1b9   : > { %v2969_v43 = vmul.f32 -1.442695, %v1025_v4 }
 0x1bb   : > { %v3167_v20 = vpop.eup %3166  ;;  %3168 = vpow2.f32 %v2969_v43 }
 0x1bc   : > { %v1009_v3 = vadd.f32 1.0, %v3167_v20  ;;  %v990_v21 = vpop.f32.mrf.mxu2  ;;  %1453 = vmatpush.bf16.msrb.mxu1 %v3671_v45 }
 0x1bd   : > { %v1003_v14 = vpop.f32.mrf.mxu3  ;;  %v963_v21 = vadd.f32 %v962_v49, %v3998_v59 }
 0x1be   : > { %3170 = vrcp.f32 %v1009_v3  ;;  %v1021_v30 = vand.u32 2147483648, %v1009_v3  ;;  %v1019_v15 = vand.u32 2147483647, %v1009_v3  ;;  %vm1015_vm15 = vweird.f32 %v1009_v3 }
 0x1c0   : > { %v1022_v20 = vor.u32 1.1754944e-38, %v1021_v30  ;;  %vm1020_vm1 = vcmp.eq.f32.partialorder %v1019_v15, 8.507059e+37  ;;  %1454 = vmatpush.bf16.msrb.mxu1 %v3704_v58  ;;  %v1057_v30 = vpop.permute.xlu1 %1056 }
 0x1c1   : > { %v3169_v5 = vpop.eup %3168 }
 0x1c2   : > { %v1029_v28 = vadd.f32 1.0, %v3169_v5  ;;  %v1002_v5 = vadd.f32 %v1001_v46, %v3991_v50  ;;  %v4917_v46 = vld [vmem:[#allocation21_spill] sm:$0xff] }
 0x1c4   : > { %v3171_v19 = vpop.eup %3170  ;;  %3172 = vrcp.f32 %v1029_v28  ;;  %v1041_v29 = vand.u32 2147483648, %v1029_v28  ;;  %vm1035_vm3 = vweird.f32 %v1029_v28  ;;  %1455 = vmatpush.bf16.msrb.mxu1 %v4917_v46 }
 0x1c5   : > { %v1011_v57 = vmul.f32 %v3171_v19, %v1009_v3  ;;  %vm1016_vm14 = vweird.f32 %v3171_v19  ;;  %v1039_v3 = vand.u32 2147483647, %v1029_v28 }
 0x1c6   : > { %vm1017_vm0 = vmor %vm1015_vm15, %vm1016_vm14  ;;  %v1042_v15 = vor.u32 1.1754944e-38, %v1041_v29 }
 0x1c7   : > { %v1012_v24 = vsub.f32 1.0, %v1011_v57  ;;  %vm1040_vm5 = vcmp.eq.f32.partialorder %v1039_v3, 8.507059e+37 }
 0x1c9   : > { %v1013_v38 = vmul.f32 %v3171_v19, %v1012_v24 }
 0x1ca   : > { %v3173_v4 = vpop.eup %3172 }
 0x1cb   : > { %v1031_v56 = vmul.f32 %v3173_v4, %v1029_v28  ;;  %v1014_v43 = vadd.f32 %v3171_v19, %v1013_v38  ;;  %vm1036_vm2 = vweird.f32 %v3173_v4 }
 0x1cc   : > { %vm1037_vm4 = vmor %vm1035_vm3, %vm1036_vm2 }
 0x1cd   : > { %v1032_v14 = vsub.f32 1.0, %v1031_v56  ;;  %v1018_v57 = vsel %vm1017_vm0, %v3171_v19, %v1014_v43  ;;  %v4918_v43 = vld [vmem:[#allocation36_spill] sm:$0xff] }
 0x1ce   : > { %v1023_v24 = vsel %vm1020_vm1, %v1022_v20, %v1018_v57  ;;  %1468 = vmatpush.bf16.msrb.mxu2 %v4918_v43  ;;  %v4919_v20 = vld [vmem:[#allocation32_spill] sm:$0xff]  ;;  %v4921_v57 = vld [vmem:[#allocation38_spill] sm:$0xff] }
 0x1cf   : > { %v1033_v45 = vmul.f32 %v3173_v4, %v1032_v14  ;;  %v1045_v38 = vmul.f32 %v1023_v24, %v1002_v5  ;;  %1442 = vmatpush.bf16.msrb.mxu0 %v4919_v20  ;;  %v4920_v5 = vld [vmem:[#allocation25_spill] sm:$0xff]  ;;  %v4922_v24 = vld [vmem:[#allocation34_spill] sm:$0xff] }
 0x1d0   : > { %1456 = vmatpush.bf16.msrb.mxu1 %v4920_v5 }
 0x1d1   : > { %v1034_v49 = vadd.f32 %v3173_v4, %v1033_v45  ;;  %v1046_v56 = vadd.f32 %v1045_v38, %v963_v21 }
 0x1d2   : > { %1469 = vmatpush.bf16.msrb.mxu2 %v4921_v57 }
 0x1d3   : > { %v1038_v19 = vsel %vm1037_vm4, %v3173_v4, %v1034_v49  ;;  %3174 = vtanh.f32 %v1046_v56  ;;  %1443 = vmatpush.bf16.msrb.mxu0 %v4922_v24  ;;  %v1064_v4 = vpop.permute.xlu1 %1063  ;;  %vm1382_vm4 = vsmask.f32 1280 }
 0x1d4   : > { %v1043_v14 = vsel %vm1040_vm5, %v1042_v15, %v1038_v19  ;;  %v1066_v49 = vmul.f32 %v1064_v4, %v4015_v11  ;;  %vm4254_vm5 = vmand %vm830_vm9, %vm1382_vm4 }
 0x1d5   : > { %v1048_v45 = vsub.f32 1.0, %v1043_v14  ;;  %v1050_v38 = vmul.f32 %v1043_v14, %v4015_v11 }
 0x1d9   : > { %v3175_v28 = vpop.eup %3174 }
 0x1da   : > { %v1049_v21 = vmul.f32 %v3175_v28, %v1048_v45 }
 0x1dc   : > { %v1051_v29 = vadd.f32 %v1050_v38, %v1049_v21 }
 0x1de   : > { %v1059_v56 = vmul.f32 %v1057_v30, %v1051_v29  ;;  %v4924_v30 = vld [vmem:[#allocation15_spill] sm:$0xff]  ;;  %v4925_v29 = vld [vmem:[#allocation17_spill] sm:$0xff] }
 0x1e0   : > { %v4131_v43 = vadd.f32 %v1066_v49, %v1059_v56  ;;  %v1177_v56 = vpop.f32.mrf.mxu0 }
 0x1e2   : > { %4923 = vst [vmem:[#allocation37_spill] sm:$0xff] %v4131_v43  ;;  %v1068_v3 = vpack.c.bf16 %v4131_v43, %v4131_v43 }
 0x1e4   : > { %v1070_v19 = vrot.slane %v1068_v3, 3  ;;  %1215 = vmatmul.bf16.vlgmr.msrb.gmra.mxu3 %v1068_v3  ;;  %1228 = vmatmul.bf16.vlgmr.msra.gmra.mxu0 %v1068_v3 }
 0x1e5   : > { %1241 = vmatmul.bf16.vlgmr.msra.gmra.mxu1 %v1068_v3  ;;  %1475 = vmatpush.bf16.msrb.mxu3 %v3789_v47 }
 0x1e6   : > { %v1073_v15 = vsel %vm825_vm8, %v1068_v3, %v1070_v19  ;;  %v1075_v14 = vsel %vm830_vm9, %v1068_v3, %v1070_v19  ;;  %v1078_v45 = vsel %vm834_vm10, %v1068_v3, %v1070_v19  ;;  %v1081_v11 = vsel %vm838_vm11, %v1068_v3, %v1070_v19  ;;  %1651 = vmatpush.bf16.msra.mxu0 %v4924_v30  ;;  %v4928_v3 = vld [vmem:[#allocation29_spill] sm:$0xff] }
 0x1e7   : > { %v1077_v28 = vrot.slane %v1075_v14, 1  ;;  %v1080_v21 = vrot.slane %v1078_v45, 2  ;;  %v1083_v38 = vrot.slane %v1081_v11, 3  ;;  %v1085_v4 = vunpack.i.h.s16 %v1073_v15  ;;  %1664 = vmatpush.bf16.msra.mxu1 %v4925_v29 }
 0x1e8   : > { %v2971_v49 = vpack.i.b16 %v1073_v15, %v1073_v15 }
 0x1e9   : > { %v1087_v47 = vunpack.i.h.s16 %v1077_v28  ;;  %v1089_v43 = vunpack.i.h.s16 %v1080_v21  ;;  %v1091_v24 = vunpack.i.h.s16 %v1083_v38  ;;  %v1093_v57 = vpack.i.b16 %v1085_v4, %v1085_v4  ;;  %1476 = vmatpush.bf16.msrb.mxu3 %v4928_v3  ;;  %v1142_v4 = vld [vmem:[%s3567_s9] sm:$0x1] }
 0x1ea   : > { %v2972_v19 = vpack.i.b16 %v1077_v28, %v1077_v28  ;;  %v2973_v14 = vpack.i.b16 %v1080_v21, %v1080_v21  ;;  %v2974_v45 = vpack.i.b16 %v1083_v38, %v1083_v38  ;;  %v1103_v11 = vperm.slane %v2971_v49, %v4019_v34  ;;  %1652 = vmatpush.bf16.msra.mxu0 %v3591_v12 }
 0x1eb   : > { %v1095_v15 = vpack.i.b16 %v1087_v47, %v1087_v47  ;;  %v1097_v29 = vpack.i.b16 %v1089_v43, %v1089_v43  ;;  %v1099_v30 = vpack.i.b16 %v1091_v24, %v1091_v24  ;;  %v1107_v5 = vperm.slane %v1093_v57, %v4019_v34  ;;  %1665 = vmatpush.bf16.msra.mxu1 %v3614_v22  ;;  %v1145_v43 = vld [vmem:[%s3567_s9 + $0x4] sm:$0x1] }
 0x1ec   : > { %v1111_v28 = vperm.slane %v2972_v19, %v4019_v34  ;;  %v1119_v21 = vperm.slane %v2973_v14, %v4019_v34  ;;  %v1127_v38 = vperm.slane %v2974_v45, %v4019_v34  ;;  %v1143_v47 = vsel %vm4143_vm7, %v1103_v11, %v1142_v4  ;;  %v1148_v14 = vld [vmem:[%s3567_s9 + $0x8] sm:$0x1]  ;;  %v1154_v45 = vld [vmem:[%s3567_s9 + $0x10] sm:$0x1]  ;;  %v1157_v4 = vld [vmem:[%s3567_s9 + $0x14] sm:$0x1] }
 0x1ed   : > { %v1115_v24 = vperm.slane %v1095_v15, %v4019_v34  ;;  %v1123_v57 = vperm.slane %v1097_v29, %v4019_v34  ;;  %v1131_v49 = vperm.slane %v1099_v30, %v4019_v34  ;;  %1144 = vst [vmem:[%s3567_s9] sm:$0x1] %v1143_v47  ;;  %v1146_v19 = vsel %vm4143_vm7, %v1107_v5, %v1145_v43  ;;  %v1151_v15 = vld [vmem:[%s3567_s9 + $0xc] sm:$0x1]  ;;  %v1163_v47 = vld [vmem:[%s3567_s9 + $0x1c] sm:$0x1] }
 0x1ee   : > { %1147 = vst [vmem:[%s3567_s9 + $0x4] sm:$0x1] %v1146_v19  ;;  %v1149_v11 = vsel %vm4143_vm7, %v1111_v28, %v1148_v14  ;;  %v1155_v29 = vsel %vm4143_vm7, %v1119_v21, %v1154_v45  ;;  %1477 = vmatpush.bf16.msrb.mxu3 %v3826_v17  ;;  %1653 = vmatpush.bf16.msra.mxu0 %v3617_v23  ;;  %v1160_v28 = vld [vmem:[%s3567_s9 + $0x18] sm:$0x1] }
 0x1ef   : > { %1150 = vst [vmem:[%s3567_s9 + $0x8] sm:$0x1] %v1149_v11  ;;  %v1152_v5 = vsel %vm4143_vm7, %v1115_v24, %v1151_v15  ;;  %v1158_v30 = vsel %vm4143_vm7, %v1123_v57, %v1157_v4  ;;  %1666 = vmatpush.bf16.msra.mxu1 %v3635_v31  ;;  %v1161_v21 = vsel %vm4143_vm7, %v1127_v38, %v1160_v28  ;;  %v1190_v38 = vpop.f32.mrf.mxu1  ;;  %v1179_v24 = vpop.f32.mrf.mxu0 }
 0x1f0   : > { %1153 = vst [vmem:[%s3567_s9 + $0xc] sm:$0x1] %v1152_v5  ;;  %v1164_v43 = vsel %vm4143_vm7, %v1131_v49, %v1163_v47  ;;  %v1203_v49 = vpop.f32.mrf.mxu2  ;;  %v1191_v19 = vadd.f32 %v1190_v38, %v3971_v13 }
 0x1f1   : > { %1156 = vst [vmem:[%s3567_s9 + $0x10] sm:$0x1] %v1155_v29 }
 0x1f2   : > { %1159 = vst [vmem:[%s3567_s9 + $0x14] sm:$0x1] %v1158_v30  ;;  %1478 = vmatpush.bf16.msrb.mxu3 %v3842_v39  ;;  %1654 = vmatpush.bf16.msra.mxu0 %v3638_v32  ;;  %v1178_v30 = vadd.f32 %v1177_v56, %v3962_v27 }
 0x1f3   : > { %1162 = vst [vmem:[%s3567_s9 + $0x18] sm:$0x1] %v1161_v21  ;;  %1667 = vmatpush.bf16.msra.mxu1 %v3656_v40 }
 0x1f4   : > { %1165 = vst [vmem:[%s3567_s9 + $0x1c] sm:$0x1] %v1164_v43 }
 0x1f6   : > { %1479 = vmatpush.bf16.msrb.mxu3 %v3853_v60  ;;  %1655 = vmatpush.bf16.msra.mxu0 %v3659_v41 }
 0x1f7   : > { %1668 = vmatpush.bf16.msra.mxu1 %v3685_v52  ;;  %v1192_v57 = vpop.f32.mrf.mxu1 }
 0x1f8   : > { %v1205_v29 = vpop.f32.mrf.mxu2  ;;  %v2983_v57 = vld [vmem:[%s3551_s3 + $0xc] sm:$0xf] }
 0x1f9   : > { %1418 = vmatmul.bf16.vlgmr.msra.gmra.mxu2 %v2983_v57  ;;  %1431 = vmatmul.bf16.vlgmr.msra.gmra.mxu3 %v2983_v57 }
 0x1fa   : > { %1480 = vmatpush.bf16.msrb.mxu3 %v3863_v18  ;;  %1656 = vmatpush.bf16.msra.mxu0 %v3691_v54 }
 0x1fb   : > { %1669 = vmatpush.bf16.msra.mxu1 %v3721_v2  ;;  %1444 = vmatmul.bf16.vlgmr.msrb.gmra.mxu0 %v2983_v57 }
 0x1fc   : > { %1677 = vmatpush.bf16.msra.mxu2 %v3682_v51 }
 0x1fe   : > { %1481 = vmatpush.bf16.msrb.mxu3 %v4909_v63  ;;  %1657 = vmatpush.bf16.msra.mxu0 %v4910_v1 }
 0x1ff   : > { %1670 = vmatpush.bf16.msra.mxu1 %v4911_v9 }
 0x200   : > { %1678 = vmatpush.bf16.msra.mxu2 %v3712_v61 }
 0x202   : > { %1482 = vmatpush.bf16.msrb.mxu3 %v4912_v25  ;;  %1658 = vmatpush.bf16.msra.mxu0 %v4913_v53 }
 0x203   : > { %1671 = vmatpush.bf16.msra.mxu1 %v4914_v6 }
 0x204   : > { %1679 = vmatpush.bf16.msra.mxu2 %v3739_v10 }
 0x206   : > { %1690 = vmatpush.bf16.msra.mxu3 %v3585_v8  ;;  %1703 = vmatpush.bf16.msrb.mxu0 %v3770_v33 }
 0x20a   : > { %1691 = vmatpush.bf16.msra.mxu3 %v4915_v16  ;;  %1704 = vmatpush.bf16.msrb.mxu0 %v3794_v48 }
 0x20e   : > { %1692 = vmatpush.bf16.msra.mxu3 %v3626_v26  ;;  %1705 = vmatpush.bf16.msrb.mxu0 %v3812_v0 }
 0x212   : > { %1693 = vmatpush.bf16.msra.mxu3 %v3647_v35  ;;  %1706 = vmatpush.bf16.msrb.mxu0 %v4916_v44 }
 0x216   : > { %1707 = vmatpush.bf16.msrb.mxu0 %v3845_v42 }
 0x21a   : > { %1708 = vmatpush.bf16.msrb.mxu0 %v3856_v62  ;;  %v4932_v62 = vld [vmem:[#allocation25_spill] sm:$0xff] }
 0x261   : > { %v1229_v14 = vpop.f32.mrf.mxu0 }
 0x262   : > { %v1230_v45 = vadd.f32 %v1229_v14, %v3975_v37  ;;  %v1242_v11 = vpop.f32.mrf.mxu1 }
 0x264   : > { %v1266_v15 = vadd.f32 %v1230_v45, %v1191_v19 }
 0x266   : > { %v2977_v4 = vmul.f32 -1.442695, %v1266_v15 }
 0x267   : > { %v1216_v5 = vpop.f32.mrf.mxu3 }
 0x268   : > { %3176 = vpow2.f32 %v2977_v4  ;;  %v1217_v28 = vadd.f32 %v1216_v5, %v3964_v36  ;;  %v4929_v4 = vld [vmem:[#allocation24_spill] sm:$0xff] }
 0x269   : > { %v1231_v21 = vpop.f32.mrf.mxu0  ;;  %1680 = vmatpush.bf16.msra.mxu2 %v4929_v4 }
 0x26a   : > { %v1246_v47 = vadd.f32 %v1217_v28, %v1178_v30  ;;  %v1244_v43 = vpop.f32.mrf.mxu1  ;;  %v4930_v28 = vld [vmem:[#allocation19_spill] sm:$0xff] }
 0x26b   : > { %1694 = vmatpush.bf16.msra.mxu3 %v4930_v28 }
 0x26c   : > { %v2976_v24 = vmul.f32 -1.442695, %v1246_v47 }
 0x26d   : > { %1681 = vmatpush.bf16.msra.mxu2 %v3796_v55  ;;  %v1204_v55 = vadd.f32 %v1203_v49, %v3998_v59 }
 0x26e   : > { %v3177_v38 = vpop.eup %3176  ;;  %3178 = vpow2.f32 %v2976_v24 }
 0x26f   : > { %v1270_v19 = vadd.f32 1.0, %v3177_v38  ;;  %v1218_v14 = vpop.f32.mrf.mxu3  ;;  %1695 = vmatpush.bf16.msra.mxu3 %v3704_v58 }
 0x271   : > { %3180 = vrcp.f32 %v1270_v19  ;;  %1682 = vmatpush.bf16.msra.mxu2 %v3815_v7  ;;  %v1282_v7 = vand.u32 2147483648, %v1270_v19  ;;  %vm1276_vm1 = vweird.f32 %v1270_v19 }
 0x273   : > { %1696 = vmatpush.bf16.msra.mxu3 %v4917_v46 }
 0x274   : > { %v3179_v56 = vpop.eup %3178 }
 0x275   : > { %v1250_v45 = vadd.f32 1.0, %v3179_v56  ;;  %1683 = vmatpush.bf16.msra.mxu2 %v4919_v20 }
 0x277   : > { %3182 = vrcp.f32 %v1250_v45  ;;  %v3181_v15 = vpop.eup %3180  ;;  %v1262_v43 = vand.u32 2147483648, %v1250_v45  ;;  %v1260_v57 = vand.u32 2147483647, %v1250_v45  ;;  %vm1256_vm13 = vweird.f32 %v1250_v45  ;;  %1697 = vmatpush.bf16.msra.mxu3 %v4932_v62 }
 0x278   : > { %v1272_v29 = vmul.f32 %v3181_v15, %v1270_v19  ;;  %vm1277_vm0 = vweird.f32 %v3181_v15 }
 0x279   : > { %v1263_v56 = vor.u32 1.1754944e-38, %v1262_v43  ;;  %vm1261_vm15 = vcmp.eq.f32.partialorder %v1260_v57, 8.507059e+37  ;;  %v1298_v43 = vpop.permute.xlu2 %1297  ;;  %vm1278_vm2 = vmor %vm1276_vm1, %vm1277_vm0  ;;  %v4934_v57 = vld [vmem:[#allocation34_spill] sm:$0xff] }
 0x27a   : > { %v1273_v21 = vsub.f32 1.0, %v1272_v29  ;;  %v1243_v29 = vadd.f32 %v1242_v11, %v3991_v50  ;;  %1684 = vmatpush.bf16.msra.mxu2 %v4934_v57  ;;  %v1390_v57 = vld [vmem:[%s3567_s9 + $0x8] sm:$0x2] }
 0x27c   : > { %v1274_v38 = vmul.f32 %v3181_v15, %v1273_v21  ;;  %v4931_v21 = vld [vmem:[#allocation36_spill] sm:$0xff] }
 0x27d   : > { %v3183_v5 = vpop.eup %3182  ;;  %1709 = vmatpush.bf16.msrb.mxu0 %v4931_v21 }
 0x27e   : > { %v1252_v30 = vmul.f32 %v3183_v5, %v1250_v45  ;;  %vm1257_vm12 = vweird.f32 %v3183_v5  ;;  %v1275_v42 = vadd.f32 %v3181_v15, %v1274_v38  ;;  %v1280_v45 = vand.u32 2147483647, %v1270_v19 }
 0x27f   : > { %vm1258_vm14 = vmor %vm1256_vm13, %vm1257_vm12  ;;  %v1283_v38 = vor.u32 1.1754944e-38, %v1282_v7  ;;  %v4937_v7 = vld [vmem:[#allocation27_spill] sm:$0xff] }
 0x280   : > { %v1253_v47 = vsub.f32 1.0, %v1252_v30  ;;  %v1279_v49 = vsel %vm1278_vm2, %v3181_v15, %v1275_v42  ;;  %vm1281_vm3 = vcmp.eq.f32.partialorder %v1280_v45, 8.507059e+37  ;;  %vm1623_vm2 = vsmask.f32 7942 }
 0x281   : > { %v1305_v19 = vpop.permute.xlu2 %1304 }
 0x282   : > { %v1254_v24 = vmul.f32 %v3183_v5, %v1253_v47 }
 0x284   : > { %v1255_v14 = vadd.f32 %v3183_v5, %v1254_v24 }
 0x286   : > { %v1259_v30 = vsel %vm1258_vm14, %v3183_v5, %v1255_v14  ;;  %v4933_v5 = vld [vmem:[#allocation38_spill] sm:$0xff]  ;;  %v1284_v14 = vsel %vm1281_vm3, %v1283_v38, %v1279_v49  ;;  %vm4365_vm3 = vmand %vm830_vm9, %vm1623_vm2 }
 0x287   : > { %v1264_v47 = vsel %vm1261_vm15, %v1263_v56, %v1259_v30  ;;  %1710 = vmatpush.bf16.msrb.mxu0 %v4933_v5  ;;  %v1289_v56 = vsub.f32 1.0, %v1284_v14 }
 0x288   : > { %v1286_v24 = vmul.f32 %v1264_v47, %v1243_v29  ;;  %v4935_v29 = vld [vmem:[#allocation37_spill] sm:$0xff] }
 0x289   : > { %v1291_v47 = vmul.f32 %v1284_v14, %v4935_v29 }
 0x28a   : > { %v1287_v11 = vadd.f32 %v1286_v24, %v1204_v55  ;;  %v1307_v55 = vmul.f32 %v1305_v19, %v4935_v29 }
 0x28c   : > { %3184 = vtanh.f32 %v1287_v11 }
 0x292   : > { %v3185_v30 = vpop.eup %3184 }
 0x293   : > { %v1290_v20 = vmul.f32 %v3185_v30, %v1289_v56  ;;  %v4939_v30 = vld [vmem:[#allocation17_spill] sm:$0xff] }
 0x295   : > { %v1292_v21 = vadd.f32 %v1291_v47, %v1290_v20 }
 0x297   : > { %v1300_v24 = vmul.f32 %v1298_v43, %v1292_v21  ;;  %v4938_v43 = vld [vmem:[#allocation15_spill] sm:$0xff] }
 0x299   : > { %v4241_v62 = vadd.f32 %v1307_v55, %v1300_v24 }
 0x29b   : > { %4936 = vst [vmem:[#allocation20_spill] sm:$0xff] %v4241_v62  ;;  %v1309_v42 = vpack.c.bf16 %v4241_v62, %v4241_v62 }
 0x29d   : > { %v1311_v15 = vrot.slane %v1309_v42, 3  ;;  %1457 = vmatmul.bf16.vlgmr.msrb.gmra.mxu1 %v1309_v42  ;;  %1470 = vmatmul.bf16.vlgmr.msrb.gmra.mxu2 %v1309_v42 }
 0x29e   : > { %1483 = vmatmul.bf16.vlgmr.msrb.gmra.mxu3 %v1309_v42  ;;  %1716 = vmatpush.bf16.msrb.mxu1 %v4937_v7 }
 0x29f   : > { %v1314_v45 = vsel %vm825_vm8, %v1309_v42, %v1311_v15  ;;  %v1316_v20 = vsel %vm830_vm9, %v1309_v42, %v1311_v15  ;;  %v1319_v11 = vsel %vm834_vm10, %v1309_v42, %v1311_v15  ;;  %v1322_v21 = vsel %vm838_vm11, %v1309_v42, %v1311_v15  ;;  %1893 = vmatpush.bf16.msrb.mxu2 %v4938_v43  ;;  %v1384_v15 = vld [vmem:[%s3567_s9] sm:$0x2] }
 0x2a0   : > { %v1318_v49 = vrot.slane %v1316_v20, 1  ;;  %v1321_v38 = vrot.slane %v1319_v11, 2  ;;  %v1324_v14 = vrot.slane %v1322_v21, 3  ;;  %v1326_v56 = vunpack.i.h.s16 %v1314_v45  ;;  %1906 = vmatpush.bf16.msrb.mxu3 %v4939_v30  ;;  %v1387_v30 = vld [vmem:[%s3567_s9 + $0x4] sm:$0x2] }
 0x2a1   : > { %v2979_v29 = vpack.i.b16 %v1314_v45, %v1314_v45 }
 0x2a2   : > { %v1328_v47 = vunpack.i.h.s16 %v1318_v49  ;;  %v1330_v19 = vunpack.i.h.s16 %v1321_v38  ;;  %v1332_v55 = vunpack.i.h.s16 %v1324_v14  ;;  %v1334_v24 = vpack.i.b16 %v1326_v56, %v1326_v56  ;;  %1717 = vmatpush.bf16.msrb.mxu1 %v4928_v3  ;;  %v1396_v3 = vld [vmem:[%s3567_s9 + $0x10] sm:$0x2] }
 0x2a3   : > { %v2980_v20 = vpack.i.b16 %v1318_v49, %v1318_v49  ;;  %v2981_v11 = vpack.i.b16 %v1321_v38, %v1321_v38  ;;  %v2982_v21 = vpack.i.b16 %v1324_v14, %v1324_v14  ;;  %v1344_v45 = vperm.slane %v2979_v29, %v4019_v34  ;;  %1894 = vmatpush.bf16.msrb.mxu2 %v3591_v12 }
 0x2a4   : > { %v1336_v56 = vpack.i.b16 %v1328_v47, %v1328_v47  ;;  %v1338_v43 = vpack.i.b16 %v1330_v19, %v1330_v19  ;;  %v1340_v7 = vpack.i.b16 %v1332_v55, %v1332_v55  ;;  %v1348_v62 = vperm.slane %v1334_v24, %v4019_v34  ;;  %1907 = vmatpush.bf16.msrb.mxu3 %v3614_v22  ;;  %v1393_v47 = vld [vmem:[%s3567_s9 + $0xc] sm:$0x2]  ;;  %v1399_v19 = vld [vmem:[%s3567_s9 + $0x14] sm:$0x2] }
 0x2a5   : > { %v1352_v49 = vperm.slane %v2980_v20, %v4019_v34  ;;  %v1360_v38 = vperm.slane %v2981_v11, %v4019_v34  ;;  %v1368_v14 = vperm.slane %v2982_v21, %v4019_v34  ;;  %v1385_v29 = vsel %vm4254_vm5, %v1344_v45, %v1384_v15  ;;  %v1402_v11 = vld [vmem:[%s3567_s9 + $0x18] sm:$0x2]  ;;  %v1405_v45 = vld [vmem:[%s3567_s9 + $0x1c] sm:$0x2] }
 0x2a6   : > { %v1356_v55 = vperm.slane %v1336_v56, %v4019_v34  ;;  %v1364_v24 = vperm.slane %v1338_v43, %v4019_v34  ;;  %v1372_v22 = vperm.slane %v1340_v7, %v4019_v34  ;;  %1386 = vst [vmem:[%s3567_s9] sm:$0x2] %v1385_v29  ;;  %v1388_v20 = vsel %vm4254_vm5, %v1348_v62, %v1387_v30  ;;  %v1432_v43 = vpop.f32.mrf.mxu3  ;;  %v1445_v56 = vpop.f32.mrf.mxu0 }
 0x2a7   : > { %1389 = vst [vmem:[%s3567_s9 + $0x4] sm:$0x2] %v1388_v20  ;;  %v1391_v15 = vsel %vm4254_vm5, %v1352_v49, %v1390_v57  ;;  %v1397_v21 = vsel %vm4254_vm5, %v1360_v38, %v1396_v3  ;;  %1718 = vmatpush.bf16.msrb.mxu1 %v3826_v17  ;;  %1895 = vmatpush.bf16.msrb.mxu2 %v3617_v23 }
 0x2a8   : > { %1392 = vst [vmem:[%s3567_s9 + $0x8] sm:$0x2] %v1391_v15  ;;  %v1394_v62 = vsel %vm4254_vm5, %v1356_v55, %v1393_v47  ;;  %v1400_v7 = vsel %vm4254_vm5, %v1364_v24, %v1399_v19  ;;  %1908 = vmatpush.bf16.msrb.mxu3 %v3635_v31  ;;  %v1403_v57 = vsel %vm4254_vm5, %v1368_v14, %v1402_v11 }
 0x2a9   : > { %1395 = vst [vmem:[%s3567_s9 + $0xc] sm:$0x2] %v1394_v62  ;;  %v1406_v3 = vsel %vm4254_vm5, %v1372_v22, %v1405_v45  ;;  %v1419_v22 = vpop.f32.mrf.mxu2  ;;  %v1433_v47 = vadd.f32 %v1432_v43, %v3971_v13  ;;  %v2991_v45 = vld [vmem:[%s3551_s3 + $0x10] sm:$0xf] }
 0x2aa   : > { %1398 = vst [vmem:[%s3567_s9 + $0x10] sm:$0x2] %v1397_v21  ;;  %v1420_v38 = vadd.f32 %v1419_v22, %v3962_v27  ;;  %1659 = vmatmul.bf16.vlgmr.msra.gmra.mxu0 %v2991_v45 }
 0x2ab   : > { %1401 = vst [vmem:[%s3567_s9 + $0x14] sm:$0x2] %v1400_v7  ;;  %1719 = vmatpush.bf16.msrb.mxu1 %v3842_v39  ;;  %1896 = vmatpush.bf16.msrb.mxu2 %v3638_v32 }
 0x2ac   : > { %1404 = vst [vmem:[%s3567_s9 + $0x18] sm:$0x2] %v1403_v57  ;;  %1909 = vmatpush.bf16.msrb.mxu3 %v3656_v40  ;;  %1919 = vmatpush.bf16.msra.mxu0 %v3682_v51 }
 0x2ad   : > { %1407 = vst [vmem:[%s3567_s9 + $0x1c] sm:$0x2] %v1406_v3  ;;  %1672 = vmatmul.bf16.vlgmr.msra.gmra.mxu1 %v2991_v45  ;;  %1685 = vmatmul.bf16.vlgmr.msra.gmra.mxu2 %v2991_v45  ;;  %v1446_v45 = vadd.f32 %v1445_v56, %v3998_v59 }
 0x2ae   : > { %v1434_v42 = vpop.f32.mrf.mxu3  ;;  %v1447_v55 = vpop.f32.mrf.mxu0 }
 0x2af   : > { %1720 = vmatpush.bf16.msrb.mxu1 %v3853_v60  ;;  %1897 = vmatpush.bf16.msrb.mxu2 %v3659_v41 }
 0x2b0   : > { %1910 = vmatpush.bf16.msrb.mxu3 %v3685_v52  ;;  %1920 = vmatpush.bf16.msra.mxu0 %v3712_v61 }
 0x2b1   : > { %v1421_v30 = vpop.f32.mrf.mxu2 }
 0x2b3   : > { %1721 = vmatpush.bf16.msrb.mxu1 %v3863_v18  ;;  %1898 = vmatpush.bf16.msrb.mxu2 %v3691_v54 }
 0x2b4   : > { %1911 = vmatpush.bf16.msrb.mxu3 %v3721_v2  ;;  %1921 = vmatpush.bf16.msra.mxu0 %v3739_v10 }
 0x2b7   : > { %1722 = vmatpush.bf16.msrb.mxu1 %v4909_v63  ;;  %1899 = vmatpush.bf16.msrb.mxu2 %v4910_v1 }
 0x2b8   : > { %1912 = vmatpush.bf16.msrb.mxu3 %v4911_v9  ;;  %1922 = vmatpush.bf16.msra.mxu0 %v4929_v4 }
 0x2bb   : > { %1723 = vmatpush.bf16.msrb.mxu1 %v4912_v25  ;;  %1900 = vmatpush.bf16.msrb.mxu2 %v4913_v53 }
 0x2bc   : > { %1913 = vmatpush.bf16.msrb.mxu3 %v4914_v6 }
 0x2bf   : > { %1932 = vmatpush.bf16.msra.mxu1 %v3585_v8  ;;  %1945 = vmatpush.bf16.msra.mxu2 %v3770_v33 }
 0x2c3   : > { %1933 = vmatpush.bf16.msra.mxu1 %v4915_v16  ;;  %1946 = vmatpush.bf16.msra.mxu2 %v3794_v48 }
 0x2c7   : > { %1934 = vmatpush.bf16.msra.mxu1 %v3626_v26  ;;  %1947 = vmatpush.bf16.msra.mxu2 %v3812_v0 }
 0x2cb   : > { %1935 = vmatpush.bf16.msra.mxu1 %v3647_v35  ;;  %1948 = vmatpush.bf16.msra.mxu2 %v4916_v44 }
 0x2cf   : > { %1936 = vmatpush.bf16.msra.mxu1 %v4930_v28 }
 0x2d3   : > { %1937 = vmatpush.bf16.msra.mxu1 %v3704_v58 }
 0x2d7   : > { %1938 = vmatpush.bf16.msra.mxu1 %v4917_v46 }
 0x31a   : > { %v1458_v49 = vpop.f32.mrf.mxu1 }
 0x31b   : > { %v1459_v14 = vadd.f32 %v1458_v49, %v3964_v36 }
 0x31d   : > { %v1488_v29 = vadd.f32 %v1459_v14, %v1420_v38 }
 0x31f   : > { %v2984_v19 = vmul.f32 -1.442695, %v1488_v29 }
 0x320   : > { %v1471_v24 = vpop.f32.mrf.mxu2 }
 0x321   : > { %3186 = vpow2.f32 %v2984_v19  ;;  %v1472_v20 = vadd.f32 %v1471_v24, %v3975_v37  ;;  %v1484_v11 = vpop.f32.mrf.mxu3 }
 0x322   : > { %v1460_v15 = vpop.f32.mrf.mxu1 }
 0x323   : > { %v1508_v21 = vadd.f32 %v1472_v20, %v1433_v47  ;;  %v4942_v20 = vld [vmem:[#allocation33_spill] sm:$0xff]  ;;  %v4943_v15 = vld [vmem:[#allocation28_spill] sm:$0xff] }
 0x324   : > { %1949 = vmatpush.bf16.msra.mxu2 %v4942_v20  ;;  %1923 = vmatpush.bf16.msra.mxu0 %v4943_v15 }
 0x325   : > { %v2985_v62 = vmul.f32 -1.442695, %v1508_v21 }
 0x327   : > { %v3187_v7 = vpop.eup %3186  ;;  %3188 = vpow2.f32 %v2985_v62 }
 0x328   : > { %v1492_v57 = vadd.f32 1.0, %v3187_v7  ;;  %v1473_v3 = vpop.f32.mrf.mxu2  ;;  %v1485_v7 = vadd.f32 %v1484_v11, %v3991_v50 }
 0x329   : > { %v1486_v22 = vpop.f32.mrf.mxu3 }
 0x32a   : > { %3190 = vrcp.f32 %v1492_v57  ;;  %v1504_v14 = vand.u32 2147483648, %v1492_v57  ;;  %v1502_v47 = vand.u32 2147483647, %v1492_v57  ;;  %vm1498_vm7 = vweird.f32 %v1492_v57 }
 0x32c   : > { %v1505_v21 = vor.u32 1.1754944e-38, %v1504_v14  ;;  %vm1503_vm13 = vcmp.eq.f32.partialorder %v1502_v47, 8.507059e+37  ;;  %v4946_v47 = vld [vmem:[#allocation36_spill] sm:$0xff] }
 0x32d   : > { %v3189_v43 = vpop.eup %3188 }
 0x32e   : > { %v1512_v30 = vadd.f32 1.0, %v3189_v43 }
 0x330   : > { %v3191_v42 = vpop.eup %3190  ;;  %3192 = vrcp.f32 %v1512_v30  ;;  %v1522_v15 = vand.u32 2147483647, %v1512_v30  ;;  %vm1518_vm15 = vweird.f32 %v1512_v30 }
 0x331   : > { %v1494_v49 = vmul.f32 %v3191_v42, %v1492_v57  ;;  %vm1499_vm6 = vweird.f32 %v3191_v42  ;;  %v4944_v57 = vld [vmem:[#allocation35_spill] sm:$0xff] }
 0x332   : > { %vm1500_vm12 = vmor %vm1498_vm7, %vm1499_vm6  ;;  %1950 = vmatpush.bf16.msra.mxu2 %v4944_v57  ;;  %vm1523_vm1 = vcmp.eq.f32.partialorder %v1522_v15, 8.507059e+37 }
 0x333   : > { %v1495_v38 = vsub.f32 1.0, %v1494_v49  ;;  %v1524_v49 = vand.u32 2147483648, %v1512_v30 }
 0x335   : > { %v1496_v29 = vmul.f32 %v3191_v42, %v1495_v38 }
 0x336   : > { %v3193_v19 = vpop.eup %3192  ;;  %1951 = vmatpush.bf16.msra.mxu2 %v4946_v47  ;;  %v4958_v47 = vld [vmem:[#allocation18_spill] sm:$0xff] }
 0x337   : > { %v1514_v55 = vmul.f32 %v3193_v19, %v1512_v30  ;;  %v1497_v24 = vadd.f32 %v3191_v42, %v1496_v29  ;;  %vm1519_vm14 = vweird.f32 %v3193_v19  ;;  %v4945_v29 = vld [vmem:[#allocation30_spill] sm:$0xff] }
 0x338   : > { %1924 = vmatpush.bf16.msra.mxu0 %v4945_v29  ;;  %vm1520_vm0 = vmor %vm1518_vm15, %vm1519_vm14 }
 0x339   : > { %v1515_v62 = vsub.f32 1.0, %v1514_v55  ;;  %v1501_v3 = vsel %vm1500_vm12, %v3191_v42, %v1497_v24  ;;  %v1525_v42 = vor.u32 1.1754944e-38, %v1524_v49  ;;  %v4947_v55 = vld [vmem:[#allocation32_spill] sm:$0xff]  ;;  %v1547_v49 = vpop.permute.xlu1 %1546 }
 0x33a   : > { %v1506_v22 = vsel %vm1503_vm13, %v1505_v21, %v1501_v3  ;;  %v4948_v21 = vld [vmem:[#allocation25_spill] sm:$0xff]  ;;  %1952 = vmatpush.bf16.msra.mxu2 %v4933_v5  ;;  %v4950_v3 = vld [vmem:[#allocation20_spill] sm:$0xff] }
 0x33b   : > { %v1516_v43 = vmul.f32 %v3193_v19, %v1515_v62  ;;  %v1528_v38 = vmul.f32 %v1506_v22, %v1485_v7  ;;  %1939 = vmatpush.bf16.msra.mxu1 %v4948_v21  ;;  %v4949_v62 = vld [vmem:[#allocation34_spill] sm:$0xff]  ;;  %v1660_v21 = vpop.f32.mrf.mxu0 }
 0x33c   : > { %1925 = vmatpush.bf16.msra.mxu0 %v4947_v55  ;;  %v1625_v55 = vld [vmem:[%s3567_s9] sm:$0x2] }
 0x33d   : > { %v1517_v14 = vadd.f32 %v3193_v19, %v1516_v43  ;;  %v1529_v56 = vadd.f32 %v1528_v38, %v1446_v45  ;;  %v1540_v43 = vpop.permute.xlu0 %1539 }
 0x33f   : > { %v1521_v11 = vsel %vm1520_vm0, %v3193_v19, %v1517_v14  ;;  %3194 = vtanh.f32 %v1529_v56  ;;  %v1549_v14 = vmul.f32 %v1547_v49, %v4950_v3  ;;  %vm1865_vm0 = vsmask.f32 2304 }
 0x340   : > { %v1526_v24 = vsel %vm1523_vm1, %v1525_v42, %v1521_v11  ;;  %1926 = vmatpush.bf16.msra.mxu0 %v4949_v62  ;;  %v4952_v42 = vld [vmem:[#allocation27_spill] sm:$0xff]  ;;  %vm4476_vm1 = vmand %vm834_vm10, %vm1865_vm0 }
 0x341   : > { %v1531_v30 = vsub.f32 1.0, %v1526_v24  ;;  %v1533_v22 = vmul.f32 %v1526_v24, %v4950_v3  ;;  %v4953_v3 = vld [vmem:[#allocation15_spill] sm:$0xff] }
 0x345   : > { %v3195_v45 = vpop.eup %3194 }
 0x346   : > { %v1532_v7 = vmul.f32 %v3195_v45, %v1531_v30 }
 0x348   : > { %v1534_v19 = vadd.f32 %v1533_v22, %v1532_v7 }
 0x34a   : > { %v1542_v38 = vmul.f32 %v1540_v43, %v1534_v19 }
 0x34c   : > { %v4352_v56 = vadd.f32 %v1549_v14, %v1542_v38  ;;  %v4954_v38 = vld [vmem:[#allocation17_spill] sm:$0xff] }
 0x34e   : > { %4951 = vst [vmem:[#allocation22_spill] sm:$0xff] %v4352_v56  ;;  %v1551_v15 = vpack.c.bf16 %v4352_v56, %v4352_v56 }
 0x350   : > { %v1553_v11 = vrot.slane %v1551_v15, 3  ;;  %1698 = vmatmul.bf16.vlgmr.msra.gmra.mxu3 %v1551_v15  ;;  %1711 = vmatmul.bf16.vlgmr.msrb.gmra.mxu0 %v1551_v15 }
 0x351   : > { %1724 = vmatmul.bf16.vlgmr.msrb.gmra.mxu1 %v1551_v15  ;;  %1958 = vmatpush.bf16.msra.mxu3 %v4952_v42 }
 0x352   : > { %v1556_v24 = vsel %vm825_vm8, %v1551_v15, %v1553_v11  ;;  %v1558_v30 = vsel %vm830_vm9, %v1551_v15, %v1553_v11  ;;  %v1561_v45 = vsel %vm834_vm10, %v1551_v15, %v1553_v11  ;;  %v1564_v7 = vsel %vm838_vm11, %v1551_v15, %v1553_v11  ;;  %2134 = vmatpush.bf16.msrb.mxu0 %v4953_v3  ;;  %v4957_v15 = vld [vmem:[#allocation29_spill] sm:$0xff] }
 0x353   : > { %v1560_v22 = vrot.slane %v1558_v30, 1  ;;  %v1563_v19 = vrot.slane %v1561_v45, 2  ;;  %v1566_v43 = vrot.slane %v1564_v7, 3  ;;  %v1568_v49 = vunpack.i.h.s16 %v1556_v24  ;;  %2147 = vmatpush.bf16.msrb.mxu1 %v4954_v38 }
 0x354   : > { %v2987_v14 = vpack.i.b16 %v1556_v24, %v1556_v24 }
 0x355   : > { %v1570_v56 = vunpack.i.h.s16 %v1560_v22  ;;  %v1572_v42 = vunpack.i.h.s16 %v1563_v19  ;;  %v1574_v62 = vunpack.i.h.s16 %v1566_v43  ;;  %v1576_v5 = vpack.i.b16 %v1568_v49, %v1568_v49  ;;  %1959 = vmatpush.bf16.msra.mxu3 %v4957_v15 }
 0x356   : > { %v2988_v11 = vpack.i.b16 %v1560_v22, %v1560_v22  ;;  %v2989_v30 = vpack.i.b16 %v1563_v19, %v1563_v19  ;;  %v2990_v45 = vpack.i.b16 %v1566_v43, %v1566_v43  ;;  %v1586_v7 = vperm.slane %v2987_v14, %v4019_v34  ;;  %2135 = vmatpush.bf16.msrb.mxu0 %v3591_v12 }
 0x357   : > { %v1578_v24 = vpack.i.b16 %v1570_v56, %v1570_v56  ;;  %v1580_v49 = vpack.i.b16 %v1572_v42, %v1572_v42  ;;  %v1582_v38 = vpack.i.b16 %v1574_v62, %v1574_v62  ;;  %v1590_v3 = vperm.slane %v1576_v5, %v4019_v34  ;;  %2148 = vmatpush.bf16.msrb.mxu1 %v4958_v47  ;;  %v1628_v42 = vld [vmem:[%s3567_s9 + $0x4] sm:$0x2] }
 0x358   : > { %v1594_v22 = vperm.slane %v2988_v11, %v4019_v34  ;;  %v1602_v19 = vperm.slane %v2989_v30, %v4019_v34  ;;  %v1610_v43 = vperm.slane %v2990_v45, %v4019_v34  ;;  %v1626_v56 = vsel %vm4365_vm3, %v1586_v7, %v1625_v55  ;;  %v1631_v30 = vld [vmem:[%s3567_s9 + $0x8] sm:$0x2]  ;;  %v1637_v45 = vld [vmem:[%s3567_s9 + $0x10] sm:$0x2]  ;;  %v1634_v7 = vld [vmem:[%s3567_s9 + $0xc] sm:$0x2] }
 0x359   : > { %v1598_v62 = vperm.slane %v1578_v24, %v4019_v34  ;;  %v1606_v5 = vperm.slane %v1580_v49, %v4019_v34  ;;  %v1614_v14 = vperm.slane %v1582_v38, %v4019_v34  ;;  %1627 = vst [vmem:[%s3567_s9] sm:$0x2] %v1626_v56  ;;  %v1629_v11 = vsel %vm4365_vm3, %v1590_v3, %v1628_v42  ;;  %v1640_v49 = vld [vmem:[%s3567_s9 + $0x14] sm:$0x2]  ;;  %v1646_v56 = vld [vmem:[%s3567_s9 + $0x1c] sm:$0x2] }
 0x35a   : > { %1630 = vst [vmem:[%s3567_s9 + $0x4] sm:$0x2] %v1629_v11  ;;  %v1632_v55 = vsel %vm4365_vm3, %v1594_v22, %v1631_v30  ;;  %v1638_v24 = vsel %vm4365_vm3, %v1602_v19, %v1637_v45  ;;  %1960 = vmatpush.bf16.msra.mxu3 %v3826_v17  ;;  %2136 = vmatpush.bf16.msrb.mxu0 %v3617_v23  ;;  %v1643_v22 = vld [vmem:[%s3567_s9 + $0x18] sm:$0x2] }
 0x35b   : > { %1633 = vst [vmem:[%s3567_s9 + $0x8] sm:$0x2] %v1632_v55  ;;  %v1635_v3 = vsel %vm4365_vm3, %v1598_v62, %v1634_v7  ;;  %v1641_v38 = vsel %vm4365_vm3, %v1606_v5, %v1640_v49  ;;  %2149 = vmatpush.bf16.msrb.mxu1 %v3635_v31  ;;  %v1644_v19 = vsel %vm4365_vm3, %v1610_v43, %v1643_v22  ;;  %v1673_v43 = vpop.f32.mrf.mxu1  ;;  %v1662_v62 = vpop.f32.mrf.mxu0 }
 0x35c   : > { %1636 = vst [vmem:[%s3567_s9 + $0xc] sm:$0x2] %v1635_v3  ;;  %v1647_v42 = vsel %vm4365_vm3, %v1614_v14, %v1646_v56  ;;  %v1686_v14 = vpop.f32.mrf.mxu2  ;;  %v1674_v11 = vadd.f32 %v1673_v43, %v3971_v13 }
 0x35d   : > { %1639 = vst [vmem:[%s3567_s9 + $0x10] sm:$0x2] %v1638_v24 }
 0x35e   : > { %1642 = vst [vmem:[%s3567_s9 + $0x14] sm:$0x2] %v1641_v38  ;;  %1961 = vmatpush.bf16.msra.mxu3 %v3842_v39  ;;  %2137 = vmatpush.bf16.msrb.mxu0 %v3638_v32  ;;  %v1661_v38 = vadd.f32 %v1660_v21, %v3962_v27 }
 0x35f   : > { %1645 = vst [vmem:[%s3567_s9 + $0x18] sm:$0x2] %v1644_v19  ;;  %2150 = vmatpush.bf16.msrb.mxu1 %v3656_v40 }
 0x360   : > { %1648 = vst [vmem:[%s3567_s9 + $0x1c] sm:$0x2] %v1647_v42 }
 0x362   : > { %1962 = vmatpush.bf16.msra.mxu3 %v3853_v60  ;;  %2138 = vmatpush.bf16.msrb.mxu0 %v3659_v41 }
 0x363   : > { %2151 = vmatpush.bf16.msrb.mxu1 %v3685_v52  ;;  %v1675_v5 = vpop.f32.mrf.mxu1 }
 0x364   : > { %v1688_v24 = vpop.f32.mrf.mxu2  ;;  %v2999_v5 = vld [vmem:[%s3551_s3 + $0x14] sm:$0xf] }
 0x365   : > { %1901 = vmatmul.bf16.vlgmr.msrb.gmra.mxu2 %v2999_v5  ;;  %1914 = vmatmul.bf16.vlgmr.msrb.gmra.mxu3 %v2999_v5 }
 0x366   : > { %1963 = vmatpush.bf16.msra.mxu3 %v3863_v18  ;;  %2139 = vmatpush.bf16.msrb.mxu0 %v3691_v54 }
 0x367   : > { %2152 = vmatpush.bf16.msrb.mxu1 %v3721_v2  ;;  %1927 = vmatmul.bf16.vlgmr.msra.gmra.mxu0 %v2999_v5 }
 0x368   : > { %2160 = vmatpush.bf16.msrb.mxu2 %v3682_v51 }
 0x36a   : > { %1964 = vmatpush.bf16.msra.mxu3 %v4909_v63  ;;  %2140 = vmatpush.bf16.msrb.mxu0 %v4910_v1 }
 0x36b   : > { %2153 = vmatpush.bf16.msrb.mxu1 %v4911_v9 }
 0x36c   : > { %2161 = vmatpush.bf16.msrb.mxu2 %v3712_v61 }
 0x36e   : > { %1965 = vmatpush.bf16.msra.mxu3 %v4912_v25  ;;  %2141 = vmatpush.bf16.msrb.mxu0 %v4913_v53 }
 0x36f   : > { %2154 = vmatpush.bf16.msrb.mxu1 %v4914_v6 }
 0x370   : > { %2162 = vmatpush.bf16.msrb.mxu2 %v3739_v10 }
 0x372   : > { %2173 = vmatpush.bf16.msrb.mxu3 %v3585_v8  ;;  %2186 = vmatpush.bf16.msra.mxu0 %v3770_v33 }
 0x374   : > { %2163 = vmatpush.bf16.msrb.mxu2 %v4929_v4 }
 0x376   : > { %2174 = vmatpush.bf16.msrb.mxu3 %v4915_v16  ;;  %2187 = vmatpush.bf16.msra.mxu0 %v3794_v48 }
 0x37a   : > { %2175 = vmatpush.bf16.msrb.mxu3 %v3626_v26  ;;  %2188 = vmatpush.bf16.msra.mxu0 %v3812_v0 }
 0x37e   : > { %2176 = vmatpush.bf16.msrb.mxu3 %v3647_v35  ;;  %2189 = vmatpush.bf16.msra.mxu0 %v4916_v44 }
 0x382   : > { %2177 = vmatpush.bf16.msrb.mxu3 %v4930_v28  ;;  %2190 = vmatpush.bf16.msra.mxu0 %v4942_v20 }
 0x386   : > { %2178 = vmatpush.bf16.msrb.mxu3 %v3704_v58  ;;  %2191 = vmatpush.bf16.msra.mxu0 %v4944_v57  ;;  %v4961_v57 = vld [vmem:[#allocation32_spill] sm:$0xff] }
 0x38a   : > { %2179 = vmatpush.bf16.msrb.mxu3 %v4917_v46  ;;  %v1781_v46 = vpop.permute.xlu2 %1780 }
 0x3cd   : > { %v1712_v30 = vpop.f32.mrf.mxu0 }
 0x3ce   : > { %v1713_v45 = vadd.f32 %v1712_v30, %v3975_v37  ;;  %v1725_v55 = vpop.f32.mrf.mxu1 }
 0x3d0   : > { %v1749_v7 = vadd.f32 %v1713_v45, %v1674_v11 }
 0x3d2   : > { %v2993_v49 = vmul.f32 -1.442695, %v1749_v7 }
 0x3d3   : > { %v1699_v3 = vpop.f32.mrf.mxu3 }
 0x3d4   : > { %3196 = vpow2.f32 %v2993_v49  ;;  %v1700_v22 = vadd.f32 %v1699_v3, %v3964_v36 }
 0x3d5   : > { %v1714_v19 = vpop.f32.mrf.mxu0 }
 0x3d6   : > { %v1729_v56 = vadd.f32 %v1700_v22, %v1661_v38  ;;  %v1727_v42 = vpop.f32.mrf.mxu1  ;;  %v4959_v22 = vld [vmem:[#allocation28_spill] sm:$0xff] }
 0x3d7   : > { %2164 = vmatpush.bf16.msrb.mxu2 %v4959_v22 }
 0x3d8   : > { %v2992_v62 = vmul.f32 -1.442695, %v1729_v56 }
 0x3da   : > { %v3197_v43 = vpop.eup %3196  ;;  %3198 = vpow2.f32 %v2992_v62 }
 0x3db   : > { %v1753_v11 = vadd.f32 1.0, %v3197_v43  ;;  %v1701_v30 = vpop.f32.mrf.mxu3  ;;  %2165 = vmatpush.bf16.msrb.mxu2 %v4945_v29 }
 0x3dd   : > { %3200 = vrcp.f32 %v1753_v11  ;;  %v1765_v29 = vand.u32 2147483648, %v1753_v11  ;;  %vm1759_vm13 = vweird.f32 %v1753_v11 }
 0x3df   : > { %2166 = vmatpush.bf16.msrb.mxu2 %v4961_v57 }
 0x3e0   : > { %v3199_v21 = vpop.eup %3198 }
 0x3e1   : > { %v1733_v45 = vadd.f32 1.0, %v3199_v21  ;;  %v1726_v21 = vadd.f32 %v1725_v55, %v3991_v50  ;;  %v4962_v55 = vld [vmem:[#allocation25_spill] sm:$0xff] }
 0x3e2   : > { %2180 = vmatpush.bf16.msrb.mxu3 %v4962_v55 }
 0x3e3   : > { %3202 = vrcp.f32 %v1733_v45  ;;  %v3201_v7 = vpop.eup %3200  ;;  %v1745_v56 = vand.u32 2147483648, %v1733_v45  ;;  %v1743_v62 = vand.u32 2147483647, %v1733_v45  ;;  %vm1739_vm5 = vweird.f32 %v1733_v45 }
 0x3e4   : > { %v1755_v24 = vmul.f32 %v3201_v7, %v1753_v11  ;;  %vm1760_vm12 = vweird.f32 %v3201_v7 }
 0x3e5   : > { %v1746_v30 = vor.u32 1.1754944e-38, %v1745_v56  ;;  %vm1744_vm7 = vcmp.eq.f32.partialorder %v1743_v62, 8.507059e+37  ;;  %vm1761_vm14 = vmor %vm1759_vm13, %vm1760_vm12  ;;  %v4964_v62 = vld [vmem:[#allocation34_spill] sm:$0xff] }
 0x3e6   : > { %v1756_v38 = vsub.f32 1.0, %v1755_v24  ;;  %v1687_v24 = vadd.f32 %v1686_v14, %v3998_v59  ;;  %2167 = vmatpush.bf16.msrb.mxu2 %v4964_v62 }
 0x3e8   : > { %v1757_v5 = vmul.f32 %v3201_v7, %v1756_v38  ;;  %v4960_v38 = vld [vmem:[#allocation36_spill] sm:$0xff] }
 0x3e9   : > { %v3203_v49 = vpop.eup %3202  ;;  %2192 = vmatpush.bf16.msra.mxu0 %v4960_v38  ;;  %v4965_v38 = vld [vmem:[#allocation22_spill] sm:$0xff] }
 0x3ea   : > { %v1735_v3 = vmul.f32 %v3203_v49, %v1733_v45  ;;  %vm1740_vm4 = vweird.f32 %v3203_v49  ;;  %v1758_v22 = vadd.f32 %v3201_v7, %v1757_v5  ;;  %v1763_v45 = vand.u32 2147483647, %v1753_v11  ;;  %v1788_v11 = vpop.permute.xlu0 %1787 }
 0x3eb   : > { %vm1741_vm6 = vmor %vm1739_vm5, %vm1740_vm4 }
 0x3ec   : > { %v1736_v19 = vsub.f32 1.0, %v1735_v3  ;;  %v1762_v14 = vsel %vm1761_vm14, %v3201_v7, %v1758_v22  ;;  %vm1764_vm15 = vcmp.eq.f32.partialorder %v1763_v45, 8.507059e+37  ;;  %v4967_v45 = vld [vmem:[#allocation27_spill] sm:$0xff]  ;;  %vm2106_vm14 = vsmask.f32 7946 }
 0x3ee   : > { %v1737_v42 = vmul.f32 %v3203_v49, %v1736_v19 }
 0x3f0   : > { %v1738_v43 = vadd.f32 %v3203_v49, %v1737_v42 }
 0x3f2   : > { %v1742_v3 = vsel %vm1741_vm6, %v3203_v49, %v1738_v43  ;;  %v4963_v49 = vld [vmem:[#allocation38_spill] sm:$0xff]  ;;  %v1766_v43 = vor.u32 1.1754944e-38, %v1765_v29 }
 0x3f3   : > { %v1747_v19 = vsel %vm1744_vm7, %v1746_v30, %v1742_v3  ;;  %2193 = vmatpush.bf16.msra.mxu0 %v4963_v49  ;;  %v1873_v49 = vld [vmem:[%s3567_s9 + $0x8] sm:$0x4] }
 0x3f4   : > { %v1769_v42 = vmul.f32 %v1747_v19, %v1726_v21  ;;  %v1767_v5 = vsel %vm1764_vm15, %v1766_v43, %v1762_v14  ;;  %v4968_v14 = vld [vmem:[#allocation15_spill] sm:$0xff]  ;;  %vm4585_vm15 = vmand %vm834_vm10, %vm2106_vm14 }
 0x3f5   : > { %v1772_v30 = vsub.f32 1.0, %v1767_v5  ;;  %v1774_v21 = vmul.f32 %v1767_v5, %v4965_v38 }
 0x3f6   : > { %v1770_v56 = vadd.f32 %v1769_v42, %v1687_v24  ;;  %v1790_v42 = vmul.f32 %v1788_v11, %v4965_v38 }
 0x3f8   : > { %3204 = vtanh.f32 %v1770_v56 }
 0x3fe   : > { %v3205_v3 = vpop.eup %3204 }
 0x3ff   : > { %v1773_v57 = vmul.f32 %v3205_v3, %v1772_v30 }
 0x401   : > { %v1775_v19 = vadd.f32 %v1774_v21, %v1773_v57  ;;  %v4969_v21 = vld [vmem:[#allocation17_spill] sm:$0xff] }
 0x403   : > { %v1783_v24 = vmul.f32 %v1781_v46, %v1775_v19 }
 0x405   : > { %v4463_v7 = vadd.f32 %v1790_v42, %v1783_v24 }
 0x407   : > { %4966 = vst [vmem:[#allocation39_spill] sm:$0xff] %v4463_v7  ;;  %v1792_v22 = vpack.c.bf16 %v4463_v7, %v4463_v7 }
 0x409   : > { %v1794_v29 = vrot.slane %v1792_v22, 3  ;;  %1940 = vmatmul.bf16.vlgmr.msra.gmra.mxu1 %v1792_v22  ;;  %1953 = vmatmul.bf16.vlgmr.msra.gmra.mxu2 %v1792_v22 }
 0x40a   : > { %1966 = vmatmul.bf16.vlgmr.msra.gmra.mxu3 %v1792_v22  ;;  %2199 = vmatpush.bf16.msra.mxu1 %v4967_v45 }
 0x40b   : > { %v1797_v56 = vsel %vm825_vm8, %v1792_v22, %v1794_v29  ;;  %v1799_v57 = vsel %vm830_vm9, %v1792_v22, %v1794_v29  ;;  %v1802_v46 = vsel %vm834_vm10, %v1792_v22, %v1794_v29  ;;  %v1805_v38 = vsel %vm838_vm11, %v1792_v22, %v1794_v29  ;;  %2376 = vmatpush.bf16.msra.mxu2 %v4968_v14  ;;  %v1867_v29 = vld [vmem:[%s3567_s9] sm:$0x4]  ;;  %v1870_v14 = vld [vmem:[%s3567_s9 + $0x4] sm:$0x4] }
 0x40c   : > { %v1801_v43 = vrot.slane %v1799_v57, 1  ;;  %v1804_v5 = vrot.slane %v1802_v46, 2  ;;  %v1807_v30 = vrot.slane %v1805_v38, 3  ;;  %v1809_v3 = vunpack.i.h.s16 %v1797_v56  ;;  %2389 = vmatpush.bf16.msra.mxu3 %v4969_v21 }
 0x40d   : > { %v2995_v19 = vpack.i.b16 %v1797_v56, %v1797_v56 }
 0x40e   : > { %v1811_v11 = vunpack.i.h.s16 %v1801_v43  ;;  %v1813_v24 = vunpack.i.h.s16 %v1804_v5  ;;  %v1815_v42 = vunpack.i.h.s16 %v1807_v30  ;;  %v1817_v45 = vpack.i.b16 %v1809_v3, %v1809_v3  ;;  %2200 = vmatpush.bf16.msra.mxu1 %v4957_v15  ;;  %v1879_v15 = vld [vmem:[%s3567_s9 + $0x10] sm:$0x4] }
 0x40f   : > { %v2996_v57 = vpack.i.b16 %v1801_v43, %v1801_v43  ;;  %v2997_v46 = vpack.i.b16 %v1804_v5, %v1804_v5  ;;  %v2998_v38 = vpack.i.b16 %v1807_v30, %v1807_v30  ;;  %v1827_v56 = vperm.slane %v2995_v19, %v4019_v34  ;;  %2377 = vmatpush.bf16.msra.mxu2 %v3591_v12  ;;  %v1876_v19 = vld [vmem:[%s3567_s9 + $0xc] sm:$0x4] }
 0x410   : > { %v1819_v3 = vpack.i.b16 %v1811_v11, %v1811_v11  ;;  %v1821_v21 = vpack.i.b16 %v1813_v24, %v1813_v24  ;;  %v1823_v7 = vpack.i.b16 %v1815_v42, %v1815_v42  ;;  %v1831_v62 = vperm.slane %v1817_v45, %v4019_v34  ;;  %2390 = vmatpush.bf16.msra.mxu3 %v4958_v47  ;;  %v1882_v11 = vld [vmem:[%s3567_s9 + $0x14] sm:$0x4] }
 0x411   : > { %v1835_v43 = vperm.slane %v2996_v57, %v4019_v34  ;;  %v1843_v5 = vperm.slane %v2997_v46, %v4019_v34  ;;  %v1851_v30 = vperm.slane %v2998_v38, %v4019_v34  ;;  %v1868_v12 = vsel %vm4476_vm1, %v1827_v56, %v1867_v29  ;;  %v1885_v57 = vld [vmem:[%s3567_s9 + $0x18] sm:$0x4]  ;;  %v1888_v38 = vld [vmem:[%s3567_s9 + $0x1c] sm:$0x4] }
 0x412   : > { %v1839_v45 = vperm.slane %v1819_v3, %v4019_v34  ;;  %v1847_v24 = vperm.slane %v1821_v21, %v4019_v34  ;;  %v1855_v47 = vperm.slane %v1823_v7, %v4019_v34  ;;  %1869 = vst [vmem:[%s3567_s9] sm:$0x4] %v1868_v12  ;;  %v1871_v42 = vsel %vm4476_vm1, %v1831_v62, %v1870_v14 }
 0x413   : > { %1872 = vst [vmem:[%s3567_s9 + $0x4] sm:$0x4] %v1871_v42  ;;  %v1874_v29 = vsel %vm4476_vm1, %v1835_v43, %v1873_v49  ;;  %v1880_v46 = vsel %vm4476_vm1, %v1843_v5, %v1879_v15  ;;  %2201 = vmatpush.bf16.msra.mxu1 %v3826_v17  ;;  %2378 = vmatpush.bf16.msra.mxu2 %v3617_v23  ;;  %v1902_v23 = vpop.f32.mrf.mxu2  ;;  %v3007_v43 = vld [vmem:[%s3551_s3 + $0x18] sm:$0xf] }
 0x414   : > { %1875 = vst [vmem:[%s3567_s9 + $0x8] sm:$0x4] %v1874_v29  ;;  %v1877_v62 = vsel %vm4476_vm1, %v1839_v45, %v1876_v19  ;;  %v1883_v7 = vsel %vm4476_vm1, %v1847_v24, %v1882_v11  ;;  %2391 = vmatpush.bf16.msra.mxu3 %v3635_v31  ;;  %v1886_v49 = vsel %vm4476_vm1, %v1851_v30, %v1885_v57  ;;  %v1915_v31 = vpop.f32.mrf.mxu3 }
 0x415   : > { %1878 = vst [vmem:[%s3567_s9 + $0xc] sm:$0x4] %v1877_v62  ;;  %v1889_v15 = vsel %vm4476_vm1, %v1855_v47, %v1888_v38  ;;  %2142 = vmatmul.bf16.vlgmr.msrb.gmra.mxu0 %v3007_v43  ;;  %v4973_v62 = vld [vmem:[#allocation35_spill] sm:$0xff] }
 0x416   : > { %1881 = vst [vmem:[%s3567_s9 + $0x10] sm:$0x4] %v1880_v46  ;;  %2402 = vmatpush.bf16.msrb.mxu0 %v3682_v51 }
 0x417   : > { %1884 = vst [vmem:[%s3567_s9 + $0x14] sm:$0x4] %v1883_v7  ;;  %2202 = vmatpush.bf16.msra.mxu1 %v3842_v39  ;;  %2379 = vmatpush.bf16.msra.mxu2 %v3638_v32 }
 0x418   : > { %1887 = vst [vmem:[%s3567_s9 + $0x18] sm:$0x4] %v1886_v49  ;;  %2392 = vmatpush.bf16.msra.mxu3 %v3656_v40 }
 0x419   : > { %1890 = vst [vmem:[%s3567_s9 + $0x1c] sm:$0x4] %v1889_v15  ;;  %2155 = vmatmul.bf16.vlgmr.msrb.gmra.mxu1 %v3007_v43  ;;  %2168 = vmatmul.bf16.vlgmr.msrb.gmra.mxu2 %v3007_v43 }
 0x41a   : > { %2403 = vmatpush.bf16.msrb.mxu0 %v3712_v61 }
 0x41b   : > { %2203 = vmatpush.bf16.msra.mxu1 %v3853_v60  ;;  %2380 = vmatpush.bf16.msra.mxu2 %v3659_v41  ;;  %v1904_v32 = vpop.f32.mrf.mxu2  ;;  %v1928_v41 = vpop.f32.mrf.mxu0 }
 0x41c   : > { %2393 = vmatpush.bf16.msra.mxu3 %v3685_v52  ;;  %v1917_v40 = vpop.f32.mrf.mxu3 }
 0x41d   : > { %v4976_v40 = vld [vmem:[#allocation36_spill] sm:$0xff] }
 0x41e   : > { %2404 = vmatpush.bf16.msrb.mxu0 %v3739_v10  ;;  %v4972_v10 = vld [vmem:[#allocation28_spill] sm:$0xff] }
 0x41f   : > { %2204 = vmatpush.bf16.msra.mxu1 %v3863_v18  ;;  %2381 = vmatpush.bf16.msra.mxu2 %v3691_v54  ;;  %v1903_v54 = vadd.f32 %v1902_v23, %v3962_v27  ;;  %v4975_v23 = vld [vmem:[#allocation21_spill] sm:$0xff] }
 0x420   : > { %2394 = vmatpush.bf16.msra.mxu3 %v3721_v2 }
 0x422   : > { %2405 = vmatpush.bf16.msrb.mxu0 %v4929_v4 }
 0x423   : > { %2205 = vmatpush.bf16.msra.mxu1 %v4909_v63  ;;  %2382 = vmatpush.bf16.msra.mxu2 %v4910_v1  ;;  %v1930_v56 = vpop.f32.mrf.mxu0 }
 0x424   : > { %2395 = vmatpush.bf16.msra.mxu3 %v4911_v9  ;;  %v1916_v9 = vadd.f32 %v1915_v31, %v3971_v13 }
 0x426   : > { %2406 = vmatpush.bf16.msrb.mxu0 %v4972_v10  ;;  %v4984_v10 = vld [vmem:[#allocation29_spill] sm:$0xff] }
 0x427   : > { %2206 = vmatpush.bf16.msra.mxu1 %v4912_v25  ;;  %2383 = vmatpush.bf16.msra.mxu2 %v4913_v53 }
 0x428   : > { %2396 = vmatpush.bf16.msra.mxu3 %v4914_v6 }
 0x42b   : > { %2415 = vmatpush.bf16.msrb.mxu1 %v3585_v8  ;;  %2428 = vmatpush.bf16.msrb.mxu2 %v3770_v33 }
 0x42f   : > { %2416 = vmatpush.bf16.msrb.mxu1 %v4915_v16  ;;  %2429 = vmatpush.bf16.msrb.mxu2 %v3794_v48 }
 0x433   : > { %2417 = vmatpush.bf16.msrb.mxu1 %v3626_v26  ;;  %2430 = vmatpush.bf16.msrb.mxu2 %v3812_v0 }
 0x437   : > { %2418 = vmatpush.bf16.msrb.mxu1 %v3647_v35  ;;  %2431 = vmatpush.bf16.msrb.mxu2 %v4916_v44  ;;  %v1929_v44 = vadd.f32 %v1928_v41, %v3998_v59 }
 0x43b   : > { %2419 = vmatpush.bf16.msrb.mxu1 %v4930_v28  ;;  %2432 = vmatpush.bf16.msrb.mxu2 %v4942_v20  ;;  %v4974_v20 = vld [vmem:[#allocation30_spill] sm:$0xff] }
 0x43c   : > { %2407 = vmatpush.bf16.msrb.mxu0 %v4974_v20 }
 0x43f   : > { %2420 = vmatpush.bf16.msrb.mxu1 %v3704_v58  ;;  %2433 = vmatpush.bf16.msrb.mxu2 %v4973_v62  ;;  %v4977_v58 = vld [vmem:[#allocation32_spill] sm:$0xff] }
 0x440   : > { %2408 = vmatpush.bf16.msrb.mxu0 %v4977_v58  ;;  %v2114_v58 = vld [vmem:[%s3567_s9 + $0x8] sm:$0x4] }
 0x443   : > { %2421 = vmatpush.bf16.msrb.mxu1 %v4975_v23  ;;  %2434 = vmatpush.bf16.msrb.mxu2 %v4976_v40 }
 0x447   : > { %2422 = vmatpush.bf16.msrb.mxu1 %v4962_v55 }
 0x486   : > { %v1941_v52 = vpop.f32.mrf.mxu1 }
 0x487   : > { %v1942_v2 = vadd.f32 %v1941_v52, %v3964_v36  ;;  %v4978_v52 = vld [vmem:[#allocation38_spill] sm:$0xff] }
 0x488   : > { %2435 = vmatpush.bf16.msrb.mxu2 %v4978_v52 }
 0x489   : > { %v1971_v1 = vadd.f32 %v1942_v2, %v1903_v54  ;;  %v4979_v54 = vld [vmem:[#allocation34_spill] sm:$0xff] }
 0x48a   : > { %2409 = vmatpush.bf16.msrb.mxu0 %v4979_v54  ;;  %v2117_v54 = vld [vmem:[%s3567_s9 + $0xc] sm:$0x4] }
 0x48b   : > { %v3000_v22 = vmul.f32 -1.442695, %v1971_v1 }
 0x48c   : > { %v1954_v14 = vpop.f32.mrf.mxu2 }
 0x48d   : > { %3206 = vpow2.f32 %v3000_v22  ;;  %v1955_v53 = vadd.f32 %v1954_v14, %v3975_v37  ;;  %v1967_v6 = vpop.f32.mrf.mxu3  ;;  %v4980_v22 = vld [vmem:[#allocation39_spill] sm:$0xff] }
 0x48e   : > { %v1943_v3 = vpop.f32.mrf.mxu1  ;;  %v1968_v4 = vadd.f32 %v1967_v6, %v3991_v50  ;;  %v2030_v6 = vpop.permute.xlu2 %2029 }
 0x48f   : > { %v1991_v21 = vadd.f32 %v1955_v53, %v1916_v9  ;;  %v2023_v53 = vpop.permute.xlu1 %2022 }
 0x491   : > { %v3001_v5 = vmul.f32 -1.442695, %v1991_v21  ;;  %v2032_v21 = vmul.f32 %v2030_v6, %v4980_v22 }
 0x493   : > { %v3207_v30 = vpop.eup %3206  ;;  %3208 = vpow2.f32 %v3001_v5 }
 0x494   : > { %v1975_v12 = vadd.f32 1.0, %v3207_v30  ;;  %v1956_v19 = vpop.f32.mrf.mxu2  ;;  %v4981_v30 = vld [vmem:[#allocation27_spill] sm:$0xff] }
 0x495   : > { %v1969_v11 = vpop.f32.mrf.mxu3 }
 0x496   : > { %3210 = vrcp.f32 %v1975_v12  ;;  %v1987_v48 = vand.u32 2147483648, %v1975_v12  ;;  %v1985_v16 = vand.u32 2147483647, %v1975_v12  ;;  %vm1981_vm3 = vweird.f32 %v1975_v12 }
 0x498   : > { %v1988_v35 = vor.u32 1.1754944e-38, %v1987_v48  ;;  %vm1986_vm5 = vcmp.eq.f32.partialorder %v1985_v16, 8.507059e+37 }
 0x499   : > { %v3209_v45 = vpop.eup %3208 }
 0x49a   : > { %v1995_v24 = vadd.f32 1.0, %v3209_v45 }
 0x49c   : > { %v3211_v8 = vpop.eup %3210  ;;  %3212 = vrcp.f32 %v1995_v24  ;;  %v2007_v46 = vand.u32 2147483648, %v1995_v24  ;;  %v2005_v7 = vand.u32 2147483647, %v1995_v24  ;;  %vm2001_vm7 = vweird.f32 %v1995_v24 }
 0x49d   : > { %v1977_v51 = vmul.f32 %v3211_v8, %v1975_v12  ;;  %vm1982_vm2 = vweird.f32 %v3211_v8 }
 0x49e   : > { %vm1983_vm4 = vmor %vm1981_vm3, %vm1982_vm2  ;;  %v2008_v32 = vor.u32 1.1754944e-38, %v2007_v46  ;;  %vm2006_vm13 = vcmp.eq.f32.partialorder %v2005_v7, 8.507059e+37 }
 0x49f   : > { %v1978_v33 = vsub.f32 1.0, %v1977_v51 }
 0x4a1   : > { %v1979_v61 = vmul.f32 %v3211_v8, %v1978_v33 }
 0x4a2   : > { %v3213_v47 = vpop.eup %3212 }
 0x4a3   : > { %v1997_v26 = vmul.f32 %v3213_v47, %v1995_v24  ;;  %v1980_v0 = vadd.f32 %v3211_v8, %v1979_v61  ;;  %vm2002_vm6 = vweird.f32 %v3213_v47 }
 0x4a4   : > { %vm2003_vm12 = vmor %vm2001_vm7, %vm2002_vm6 }
 0x4a5   : > { %v1998_v42 = vsub.f32 1.0, %v1997_v26  ;;  %v1984_v57 = vsel %vm1983_vm4, %v3211_v8, %v1980_v0 }
 0x4a6   : > { %v1989_v29 = vsel %vm1986_vm5, %v1988_v35, %v1984_v57 }
 0x4a7   : > { %v1999_v28 = vmul.f32 %v3213_v47, %v1998_v42  ;;  %v2011_v38 = vmul.f32 %v1989_v29, %v1968_v4 }
 0x4a9   : > { %v2000_v49 = vadd.f32 %v3213_v47, %v1999_v28  ;;  %v2012_v15 = vadd.f32 %v2011_v38, %v1929_v44  ;;  %v2108_v38 = vld [vmem:[%s3567_s9] sm:$0x4] }
 0x4ab   : > { %v2004_v31 = vsel %vm2003_vm12, %v3213_v47, %v2000_v49  ;;  %3214 = vtanh.f32 %v2012_v15  ;;  %v2111_v15 = vld [vmem:[%s3567_s9 + $0x4] sm:$0x4]  ;;  %vm2348_vm12 = vsmask.f32 3328 }
 0x4ac   : > { %v2009_v41 = vsel %vm2006_vm13, %v2008_v32, %v2004_v31  ;;  %vm4654_vm13 = vmand %vm838_vm11, %vm2348_vm12 }
 0x4ad   : > { %v2014_v2 = vsub.f32 1.0, %v2009_v41  ;;  %v2016_v56 = vmul.f32 %v2009_v41, %v4980_v22  ;;  %v2120_v41 = vld [vmem:[%s3567_s9 + $0x10] sm:$0x4] }
 0x4b1   : > { %v3215_v1 = vpop.eup %3214 }
 0x4b2   : > { %v2015_v9 = vmul.f32 %v3215_v1, %v2014_v2  ;;  %v2123_v1 = vld [vmem:[%s3567_s9 + $0x14] sm:$0x4] }
 0x4b4   : > { %v2017_v14 = vadd.f32 %v2016_v56, %v2015_v9  ;;  %v2126_v56 = vld [vmem:[%s3567_s9 + $0x18] sm:$0x4] }
 0x4b6   : > { %v2025_v3 = vmul.f32 %v2023_v53, %v2017_v14  ;;  %v2129_v53 = vld [vmem:[%s3567_s9 + $0x1c] sm:$0x4] }
 0x4b8   : > { %v4574_v43 = vadd.f32 %v2032_v21, %v2025_v3  ;;  %v2156_v3 = vpop.f32.mrf.mxu1 }
 0x4ba   : > { %v2034_v55 = vpack.c.bf16 %v4574_v43, %v4574_v43 }
 0x4bc   : > { %v2036_v5 = vrot.slane %v2034_v55, 3  ;;  %2181 = vmatmul.bf16.vlgmr.msrb.gmra.mxu3 %v2034_v55  ;;  %2194 = vmatmul.bf16.vlgmr.msra.gmra.mxu0 %v2034_v55 }
 0x4bd   : > { %2207 = vmatmul.bf16.vlgmr.msra.gmra.mxu1 %v2034_v55  ;;  %2441 = vmatpush.bf16.msrb.mxu3 %v4981_v30  ;;  %v2157_v30 = vadd.f32 %v2156_v3, %v3971_v13 }
 0x4be   : > { %v2039_v12 = vsel %vm825_vm8, %v2034_v55, %v2036_v5  ;;  %v2041_v19 = vsel %vm830_vm9, %v2034_v55, %v2036_v5  ;;  %v2044_v11 = vsel %vm834_vm10, %v2034_v55, %v2036_v5  ;;  %v2047_v45 = vsel %vm838_vm11, %v2034_v55, %v2036_v5  ;;  %v2169_v5 = vpop.f32.mrf.mxu2 }
 0x4bf   : > { %v2043_v24 = vrot.slane %v2041_v19, 1  ;;  %v2046_v8 = vrot.slane %v2044_v11, 2  ;;  %v2049_v51 = vrot.slane %v2047_v45, 3  ;;  %v2051_v33 = vunpack.i.h.s16 %v2039_v12 }
 0x4c0   : > { %v3003_v48 = vpack.i.b16 %v2039_v12, %v2039_v12  ;;  %v2158_v55 = vpop.f32.mrf.mxu1 }
 0x4c1   : > { %v2053_v61 = vunpack.i.h.s16 %v2043_v24  ;;  %v2055_v16 = vunpack.i.h.s16 %v2046_v8  ;;  %v2057_v47 = vunpack.i.h.s16 %v2049_v51  ;;  %v2059_v26 = vpack.i.b16 %v2051_v33, %v2051_v33  ;;  %2442 = vmatpush.bf16.msrb.mxu3 %v4984_v10 }
 0x4c2   : > { %v3004_v35 = vpack.i.b16 %v2043_v24, %v2043_v24  ;;  %v3005_v44 = vpack.i.b16 %v2046_v8, %v2046_v8  ;;  %v3006_v42 = vpack.i.b16 %v2049_v51, %v2049_v51  ;;  %v2069_v4 = vperm.slane %v3003_v48, %v4019_v34  ;;  %v3015_v48 = vld [vmem:[%s3551_s3 + $0x1c] sm:$0xf] }
 0x4c3   : > { %v2061_v57 = vpack.i.b16 %v2053_v61, %v2053_v61  ;;  %v2063_v29 = vpack.i.b16 %v2055_v16, %v2055_v16  ;;  %v2065_v28 = vpack.i.b16 %v2057_v47, %v2057_v47  ;;  %v2073_v46 = vperm.slane %v2059_v26, %v4019_v34  ;;  %2384 = vmatmul.bf16.vlgmr.msra.gmra.mxu2 %v3015_v48 }
 0x4c4   : > { %v2077_v62 = vperm.slane %v3004_v35, %v4019_v34  ;;  %v2085_v20 = vperm.slane %v3005_v44, %v4019_v34  ;;  %v2093_v7 = vperm.slane %v3006_v42, %v4019_v34  ;;  %v2109_v49 = vsel %vm4585_vm15, %v2069_v4, %v2108_v38 }
 0x4c5   : > { %v2081_v23 = vperm.slane %v2061_v57, %v4019_v34  ;;  %v2089_v31 = vperm.slane %v2063_v29, %v4019_v34  ;;  %v2097_v32 = vperm.slane %v2065_v28, %v4019_v34  ;;  %2110 = vst [vmem:[%s3567_s9] sm:$0x4] %v2109_v49  ;;  %v2112_v40 = vsel %vm4585_vm15, %v2073_v46, %v2111_v15 }
 0x4c6   : > { %2113 = vst [vmem:[%s3567_s9 + $0x4] sm:$0x4] %v2112_v40  ;;  %v2115_v52 = vsel %vm4585_vm15, %v2077_v62, %v2114_v58  ;;  %v2121_v2 = vsel %vm4585_vm15, %v2085_v20, %v2120_v41  ;;  %2443 = vmatpush.bf16.msrb.mxu3 %v3826_v17  ;;  %v2127_v14 = vsel %vm4585_vm15, %v2093_v7, %v2126_v56  ;;  %v2143_v17 = vpop.f32.mrf.mxu0 }
 0x4c7   : > { %2116 = vst [vmem:[%s3567_s9 + $0x8] sm:$0x4] %v2115_v52  ;;  %v2118_v9 = vsel %vm4585_vm15, %v2081_v23, %v2117_v54  ;;  %v2124_v22 = vsel %vm4585_vm15, %v2089_v31, %v2123_v1  ;;  %v2130_v6 = vsel %vm4585_vm15, %v2097_v32, %v2129_v53  ;;  %v2170_v49 = vadd.f32 %v2169_v5, %v3998_v59  ;;  %v2264_v53 = vpop.permute.xlu0 %2263 }
 0x4c8   : > { %2119 = vst [vmem:[%s3567_s9 + $0xc] sm:$0x4] %v2118_v9 }
 0x4c9   : > { %2122 = vst [vmem:[%s3567_s9 + $0x10] sm:$0x4] %v2121_v2 }
 0x4ca   : > { %2125 = vst [vmem:[%s3567_s9 + $0x14] sm:$0x4] %v2124_v22  ;;  %2444 = vmatpush.bf16.msrb.mxu3 %v3842_v39 }
 0x4cb   : > { %2128 = vst [vmem:[%s3567_s9 + $0x18] sm:$0x4] %v2127_v14 }
 0x4cc   : > { %2131 = vst [vmem:[%s3567_s9 + $0x1c] sm:$0x4] %v2130_v6  ;;  %2397 = vmatmul.bf16.vlgmr.msra.gmra.mxu3 %v3015_v48  ;;  %2410 = vmatmul.bf16.vlgmr.msrb.gmra.mxu0 %v3015_v48  ;;  %v2271_v6 = vpop.permute.xlu1 %2270 }
 0x4cd   : > { %v2273_v3 = vmul.f32 %v2271_v6, %v4574_v43 }
 0x4ce   : > { %2445 = vmatpush.bf16.msrb.mxu3 %v3853_v60  ;;  %v2145_v21 = vpop.f32.mrf.mxu0  ;;  %v2171_v60 = vpop.f32.mrf.mxu2 }
 0x4d2   : > { %2446 = vmatpush.bf16.msrb.mxu3 %v3863_v18 }
 0x4d6   : > { %2447 = vmatpush.bf16.msrb.mxu3 %v4909_v63  ;;  %v2144_v63 = vadd.f32 %v2143_v17, %v3962_v27 }
 0x4da   : > { %2448 = vmatpush.bf16.msrb.mxu3 %v4912_v25 }
 0x539   : > { %v2195_v12 = vpop.f32.mrf.mxu0 }
 0x53a   : > { %v2196_v39 = vadd.f32 %v2195_v12, %v3975_v37  ;;  %v2208_v19 = vpop.f32.mrf.mxu1 }
 0x53b   : > { %v2209_v7 = vadd.f32 %v2208_v19, %v3991_v50 }
 0x53c   : > { %v2232_v11 = vadd.f32 %v2196_v39, %v2157_v30 }
 0x53e   : > { %v3009_v45 = vmul.f32 -1.442695, %v2232_v11 }
 0x53f   : > { %v2182_v18 = vpop.f32.mrf.mxu3 }
 0x540   : > { %3216 = vpow2.f32 %v3009_v45  ;;  %v2183_v25 = vadd.f32 %v2182_v18, %v3964_v36 }
 0x541   : > { %v2197_v24 = vpop.f32.mrf.mxu0 }
 0x542   : > { %v2212_v8 = vadd.f32 %v2183_v25, %v2144_v63  ;;  %v2210_v51 = vpop.f32.mrf.mxu1 }
 0x544   : > { %v3008_v33 = vmul.f32 -1.442695, %v2212_v8 }
 0x546   : > { %v3217_v61 = vpop.eup %3216  ;;  %3218 = vpow2.f32 %v3008_v33  ;;  %v2350_v33 = vld [vmem:[%s3567_s9] sm:$0x8] }
 0x547   : > { %v2236_v16 = vadd.f32 1.0, %v3217_v61  ;;  %v2184_v47 = vpop.f32.mrf.mxu3 }
 0x549   : > { %3220 = vrcp.f32 %v2236_v16  ;;  %v2248_v32 = vand.u32 2147483648, %v2236_v16  ;;  %vm2242_vm5 = vweird.f32 %v2236_v16  ;;  %v2246_v58 = vand.u32 2147483647, %v2236_v16 }
 0x54b   : > { %v2249_v54 = vor.u32 1.1754944e-38, %v2248_v32  ;;  %vm2247_vm7 = vcmp.eq.f32.partialorder %v2246_v58, 8.507059e+37 }
 0x54c   : > { %v3219_v26 = vpop.eup %3218 }
 0x54d   : > { %v2216_v0 = vadd.f32 1.0, %v3219_v26  ;;  %v2353_v26 = vld [vmem:[%s3567_s9 + $0x4] sm:$0x8] }
 0x54f   : > { %3222 = vrcp.f32 %v2216_v0  ;;  %v3221_v10 = vpop.eup %3220  ;;  %v2228_v29 = vand.u32 2147483648, %v2216_v0  ;;  %v2226_v46 = vand.u32 2147483647, %v2216_v0  ;;  %vm2222_vm1 = vweird.f32 %v2216_v0 }
 0x550   : > { %v2238_v35 = vmul.f32 %v3221_v10, %v2236_v16  ;;  %vm2243_vm4 = vweird.f32 %v3221_v10 }
 0x551   : > { %v2229_v20 = vor.u32 1.1754944e-38, %v2228_v29  ;;  %vm2227_vm3 = vcmp.eq.f32.partialorder %v2226_v46, 8.507059e+37  ;;  %vm2244_vm6 = vmor %vm2242_vm5, %vm2243_vm4 }
 0x552   : > { %v2239_v4 = vsub.f32 1.0, %v2238_v35 }
 0x554   : > { %v2240_v38 = vmul.f32 %v3221_v10, %v2239_v4  ;;  %v2362_v4 = vld [vmem:[%s3567_s9 + $0x10] sm:$0x8] }
 0x555   : > { %v3223_v44 = vpop.eup %3222 }
 0x556   : > { %v2218_v42 = vmul.f32 %v3223_v44, %v2216_v0  ;;  %vm2223_vm0 = vweird.f32 %v3223_v44  ;;  %v2241_v31 = vadd.f32 %v3221_v10, %v2240_v38  ;;  %v2359_v38 = vld [vmem:[%s3567_s9 + $0xc] sm:$0x8] }
 0x557   : > { %vm2224_vm2 = vmor %vm2222_vm1, %vm2223_vm0 }
 0x558   : > { %v2219_v57 = vsub.f32 1.0, %v2218_v42  ;;  %v2245_v52 = vsel %vm2244_vm6, %v3221_v10, %v2241_v31  ;;  %v2356_v42 = vld [vmem:[%s3567_s9 + $0x8] sm:$0x8]  ;;  %vm2589_vm6 = vsmask.f32 7950 }
 0x559   : > { %v2250_v2 = vsel %vm2247_vm7, %v2249_v54, %v2245_v52  ;;  %vm4711_vm7 = vmand %vm838_vm11, %vm2589_vm6 }
 0x55a   : > { %v2220_v28 = vmul.f32 %v3223_v44, %v2219_v57  ;;  %v2255_v1 = vsub.f32 1.0, %v2250_v2  ;;  %v2257_v56 = vmul.f32 %v2250_v2, %v4574_v43  ;;  %v2385_v2 = vpop.f32.mrf.mxu2 }
 0x55c   : > { %v2221_v62 = vadd.f32 %v3223_v44, %v2220_v28 }
 0x55e   : > { %v2225_v15 = vsel %vm2224_vm2, %v3223_v44, %v2221_v62  ;;  %v2365_v62 = vld [vmem:[%s3567_s9 + $0x14] sm:$0x8] }
 0x55f   : > { %v2230_v23 = vsel %vm2227_vm3, %v2229_v20, %v2225_v15 }
 0x560   : > { %v2252_v40 = vmul.f32 %v2230_v23, %v2209_v7  ;;  %v2368_v23 = vld [vmem:[%s3567_s9 + $0x18] sm:$0x8] }
 0x562   : > { %v2253_v41 = vadd.f32 %v2252_v40, %v2170_v49  ;;  %v2371_v40 = vld [vmem:[%s3567_s9 + $0x1c] sm:$0x8] }
 0x564   : > { %3224 = vtanh.f32 %v2253_v41 }
 0x56a   : > { %v3225_v9 = vpop.eup %3224 }
 0x56b   : > { %v2256_v22 = vmul.f32 %v3225_v9, %v2255_v1  ;;  %v2398_v1 = vpop.f32.mrf.mxu3  ;;  %v2387_v9 = vpop.f32.mrf.mxu2 }
 0x56d   : > { %v2258_v14 = vadd.f32 %v2257_v56, %v2256_v22  ;;  %v2411_v56 = vpop.f32.mrf.mxu0 }
 0x56f   : > { %v2266_v17 = vmul.f32 %v2264_v53, %v2258_v14  ;;  %v2386_v53 = vadd.f32 %v2385_v2, %v3962_v27 }
 0x571   : > { %v4645_v21 = vadd.f32 %v2273_v3, %v2266_v17  ;;  %v2399_v3 = vadd.f32 %v2398_v1, %v3971_v13 }
 0x573   : > { %v2275_v55 = vpack.c.bf16 %v4645_v21, %v4645_v21  ;;  %v2400_v22 = vpop.f32.mrf.mxu3 }
 0x575   : > { %v2277_v5 = vrot.slane %v2275_v55, 3  ;;  %2423 = vmatmul.bf16.vlgmr.msrb.gmra.mxu1 %v2275_v55  ;;  %2436 = vmatmul.bf16.vlgmr.msrb.gmra.mxu2 %v2275_v55 }
 0x576   : > { %2449 = vmatmul.bf16.vlgmr.msrb.gmra.mxu3 %v2275_v55 }
 0x577   : > { %v2280_v30 = vsel %vm825_vm8, %v2275_v55, %v2277_v5  ;;  %v2282_v12 = vsel %vm830_vm9, %v2275_v55, %v2277_v5  ;;  %v2285_v39 = vsel %vm834_vm10, %v2275_v55, %v2277_v5  ;;  %v2288_v19 = vsel %vm838_vm11, %v2275_v55, %v2277_v5  ;;  %v2413_v5 = vpop.f32.mrf.mxu0 }
 0x578   : > { %v2284_v43 = vrot.slane %v2282_v12, 1  ;;  %v2287_v11 = vrot.slane %v2285_v39, 2  ;;  %v2290_v60 = vrot.slane %v2288_v19, 3  ;;  %v2292_v45 = vunpack.i.h.s16 %v2280_v30 }
 0x579   : > { %v3011_v18 = vpack.i.b16 %v2280_v30, %v2280_v30 }
 0x57a   : > { %v2294_v63 = vunpack.i.h.s16 %v2284_v43  ;;  %v2296_v25 = vunpack.i.h.s16 %v2287_v11  ;;  %v2298_v24 = vunpack.i.h.s16 %v2290_v60  ;;  %v2300_v8 = vpack.i.b16 %v2292_v45, %v2292_v45 }
 0x57b   : > { %v3012_v48 = vpack.i.b16 %v2284_v43, %v2284_v43  ;;  %v3013_v61 = vpack.i.b16 %v2287_v11, %v2287_v11  ;;  %v3014_v16 = vpack.i.b16 %v2290_v60, %v2290_v60  ;;  %v2310_v47 = vperm.slane %v3011_v18, %v4019_v34 }
 0x57c   : > { %v2302_v0 = vpack.i.b16 %v2294_v63, %v2294_v63  ;;  %v2304_v10 = vpack.i.b16 %v2296_v25, %v2296_v25  ;;  %v2306_v35 = vpack.i.b16 %v2298_v24, %v2298_v24  ;;  %v2314_v44 = vperm.slane %v2300_v8, %v4019_v34 }
 0x57d   : > { %v2318_v57 = vperm.slane %v3012_v48, %v4019_v34  ;;  %v2326_v29 = vperm.slane %v3013_v61, %v4019_v34  ;;  %v2334_v28 = vperm.slane %v3014_v16, %v4019_v34  ;;  %v2351_v46 = vsel %vm4654_vm13, %v2310_v47, %v2350_v33 }
 0x57e   : > { %v2322_v20 = vperm.slane %v2302_v0, %v4019_v34  ;;  %v2330_v7 = vperm.slane %v2304_v10, %v4019_v34  ;;  %v2338_v49 = vperm.slane %v2306_v35, %v4019_v34  ;;  %2352 = vst [vmem:[%s3567_s9] sm:$0x8] %v2351_v46  ;;  %v2354_v15 = vsel %vm4654_vm13, %v2314_v44, %v2353_v26 }
 0x57f   : > { %2355 = vst [vmem:[%s3567_s9 + $0x4] sm:$0x8] %v2354_v15  ;;  %v2357_v31 = vsel %vm4654_vm13, %v2318_v57, %v2356_v42  ;;  %v2363_v32 = vsel %vm4654_vm13, %v2326_v29, %v2362_v4  ;;  %v2369_v52 = vsel %vm4654_vm13, %v2334_v28, %v2368_v23  ;;  %v2412_v47 = vadd.f32 %v2411_v56, %v3998_v59  ;;  %v2513_v15 = vpop.permute.xlu0 %2512  ;;  %v2506_v23 = vpop.permute.xlu2 %2505 }
 0x580   : > { %2358 = vst [vmem:[%s3567_s9 + $0x8] sm:$0x8] %v2357_v31  ;;  %v2360_v58 = vsel %vm4654_vm13, %v2322_v20, %v2359_v38  ;;  %v2366_v41 = vsel %vm4654_vm13, %v2330_v7, %v2365_v62  ;;  %v2372_v54 = vsel %vm4654_vm13, %v2338_v49, %v2371_v40 }
 0x581   : > { %2361 = vst [vmem:[%s3567_s9 + $0xc] sm:$0x8] %v2360_v58 }
 0x582   : > { %2364 = vst [vmem:[%s3567_s9 + $0x10] sm:$0x8] %v2363_v32  ;;  %v2515_v32 = vmul.f32 %v2513_v15, %v4645_v21 }
 0x583   : > { %2367 = vst [vmem:[%s3567_s9 + $0x14] sm:$0x8] %v2366_v41 }
 0x584   : > { %2370 = vst [vmem:[%s3567_s9 + $0x18] sm:$0x8] %v2369_v52 }
 0x585   : > { %2373 = vst [vmem:[%s3567_s9 + $0x1c] sm:$0x8] %v2372_v54 }
 0x5f2   : > { %v2424_v14 = vpop.f32.mrf.mxu1 }
 0x5f3   : > { %v2425_v6 = vadd.f32 %v2424_v14, %v3964_v36 }
 0x5f5   : > { %v2454_v17 = vadd.f32 %v2425_v6, %v2386_v53 }
 0x5f7   : > { %v3016_v55 = vmul.f32 -1.442695, %v2454_v17 }
 0x5f8   : > { %v2437_v30 = vpop.f32.mrf.mxu2 }
 0x5f9   : > { %3226 = vpow2.f32 %v3016_v55  ;;  %v2438_v12 = vadd.f32 %v2437_v30, %v3975_v37  ;;  %v2450_v39 = vpop.f32.mrf.mxu3 }
 0x5fa   : > { %v2426_v19 = vpop.f32.mrf.mxu1  ;;  %v2451_v0 = vadd.f32 %v2450_v39, %v3991_v50 }
 0x5fb   : > { %v2474_v43 = vadd.f32 %v2438_v12, %v2399_v3 }
 0x5fd   : > { %v3017_v11 = vmul.f32 -1.442695, %v2474_v43 }
 0x5ff   : > { %v3227_v60 = vpop.eup %3226  ;;  %3228 = vpow2.f32 %v3017_v11 }
 0x600   : > { %v2458_v45 = vadd.f32 1.0, %v3227_v60  ;;  %v2439_v18 = vpop.f32.mrf.mxu2 }
 0x601   : > { %v2452_v27 = vpop.f32.mrf.mxu3 }
 0x602   : > { %3230 = vrcp.f32 %v2458_v45  ;;  %v2470_v8 = vand.u32 2147483648, %v2458_v45  ;;  %v2468_v37 = vand.u32 2147483647, %v2458_v45  ;;  %vm2464_vm15 = vweird.f32 %v2458_v45 }
 0x604   : > { %v2471_v16 = vor.u32 1.1754944e-38, %v2470_v8  ;;  %vm2469_vm1 = vcmp.eq.f32.partialorder %v2468_v37, 8.507059e+37  ;;  %v2597_v37 = vld [vmem:[%s3567_s9 + $0x8] sm:$0x8] }
 0x605   : > { %v3229_v36 = vpop.eup %3228 }
 0x606   : > { %v2478_v63 = vadd.f32 1.0, %v3229_v36 }
 0x608   : > { %v3231_v25 = vpop.eup %3230  ;;  %3232 = vrcp.f32 %v2478_v63  ;;  %v2490_v42 = vand.u32 2147483648, %v2478_v63  ;;  %v2488_v57 = vand.u32 2147483647, %v2478_v63  ;;  %vm2484_vm3 = vweird.f32 %v2478_v63 }
 0x609   : > { %v2460_v13 = vmul.f32 %v3231_v25, %v2458_v45  ;;  %vm2465_vm14 = vweird.f32 %v3231_v25  ;;  %v2591_v45 = vld [vmem:[%s3567_s9] sm:$0x8] }
 0x60a   : > { %vm2466_vm0 = vmor %vm2464_vm15, %vm2465_vm14  ;;  %v2491_v38 = vor.u32 1.1754944e-38, %v2490_v42  ;;  %vm2489_vm5 = vcmp.eq.f32.partialorder %v2488_v57, 8.507059e+37 }
 0x60b   : > { %v2461_v24 = vsub.f32 1.0, %v2460_v13 }
 0x60d   : > { %v2462_v51 = vmul.f32 %v3231_v25, %v2461_v24 }
 0x60e   : > { %v3233_v33 = vpop.eup %3232 }
 0x60f   : > { %v2480_v48 = vmul.f32 %v3233_v33, %v2478_v63  ;;  %v2463_v61 = vadd.f32 %v3231_v25, %v2462_v51  ;;  %vm2485_vm2 = vweird.f32 %v3233_v33 }
 0x610   : > { %vm2486_vm4 = vmor %vm2484_vm3, %vm2485_vm2 }
 0x611   : > { %v2481_v26 = vsub.f32 1.0, %v2480_v48  ;;  %v2467_v10 = vsel %vm2466_vm0, %v3231_v25, %v2463_v61  ;;  %v2594_v25 = vld [vmem:[%s3567_s9 + $0x4] sm:$0x8]  ;;  %v2600_v61 = vld [vmem:[%s3567_s9 + $0xc] sm:$0x8] }
 0x612   : > { %v2472_v35 = vsel %vm2469_vm1, %v2471_v16, %v2467_v10 }
 0x613   : > { %v2482_v44 = vmul.f32 %v3233_v33, %v2481_v26  ;;  %v2494_v4 = vmul.f32 %v2472_v35, %v2451_v0  ;;  %v2609_v0 = vld [vmem:[%s3567_s9 + $0x18] sm:$0x8]  ;;  %v2612_v35 = vld [vmem:[%s3567_s9 + $0x1c] sm:$0x8] }
 0x615   : > { %v2483_v29 = vadd.f32 %v3233_v33, %v2482_v44  ;;  %v2495_v28 = vadd.f32 %v2494_v4, %v2412_v47 }
 0x617   : > { %v2487_v46 = vsel %vm2486_vm4, %v3233_v33, %v2483_v29  ;;  %3234 = vtanh.f32 %v2495_v28  ;;  %v2603_v33 = vld [vmem:[%s3567_s9 + $0x10] sm:$0x8] }
 0x618   : > { %v2492_v59 = vsel %vm2489_vm5, %v2491_v38, %v2487_v46 }
 0x619   : > { %v2497_v62 = vsub.f32 1.0, %v2492_v59  ;;  %v2499_v7 = vmul.f32 %v2492_v59, %v4645_v21 }
 0x61d   : > { %v3235_v20 = vpop.eup %3234 }
 0x61e   : > { %v2498_v50 = vmul.f32 %v3235_v20, %v2497_v62 }
 0x620   : > { %v2500_v49 = vadd.f32 %v2499_v7, %v2498_v50 }
 0x622   : > { %v2508_v31 = vmul.f32 %v2506_v23, %v2500_v49 }
 0x624   : > { %v2516_v40 = vadd.f32 %v2515_v32, %v2508_v31 }
 0x626   : > { %v2517_v58 = vpack.c.bf16 %v2516_v40, %v2516_v40  ;;  %2615 = vst [vmem:[#allocation2] sm:$0xff] %v2516_v40 }
 0x628   : > { %v2519_v41 = vrot.slane %v2517_v58, 3 }
 0x62a   : > { %v2522_v52 = vsel %vm825_vm8, %v2517_v58, %v2519_v41  ;;  %v2524_v54 = vsel %vm830_vm9, %v2517_v58, %v2519_v41  ;;  %v2527_v2 = vsel %vm834_vm10, %v2517_v58, %v2519_v41  ;;  %v2530_v1 = vsel %vm838_vm11, %v2517_v58, %v2519_v41 }
 0x62b   : > { %v2526_v9 = vrot.slane %v2524_v54, 1  ;;  %v2529_v22 = vrot.slane %v2527_v2, 2  ;;  %v2532_v56 = vrot.slane %v2530_v1, 3  ;;  %v2534_v14 = vunpack.i.h.s16 %v2522_v52 }
 0x62c   : > { %v3019_v53 = vpack.i.b16 %v2522_v52, %v2522_v52 }
 0x62d   : > { %v2536_v21 = vunpack.i.h.s16 %v2526_v9  ;;  %v2538_v6 = vunpack.i.h.s16 %v2529_v22  ;;  %v2540_v17 = vunpack.i.h.s16 %v2532_v56  ;;  %v2542_v3 = vpack.i.b16 %v2534_v14, %v2534_v14 }
 0x62e   : > { %v3020_v5 = vpack.i.b16 %v2526_v9, %v2526_v9  ;;  %v3021_v30 = vpack.i.b16 %v2529_v22, %v2529_v22  ;;  %v3022_v12 = vpack.i.b16 %v2532_v56, %v2532_v56  ;;  %v2552_v39 = vperm.slane %v3019_v53, %v4019_v34 }
 0x62f   : > { %v2544_v19 = vpack.i.b16 %v2536_v21, %v2536_v21  ;;  %v2546_v43 = vpack.i.b16 %v2538_v6, %v2538_v6  ;;  %v2548_v11 = vpack.i.b16 %v2540_v17, %v2540_v17  ;;  %v2556_v60 = vperm.slane %v2542_v3, %v4019_v34 }
 0x630   : > { %v2560_v18 = vperm.slane %v3020_v5, %v4019_v34  ;;  %v2568_v27 = vperm.slane %v3021_v30, %v4019_v34  ;;  %v2576_v36 = vperm.slane %v3022_v12, %v4019_v34  ;;  %v2592_v63 = vsel %vm4711_vm7, %v2552_v39, %v2591_v45 }
 0x631   : > { %v2564_v13 = vperm.slane %v2544_v19, %v4019_v34  ;;  %v2572_v24 = vperm.slane %v2546_v43, %v4019_v34  ;;  %v2580_v8 = vperm.slane %v2548_v11, %v4019_v34  ;;  %2593 = vst [vmem:[%s3567_s9] sm:$0x8] %v2592_v63  ;;  %v2595_v51 = vsel %vm4711_vm7, %v2556_v60, %v2594_v25  ;;  %v2606_v34 = vld [vmem:[%s3567_s9 + $0x14] sm:$0x8] }
 0x632   : > { %2596 = vst [vmem:[%s3567_s9 + $0x4] sm:$0x8] %v2595_v51  ;;  %v2598_v48 = vsel %vm4711_vm7, %v2560_v18, %v2597_v37  ;;  %v2604_v16 = vsel %vm4711_vm7, %v2568_v27, %v2603_v33  ;;  %v2610_v10 = vsel %vm4711_vm7, %v2576_v36, %v2609_v0 }
 0x633   : > { %2599 = vst [vmem:[%s3567_s9 + $0x8] sm:$0x8] %v2598_v48  ;;  %v2601_v47 = vsel %vm4711_vm7, %v2564_v13, %v2600_v61  ;;  %v2607_v26 = vsel %vm4711_vm7, %v2572_v24, %v2606_v34  ;;  %v2613_v44 = vsel %vm4711_vm7, %v2580_v8, %v2612_v35 }
 0x634   : > { %2602 = vst [vmem:[%s3567_s9 + $0xc] sm:$0x8] %v2601_v47  ;;  %2619 = sbr.rel (%p3023_p1) target bundleno = 1594 (0x63a), region = 60 }
 0x635   : > { %2605 = vst [vmem:[%s3567_s9 + $0x10] sm:$0x8] %v2604_v16 }
 0x636   : > { %2608 = vst [vmem:[%s3567_s9 + $0x14] sm:$0x8] %v2607_v26 }
 0x637   : > { %2611 = vst [vmem:[%s3567_s9 + $0x18] sm:$0x8] %v2610_v10 }
 0x638   : > { %2614 = vst [vmem:[%s3567_s9 + $0x1c] sm:$0x8] %v2613_v44 }
 0x639   : > { %2620 = vst [vmem:[#allocation9] sm:$0xff] %v2516_v40 }
 0x63a PF: > { %s3025_s3 = sshll.u32 %s3473_s28, 2  ;;  %s2633_s22 = sshll.u32 %s3567_s9, 4  ;;  %s2634_s22 = int_to_ptr.vmem [resolvable:$true] %s2633_s22 }
 0x63b   : > { %s2632_s11 = scalar_lea.hbm %s4804_s6, %s3025_s3  ;;  %s2622_s29 = scalar_lea.sflag [#allocation5], %s3547_s23 }
 0x63c   : > { %s2635_s14 = sshll.u32 %s2632_s11, 4  ;;  %s3316_s17 = scalar_lea.hbm %s4804_s6, 96  ;;  %s2636_s14 = int_to_ptr.hbm [resolvable:$true] %s2635_s14 }
 0x63d   : > { %s3310_s19 = sshra.s32 %s2636_s14, 4  ;;  %s3311_s19 = int_to_ptr.hbm [resolvable:$true] %s3310_s19 }
 0x63e   : > { %s3312_s12 = scalar_lea.hbm %s3311_s19, 32  ;;  %p3317_p11 = scmp.lt.s32.totalorder %s3311_s19, %s4804_s6 }
 0x63f   : > { %p3313_p8 = scmp.ne.s32.totalorder %s3311_s19, %s3312_s12  ;;  %p3318_p12 = scmp.lt.s32.totalorder %s3316_s17, %s3312_s12 }
 0x641   : > { %p3314_p9 = pnand %p3313_p8, %p3519_p7  ;;  %p3319_p13 = por %p3318_p12, %p3317_p11 }
 0x643   : > { %p3315_p10 = pneg %p3314_p9 }
 0x645   : > { %p3320_p0 = pnand %p3319_p13, %p3315_p10 }
 0x647   : > { %3323 = shalt.err (!%p3320_p0)
}
 0x648   : > { %s3408_s23 = smov 64   ;;  %s3409_s9 = smov 192  }
 0x649   : > { %s3410_s3 = smov 4   ;;  %s2650_s11 = sshll.u32 %s4805_s7, 4  ;;  %s2651_s11 = int_to_ptr.hbm [resolvable:$true] %s2650_s11 }
 0x64a   : > { %3085 = dma.vmem_to_hbm [thread:$0]  (%p3519_p7), %s2634_s22, 512, %s2636_s14, %s2622_s29, %s3408_s23, %s3409_s9, %s3410_s3  }
 0x64b   : > { %s3411_s13 = smov [#allocation9]   ;;  %p4989_p3 = scmp.eq.s32.totalorder %s3473_s28, 2 }
 0x64c   : > { %s2648_s16 = sshll.u32 %s3411_s13, 4  ;;  %s2649_s16 = int_to_ptr.vmem [resolvable:$true] %s2648_s16 }
 0x64d   : > { %3087 = dma.vmem_to_hbm [thread:$0]  (%p4989_p3), %s2649_s16, 128, %s2651_s11, [#allocation10]  }
 0x64e   : > { %p4990_p5 = pmov %p4989_p3 }
 0x64f   : > { %p4991_p2 = pmov %p4989_p3 }
 0x650   : > { %3377 = dma.done.wait (%p4990_p5), [#allocation10], 128  }
 0x651   : > { %3379 = vsyncadd (%p4991_p2), [#allocation10], 4294967168 }
 0x652 PF: > { %p3108_p7 = scmp.ge.s32.totalorder %s3398_s27, 2  ;;  %s2667_s0 = sand.u32 1, %s3386_s24  }
 0x653   : > { %s2668_s21 = scalar_lea.sflag [#allocation5], %s2667_s0 }
 0x654   : > { %p3100_p4 = pnand %p3108_p7, %p3487_p6 }
 0x656   : > { %p3101_p1 = pneg %p3100_p4 }
 0x658   : > { %3381 = dma.done.wait (%p3101_p1), %s2668_s21, 512  }
 0x659   : > { %3383 = vsyncadd (%p3101_p1), %s2668_s21, 4294966784  ;;  %p23_p8 = scmp.ge.s32.totalorder %s3505_s15, 5   ;;  %s4992_s24 = smov %s3390_s25 }
 0x65a   : > { %s4993_s25 = smov %s3394_s26  ;;  %s4994_s26 = smov %s3515_s20 }
 0x65b   : > { %s4995_s27 = smov %s3505_s15  ;;  %25 = sbr.rel (!%p23_p8) target bundleno = 10 (0xa), region = 126 }
 0x660   :  { %2674 = vsyncpa [#allocation4], 1 }
 0x661   :  { %2676 = vsyncpa [#allocation4 + $0x1], 1 }
 0x662   :  { %2677 = vsyncpa [#allocation7], 1 }
 0x663   :  { %2678 = vsyncpa [#allocation5], 1 }
 0x664   :  { %2680 = vsyncpa [#allocation5 + $0x1], 1 }
 0x665   :  { %2681 = vsyncpa [#allocation10], 1 }

</bundles_post_ra>
